<compile_context>
chip_gen: v7x
topology: tpu7x:2x2x1
jax: 0.10.0
libtpu: 0.0.40
codegen_flags: <defaults>
</compile_context>

<pallas_src>
import functools

import jax
import jax.numpy as jnp
from jax.experimental import pallas as pl
from jax.experimental.pallas import tpu as pltpu


# --------------------------------------------------------------------------
# Fused Pallas kernel: encoder -> stacked LSTM -> logits head
# --------------------------------------------------------------------------
def _fused_rnn_kernel(T, B, H, C, L,
                      x_ref, enc_w_ref, enc_b_ref,
                      wih_ref, whh_ref, b_ref,
                      fc_w_ref, fc_b_ref,
                      logits_ref, hN_ref, cN_ref,
                      act_sc, gates_sc):
    # ---- notes_encoder: all timesteps at once --------------------------
    # (T*B, In) @ (In, H) + b  ->  activation slab kept in VMEM scratch
    act_sc[...] = (
        jnp.dot(x_ref[...], enc_w_ref[...], preferred_element_type=jnp.float32)
        + enc_b_ref[...]
    )

    # ---- stacked LSTM ---------------------------------------------------
    for layer in range(L):
        # Hoisted input projection (+ fused b_ih + b_hh) for every timestep:
        # one (T*B, H) @ (H, 4H) matmul instead of T tiny ones on the
        # serial critical path.
        gates_sc[...] = (
            jnp.dot(act_sc[...], wih_ref[layer],
                    preferred_element_type=jnp.float32)
            + b_ref[layer]
        )

        w_hh = whh_ref[layer]                       # (H, 4H), loaded once/layer
        h = jnp.zeros((B, H), jnp.float32)
        c = jnp.zeros((B, H), jnp.float32)

        for t in range(T):                          # serial recurrence, unrolled
            gates = gates_sc[t * B:(t + 1) * B, :] + jnp.dot(
                h, w_hh, preferred_element_type=jnp.float32)   # (B, 4H)

            # One whole-vreg sigmoid (4H = 128 lanes), then tanh on g slice.
            sg = jax.nn.sigmoid(gates)
            i_g = sg[:, 0 * H:1 * H]
            f_g = sg[:, 1 * H:2 * H]
            o_g = sg[:, 3 * H:4 * H]
            g_g = jnp.tanh(gates[:, 2 * H:3 * H])

            c = f_g * c + i_g * g_g
            h = o_g * jnp.tanh(c)

            # This layer's per-timestep output becomes next layer's input.
            act_sc[t * B:(t + 1) * B, :] = h

        # Final states written exactly once per layer.
        hN_ref[layer] = h
        cN_ref[layer] = c

    # ---- logits_fc: all timesteps at once -------------------------------
    logits_ref[...] = (
        jnp.dot(act_sc[...], fc_w_ref[...], preferred_element_type=jnp.float32)
        + fc_b_ref[...]
    )


# --------------------------------------------------------------------------
# Forward (mirrors the PyTorch module's forward)
# --------------------------------------------------------------------------
def rnn_forward(params, input_sequences, input_sequences_lengths, hidden=None):
    # TODO(synk): input_sequences_lengths is unused in the reference forward
    #             (no packing is performed there either).
    # TODO(synk): only hidden=None (zero initial state) is supported, matching
    #             how the reference module is called with its default.
    del input_sequences_lengths, hidden
    T, B, F = input_sequences.shape
    H = params["hidden_size"]
    C = params["num_classes"]
    L = params["n_layers"]

    kernel = functools.partial(_fused_rnn_kernel, T, B, H, C, L)

    logits2d, h_n, c_n = pl.pallas_call(
        kernel,
        out_shape=[
            jax.ShapeDtypeStruct((T * B, C), jnp.float32),   # logits slab
            jax.ShapeDtypeStruct((L, B, H), jnp.float32),    # final h
            jax.ShapeDtypeStruct((L, B, H), jnp.float32),    # final c
        ],
        scratch_shapes=[
            pltpu.VMEM((T * B, H), jnp.float32),             # activations
            pltpu.VMEM((T * B, 4 * H), jnp.float32),         # hoisted gates
        ],
    )(
        input_sequences.reshape(T * B, F),
        params["enc_w"], params["enc_b"],
        params["lstm_w_ih"], params["lstm_w_hh"], params["lstm_b"],
        params["fc_w"], params["fc_b"],
    )

    # transpose(0,1); stack (logits, 1-logits) on dim=3; view(-1, 2)
    logits_bt = jnp.transpose(logits2d.reshape(T, B, C), (1, 0, 2))   # (B,T,C)
    binary = jnp.stack([logits_bt, 1.0 - logits_bt], axis=3)          # (B,T,C,2)
    logits_flatten = binary.reshape(-1, 2)

    return logits_flatten, (h_n, c_n)


# --------------------------------------------------------------------------
# Pure-JAX reference (for correctness check)
# --------------------------------------------------------------------------
def rnn_reference(params, x_seq):
    T, B, _ = x_seq.shape
    H = params["hidden_size"]
    L = params["n_layers"]
    x = x_seq @ params["enc_w"] + params["enc_b"][0]
    hs, cs = [], []
    for l in range(L):
        w_ih = params["lstm_w_ih"][l]
        w_hh = params["lstm_w_hh"][l]
        b = params["lstm_b"][l, 0]

        def step(carry, x_t, w_ih=w_ih, w_hh=w_hh, b=b):
            h, c = carry
            gates = x_t @ w_ih + h @ w_hh + b
            i = jax.nn.sigmoid(gates[:, 0 * H:1 * H])
            f = jax.nn.sigmoid(gates[:, 1 * H:2 * H])
            g = jnp.tanh(gates[:, 2 * H:3 * H])
            o = jax.nn.sigmoid(gates[:, 3 * H:4 * H])
            c = f * c + i * g
            h = o * jnp.tanh(c)
            return (h, c), h

        init = (jnp.zeros((B, H), jnp.float32), jnp.zeros((B, H), jnp.float32))
        (h_n, c_n), ys = jax.lax.scan(step, init, x)
        x = ys
        hs.append(h_n)
        cs.append(c_n)
    logits = x @ params["fc_w"] + params["fc_b"][0]
    logits_bt = jnp.transpose(logits, (1, 0, 2))
    binary = jnp.stack([logits_bt, 1.0 - logits_bt], axis=3)
    return binary.reshape(-1, 2), (jnp.stack(hs, 0), jnp.stack(cs, 0))


# --------------------------------------------------------------------------
# Parameter construction (deterministic, PyTorch-style uniform init)
# --------------------------------------------------------------------------
def make_params(key, input_size, hidden_size, num_classes, n_layers):
    def uniform(key, shape, fan_in):
        bound = 1.0 / (fan_in ** 0.5)
        return jax.random.uniform(key, shape, jnp.float32, -bound, bound)

    keys = jax.random.split(key, 4 + 4 * n_layers)
    w_ih, w_hh, b = [], [], []
    for l in range(n_layers):
        k = keys[4 + 4 * l: 4 + 4 * (l + 1)]
        w_ih.append(uniform(k[0], (hidden_size, 4 * hidden_size), hidden_size))
        w_hh.append(uniform(k[1], (hidden_size, 4 * hidden_size), hidden_size))
        # b_ih + b_hh fused into a single (1, 4H) row
        b.append(uniform(k[2], (1, 4 * hidden_size), hidden_size)
                 + uniform(k[3], (1, 4 * hidden_size), hidden_size))

    return {
        "hidden_size": hidden_size,
        "num_classes": num_classes,
        "n_layers": n_layers,
        # Linear weights stored pre-transposed: (in, out)
        "enc_w": uniform(keys[0], (input_size, hidden_size), input_size),
        "enc_b": uniform(keys[1], (1, hidden_size), input_size),
        "fc_w": uniform(keys[2], (hidden_size, num_classes), hidden_size),
        "fc_b": uniform(keys[3], (1, num_classes), hidden_size),
        # Stacked per-layer LSTM weights (all resident in VMEM in the kernel)
        "lstm_w_ih": jnp.stack(w_ih),    # (L, H, 4H)
        "lstm_w_hh": jnp.stack(w_hh),    # (L, H, 4H)
        "lstm_b": jnp.stack(b),          # (L, 1, 4H)
    }


# --------------------------------------------------------------------------
if __name__ == "__main__":
    input_size, hidden_size, num_classes, n_layers = 12, 32, 16, 4
    T, B = 8, 2

    key = jax.random.PRNGKey(0)
    k_par, k_x = jax.random.split(key)
    params = make_params(k_par, input_size, hidden_size, num_classes, n_layers)

    input_sequences = jax.random.normal(k_x, (T, B, input_size), jnp.float32)
    input_sequences_lengths = jnp.full((B,), T, jnp.int32)

    logits_flat, (h_n, c_n) = rnn_forward(
        params, input_sequences, input_sequences_lengths)
    jax.block_until_ready((logits_flat, h_n, c_n))

    # sanity check against pure-JAX reference
    ref_logits, (ref_h, ref_c) = rnn_reference(params, input_sequences)
    assert logits_flat.shape == (B * T * num_classes, 2)
    assert h_n.shape == (n_layers, B, hidden_size)
    assert c_n.shape == (n_layers, B, hidden_size)
    assert jnp.allclose(logits_flat, ref_logits, atol=1e-2, rtol=1e-2)
    assert jnp.allclose(h_n, ref_h, atol=1e-2, rtol=1e-2)
    assert jnp.allclose(c_n, ref_c, atol=1e-2, rtol=1e-2)

    print("KERNEL_OK")
</pallas_src>

<mosaic_0001>
module attributes {stable_mosaic.version = 11 : i64} {
  func.func @_fused_rnn_kernel(%arg0: memref<16x12xf32, #tpu.memory_space<vmem>>, %arg1: memref<12x32xf32, #tpu.memory_space<vmem>>, %arg2: memref<1x32xf32, #tpu.memory_space<vmem>>, %arg3: memref<4x32x128xf32, #tpu.memory_space<vmem>>, %arg4: memref<4x32x128xf32, #tpu.memory_space<vmem>>, %arg5: memref<4x1x128xf32, #tpu.memory_space<vmem>>, %arg6: memref<32x16xf32, #tpu.memory_space<vmem>>, %arg7: memref<1x16xf32, #tpu.memory_space<vmem>>, %arg8: memref<16x16xf32, #tpu.memory_space<vmem>>, %arg9: memref<4x2x32xf32, #tpu.memory_space<vmem>>, %arg10: memref<4x2x32xf32, #tpu.memory_space<vmem>>, %arg11: memref<16x32xf32, #tpu.memory_space<vmem>>, %arg12: memref<16x128xf32, #tpu.memory_space<vmem>>) attributes {dimension_semantics = [], scalar_prefetch = 0 : i64, scratch_operands = 2 : i64, tpu.core_type = #tpu.core_type<tc>} {
    %c0 = arith.constant 0 : index
    %c0_0 = arith.constant 0 : index
    %0 = vector.load %arg0[%c0, %c0_0] : memref<16x12xf32, #tpu.memory_space<vmem>>, vector<16x12xf32>
    %c0_1 = arith.constant 0 : index
    %c0_2 = arith.constant 0 : index
    %1 = vector.load %arg1[%c0_1, %c0_2] : memref<12x32xf32, #tpu.memory_space<vmem>>, vector<12x32xf32>
    %cst = arith.constant dense<0.000000e+00> : vector<16x32xf32>
    %2 = tpu.matmul %0, %1, %cst {dimension_numbers = #tpu.dot_dimension_numbers<[1], [0], [0], [1], [0, 0, 1, 1], [], []>} : vector<16x12xf32>, vector<12x32xf32>, vector<16x32xf32> -> vector<16x32xf32>
    %c0_3 = arith.constant 0 : index
    %c0_4 = arith.constant 0 : index
    %3 = vector.load %arg2[%c0_3, %c0_4] : memref<1x32xf32, #tpu.memory_space<vmem>>, vector<1x32xf32>
    %4 = vector.broadcast %3 : vector<1x32xf32> to vector<16x32xf32>
    %5 = arith.addf %2, %4 : vector<16x32xf32>
    %c0_5 = arith.constant 0 : index
    %c0_6 = arith.constant 0 : index
    %6 = vector.load %arg11[%c0_5, %c0_6] : memref<16x32xf32, #tpu.memory_space<vmem>>, vector<16x32xf32>
    tpu.vector_store %arg11[%c0_5, %c0_6], %5 {strides = array<i32>} : memref<16x32xf32, #tpu.memory_space<vmem>>, vector<16x32xf32>,
    %c0_7 = arith.constant 0 : index
    %c0_8 = arith.constant 0 : index
    %7 = vector.load %arg11[%c0_7, %c0_8] : memref<16x32xf32, #tpu.memory_space<vmem>>, vector<16x32xf32>
    %c0_9 = arith.constant 0 : index
    %c0_10 = arith.constant 0 : index
    %c0_11 = arith.constant 0 : index
    %8 = vector.load %arg3[%c0_9, %c0_10, %c0_11] : memref<4x32x128xf32, #tpu.memory_space<vmem>>, vector<1x32x128xf32>
    %9 = vector.shape_cast %8 : vector<1x32x128xf32> to vector<32x128xf32>
    %cst_12 = arith.constant dense<0.000000e+00> : vector<16x128xf32>
    %10 = tpu.matmul %7, %9, %cst_12 {dimension_numbers = #tpu.dot_dimension_numbers<[1], [0], [0], [1], [0, 0, 1, 1], [], []>} : vector<16x32xf32>, vector<32x128xf32>, vector<16x128xf32> -> vector<16x128xf32>
    %c0_13 = arith.constant 0 : index
    %c0_14 = arith.constant 0 : index
    %c0_15 = arith.constant 0 : index
    %11 = vector.load %arg5[%c0_13, %c0_14, %c0_15] : memref<4x1x128xf32, #tpu.memory_space<vmem>>, vector<1x1x128xf32>
    %12 = vector.shape_cast %11 : vector<1x1x128xf32> to vector<1x128xf32>
    %13 = vector.broadcast %12 : vector<1x128xf32> to vector<16x128xf32>
    %14 = arith.addf %10, %13 : vector<16x128xf32>
    %c0_16 = arith.constant 0 : index
    %c0_17 = arith.constant 0 : index
    %15 = vector.load %arg12[%c0_16, %c0_17] : memref<16x128xf32, #tpu.memory_space<vmem>>, vector<16x128xf32>
    tpu.vector_store %arg12[%c0_16, %c0_17], %14 {strides = array<i32>} : memref<16x128xf32, #tpu.memory_space<vmem>>, vector<16x128xf32>,
    %c0_18 = arith.constant 0 : index
    %c0_19 = arith.constant 0 : index
    %c0_20 = arith.constant 0 : index
    %16 = vector.load %arg4[%c0_18, %c0_19, %c0_20] : memref<4x32x128xf32, #tpu.memory_space<vmem>>, vector<1x32x128xf32>
    %17 = vector.shape_cast %16 : vector<1x32x128xf32> to vector<32x128xf32>
    %cst_21 = arith.constant 0.000000e+00 : f32
    %18 = vector.broadcast %cst_21 : f32 to vector<2x32xf32>
    %cst_22 = arith.constant 0.000000e+00 : f32
    %19 = vector.broadcast %cst_22 : f32 to vector<2x32xf32>
    %c0_23 = arith.constant 0 : index
    %c0_24 = arith.constant 0 : index
    %20 = vector.load %arg12[%c0_23, %c0_24] : memref<16x128xf32, #tpu.memory_space<vmem>>, vector<2x128xf32>
    %cst_25 = arith.constant dense<0.000000e+00> : vector<2x128xf32>
    %21 = tpu.matmul %18, %17, %cst_25 {dimension_numbers = #tpu.dot_dimension_numbers<[1], [0], [0], [1], [0, 0, 1, 1], [], []>} : vector<2x32xf32>, vector<32x128xf32>, vector<2x128xf32> -> vector<2x128xf32>
    %22 = arith.addf %20, %21 : vector<2x128xf32>
    %23 = arith.negf %22 : vector<2x128xf32>
    %24 = math.exp %23 : vector<2x128xf32>
    %cst_26 = arith.constant 1.000000e+00 : f32
    %25 = vector.broadcast %cst_26 : f32 to vector<2x128xf32>
    %26 = arith.addf %25, %24 : vector<2x128xf32>
    %27 = arith.divf %25, %26 : vector<2x128xf32>
    %28 = vector.extract_strided_slice %27 {offsets = [0, 0], sizes = [2, 32], strides = [1, 1]} : vector<2x128xf32> to vector<2x32xf32>
    %29 = vector.extract_strided_slice %27 {offsets = [0, 32], sizes = [2, 32], strides = [1, 1]} : vector<2x128xf32> to vector<2x32xf32>
    %30 = vector.extract_strided_slice %27 {offsets = [0, 96], sizes = [2, 32], strides = [1, 1]} : vector<2x128xf32> to vector<2x32xf32>
    %31 = vector.extract_strided_slice %22 {offsets = [0, 64], sizes = [2, 32], strides = [1, 1]} : vector<2x128xf32> to vector<2x32xf32>
    %32 = math.tanh %31 : vector<2x32xf32>
    %33 = arith.mulf %29, %19 : vector<2x32xf32>
    %34 = arith.mulf %28, %32 : vector<2x32xf32>
    %35 = arith.addf %33, %34 : vector<2x32xf32>
    %36 = math.tanh %35 : vector<2x32xf32>
    %37 = arith.mulf %30, %36 : vector<2x32xf32>
    %c0_27 = arith.constant 0 : index
    %c0_28 = arith.constant 0 : index
    %38 = vector.load %arg11[%c0_27, %c0_28] : memref<16x32xf32, #tpu.memory_space<vmem>>, vector<2x32xf32>
    tpu.vector_store %arg11[%c0_27, %c0_28], %37 {strides = array<i32>} : memref<16x32xf32, #tpu.memory_space<vmem>>, vector<2x32xf32>,
    %c2 = arith.constant 2 : index
    %c0_29 = arith.constant 0 : index
    %39 = vector.load %arg12[%c2, %c0_29] : memref<16x128xf32, #tpu.memory_space<vmem>>, vector<2x128xf32>
    %cst_30 = arith.constant dense<0.000000e+00> : vector<2x128xf32>
    %40 = tpu.matmul %37, %17, %cst_30 {dimension_numbers = #tpu.dot_dimension_numbers<[1], [0], [0], [1], [0, 0, 1, 1], [], []>} : vector<2x32xf32>, vector<32x128xf32>, vector<2x128xf32> -> vector<2x128xf32>
    %41 = arith.addf %39, %40 : vector<2x128xf32>
    %42 = arith.negf %41 : vector<2x128xf32>
    %43 = math.exp %42 : vector<2x128xf32>
    %cst_31 = arith.constant 1.000000e+00 : f32
    %44 = vector.broadcast %cst_31 : f32 to vector<2x128xf32>
    %45 = arith.addf %44, %43 : vector<2x128xf32>
    %46 = arith.divf %44, %45 : vector<2x128xf32>
    %47 = vector.extract_strided_slice %46 {offsets = [0, 0], sizes = [2, 32], strides = [1, 1]} : vector<2x128xf32> to vector<2x32xf32>
    %48 = vector.extract_strided_slice %46 {offsets = [0, 32], sizes = [2, 32], strides = [1, 1]} : vector<2x128xf32> to vector<2x32xf32>
    %49 = vector.extract_strided_slice %46 {offsets = [0, 96], sizes = [2, 32], strides = [1, 1]} : vector<2x128xf32> to vector<2x32xf32>
    %50 = vector.extract_strided_slice %41 {offsets = [0, 64], sizes = [2, 32], strides = [1, 1]} : vector<2x128xf32> to vector<2x32xf32>
    %51 = math.tanh %50 : vector<2x32xf32>
    %52 = arith.mulf %48, %35 : vector<2x32xf32>
    %53 = arith.mulf %47, %51 : vector<2x32xf32>
    %54 = arith.addf %52, %53 : vector<2x32xf32>
    %55 = math.tanh %54 : vector<2x32xf32>
    %56 = arith.mulf %49, %55 : vector<2x32xf32>
    %c2_32 = arith.constant 2 : index
    %c0_33 = arith.constant 0 : index
    %57 = vector.load %arg11[%c2_32, %c0_33] : memref<16x32xf32, #tpu.memory_space<vmem>>, vector<2x32xf32>
    tpu.vector_store %arg11[%c2_32, %c0_33], %56 {strides = array<i32>} : memref<16x32xf32, #tpu.memory_space<vmem>>, vector<2x32xf32>,
    %c4 = arith.constant 4 : index
    %c0_34 = arith.constant 0 : index
    %58 = vector.load %arg12[%c4, %c0_34] : memref<16x128xf32, #tpu.memory_space<vmem>>, vector<2x128xf32>
    %cst_35 = arith.constant dense<0.000000e+00> : vector<2x128xf32>
    %59 = tpu.matmul %56, %17, %cst_35 {dimension_numbers = #tpu.dot_dimension_numbers<[1], [0], [0], [1], [0, 0, 1, 1], [], []>} : vector<2x32xf32>, vector<32x128xf32>, vector<2x128xf32> -> vector<2x128xf32>
    %60 = arith.addf %58, %59 : vector<2x128xf32>
    %61 = arith.negf %60 : vector<2x128xf32>
    %62 = math.exp %61 : vector<2x128xf32>
    %cst_36 = arith.constant 1.000000e+00 : f32
    %63 = vector.broadcast %cst_36 : f32 to vector<2x128xf32>
    %64 = arith.addf %63, %62 : vector<2x128xf32>
    %65 = arith.divf %63, %64 : vector<2x128xf32>
    %66 = vector.extract_strided_slice %65 {offsets = [0, 0], sizes = [2, 32], strides = [1, 1]} : vector<2x128xf32> to vector<2x32xf32>
    %67 = vector.extract_strided_slice %65 {offsets = [0, 32], sizes = [2, 32], strides = [1, 1]} : vector<2x128xf32> to vector<2x32xf32>
    %68 = vector.extract_strided_slice %65 {offsets = [0, 96], sizes = [2, 32], strides = [1, 1]} : vector<2x128xf32> to vector<2x32xf32>
    %69 = vector.extract_strided_slice %60 {offsets = [0, 64], sizes = [2, 32], strides = [1, 1]} : vector<2x128xf32> to vector<2x32xf32>
    %70 = math.tanh %69 : vector<2x32xf32>
    %71 = arith.mulf %67, %54 : vector<2x32xf32>
    %72 = arith.mulf %66, %70 : vector<2x32xf32>
    %73 = arith.addf %71, %72 : vector<2x32xf32>
    %74 = math.tanh %73 : vector<2x32xf32>
    %75 = arith.mulf %68, %74 : vector<2x32xf32>
    %c4_37 = arith.constant 4 : index
    %c0_38 = arith.constant 0 : index
    %76 = vector.load %arg11[%c4_37, %c0_38] : memref<16x32xf32, #tpu.memory_space<vmem>>, vector<2x32xf32>
    tpu.vector_store %arg11[%c4_37, %c0_38], %75 {strides = array<i32>} : memref<16x32xf32, #tpu.memory_space<vmem>>, vector<2x32xf32>,
    %c6 = arith.constant 6 : index
    %c0_39 = arith.constant 0 : index
    %77 = vector.load %arg12[%c6, %c0_39] : memref<16x128xf32, #tpu.memory_space<vmem>>, vector<2x128xf32>
    %cst_40 = arith.constant dense<0.000000e+00> : vector<2x128xf32>
    %78 = tpu.matmul %75, %17, %cst_40 {dimension_numbers = #tpu.dot_dimension_numbers<[1], [0], [0], [1], [0, 0, 1, 1], [], []>} : vector<2x32xf32>, vector<32x128xf32>, vector<2x128xf32> -> vector<2x128xf32>
    %79 = arith.addf %77, %78 : vector<2x128xf32>
    %80 = arith.negf %79 : vector<2x128xf32>
    %81 = math.exp %80 : vector<2x128xf32>
    %cst_41 = arith.constant 1.000000e+00 : f32
    %82 = vector.broadcast %cst_41 : f32 to vector<2x128xf32>
    %83 = arith.addf %82, %81 : vector<2x128xf32>
    %84 = arith.divf %82, %83 : vector<2x128xf32>
    %85 = vector.extract_strided_slice %84 {offsets = [0, 0], sizes = [2, 32], strides = [1, 1]} : vector<2x128xf32> to vector<2x32xf32>
    %86 = vector.extract_strided_slice %84 {offsets = [0, 32], sizes = [2, 32], strides = [1, 1]} : vector<2x128xf32> to vector<2x32xf32>
    %87 = vector.extract_strided_slice %84 {offsets = [0, 96], sizes = [2, 32], strides = [1, 1]} : vector<2x128xf32> to vector<2x32xf32>
    %88 = vector.extract_strided_slice %79 {offsets = [0, 64], sizes = [2, 32], strides = [1, 1]} : vector<2x128xf32> to vector<2x32xf32>
    %89 = math.tanh %88 : vector<2x32xf32>
    %90 = arith.mulf %86, %73 : vector<2x32xf32>
    %91 = arith.mulf %85, %89 : vector<2x32xf32>
    %92 = arith.addf %90, %91 : vector<2x32xf32>
    %93 = math.tanh %92 : vector<2x32xf32>
    %94 = arith.mulf %87, %93 : vector<2x32xf32>
    %c6_42 = arith.constant 6 : index
    %c0_43 = arith.constant 0 : index
    %95 = vector.load %arg11[%c6_42, %c0_43] : memref<16x32xf32, #tpu.memory_space<vmem>>, vector<2x32xf32>
    tpu.vector_store %arg11[%c6_42, %c0_43], %94 {strides = array<i32>} : memref<16x32xf32, #tpu.memory_space<vmem>>, vector<2x32xf32>,
    %c8 = arith.constant 8 : index
    %c0_44 = arith.constant 0 : index
    %96 = vector.load %arg12[%c8, %c0_44] : memref<16x128xf32, #tpu.memory_space<vmem>>, vector<2x128xf32>
    %cst_45 = arith.constant dense<0.000000e+00> : vector<2x128xf32>
    %97 = tpu.matmul %94, %17, %cst_45 {dimension_numbers = #tpu.dot_dimension_numbers<[1], [0], [0], [1], [0, 0, 1, 1], [], []>} : vector<2x32xf32>, vector<32x128xf32>, vector<2x128xf32> -> vector<2x128xf32>
    %98 = arith.addf %96, %97 : vector<2x128xf32>
    %99 = arith.negf %98 : vector<2x128xf32>
    %100 = math.exp %99 : vector<2x128xf32>
    %cst_46 = arith.constant 1.000000e+00 : f32
    %101 = vector.broadcast %cst_46 : f32 to vector<2x128xf32>
    %102 = arith.addf %101, %100 : vector<2x128xf32>
    %103 = arith.divf %101, %102 : vector<2x128xf32>
    %104 = vector.extract_strided_slice %103 {offsets = [0, 0], sizes = [2, 32], strides = [1, 1]} : vector<2x128xf32> to vector<2x32xf32>
    %105 = vector.extract_strided_slice %103 {offsets = [0, 32], sizes = [2, 32], strides = [1, 1]} : vector<2x128xf32> to vector<2x32xf32>
    %106 = vector.extract_strided_slice %103 {offsets = [0, 96], sizes = [2, 32], strides = [1, 1]} : vector<2x128xf32> to vector<2x32xf32>
    %107 = vector.extract_strided_slice %98 {offsets = [0, 64], sizes = [2, 32], strides = [1, 1]} : vector<2x128xf32> to vector<2x32xf32>
    %108 = math.tanh %107 : vector<2x32xf32>
    %109 = arith.mulf %105, %92 : vector<2x32xf32>
    %110 = arith.mulf %104, %108 : vector<2x32xf32>
    %111 = arith.addf %109, %110 : vector<2x32xf32>
    %112 = math.tanh %111 : vector<2x32xf32>
    %113 = arith.mulf %106, %112 : vector<2x32xf32>
    %c8_47 = arith.constant 8 : index
    %c0_48 = arith.constant 0 : index
    %114 = vector.load %arg11[%c8_47, %c0_48] : memref<16x32xf32, #tpu.memory_space<vmem>>, vector<2x32xf32>
    tpu.vector_store %arg11[%c8_47, %c0_48], %113 {strides = array<i32>} : memref<16x32xf32, #tpu.memory_space<vmem>>, vector<2x32xf32>,
    %c10 = arith.constant 10 : index
    %c0_49 = arith.constant 0 : index
    %115 = vector.load %arg12[%c10, %c0_49] : memref<16x128xf32, #tpu.memory_space<vmem>>, vector<2x128xf32>
    %cst_50 = arith.constant dense<0.000000e+00> : vector<2x128xf32>
    %116 = tpu.matmul %113, %17, %cst_50 {dimension_numbers = #tpu.dot_dimension_numbers<[1], [0], [0], [1], [0, 0, 1, 1], [], []>} : vector<2x32xf32>, vector<32x128xf32>, vector<2x128xf32> -> vector<2x128xf32>
    %117 = arith.addf %115, %116 : vector<2x128xf32>
    %118 = arith.negf %117 : vector<2x128xf32>
    %119 = math.exp %118 : vector<2x128xf32>
    %cst_51 = arith.constant 1.000000e+00 : f32
    %120 = vector.broadcast %cst_51 : f32 to vector<2x128xf32>
    %121 = arith.addf %120, %119 : vector<2x128xf32>
    %122 = arith.divf %120, %121 : vector<2x128xf32>
    %123 = vector.extract_strided_slice %122 {offsets = [0, 0], sizes = [2, 32], strides = [1, 1]} : vector<2x128xf32> to vector<2x32xf32>
    %124 = vector.extract_strided_slice %122 {offsets = [0, 32], sizes = [2, 32], strides = [1, 1]} : vector<2x128xf32> to vector<2x32xf32>
    %125 = vector.extract_strided_slice %122 {offsets = [0, 96], sizes = [2, 32], strides = [1, 1]} : vector<2x128xf32> to vector<2x32xf32>
    %126 = vector.extract_strided_slice %117 {offsets = [0, 64], sizes = [2, 32], strides = [1, 1]} : vector<2x128xf32> to vector<2x32xf32>
    %127 = math.tanh %126 : vector<2x32xf32>
    %128 = arith.mulf %124, %111 : vector<2x32xf32>
    %129 = arith.mulf %123, %127 : vector<2x32xf32>
    %130 = arith.addf %128, %129 : vector<2x32xf32>
    %131 = math.tanh %130 : vector<2x32xf32>
    %132 = arith.mulf %125, %131 : vector<2x32xf32>
    %c10_52 = arith.constant 10 : index
    %c0_53 = arith.constant 0 : index
    %133 = vector.load %arg11[%c10_52, %c0_53] : memref<16x32xf32, #tpu.memory_space<vmem>>, vector<2x32xf32>
    tpu.vector_store %arg11[%c10_52, %c0_53], %132 {strides = array<i32>} : memref<16x32xf32, #tpu.memory_space<vmem>>, vector<2x32xf32>,
    %c12 = arith.constant 12 : index
    %c0_54 = arith.constant 0 : index
    %134 = vector.load %arg12[%c12, %c0_54] : memref<16x128xf32, #tpu.memory_space<vmem>>, vector<2x128xf32>
    %cst_55 = arith.constant dense<0.000000e+00> : vector<2x128xf32>
    %135 = tpu.matmul %132, %17, %cst_55 {dimension_numbers = #tpu.dot_dimension_numbers<[1], [0], [0], [1], [0, 0, 1, 1], [], []>} : vector<2x32xf32>, vector<32x128xf32>, vector<2x128xf32> -> vector<2x128xf32>
    %136 = arith.addf %134, %135 : vector<2x128xf32>
    %137 = arith.negf %136 : vector<2x128xf32>
    %138 = math.exp %137 : vector<2x128xf32>
    %cst_56 = arith.constant 1.000000e+00 : f32
    %139 = vector.broadcast %cst_56 : f32 to vector<2x128xf32>
    %140 = arith.addf %139, %138 : vector<2x128xf32>
    %141 = arith.divf %139, %140 : vector<2x128xf32>
    %142 = vector.extract_strided_slice %141 {offsets = [0, 0], sizes = [2, 32], strides = [1, 1]} : vector<2x128xf32> to vector<2x32xf32>
    %143 = vector.extract_strided_slice %141 {offsets = [0, 32], sizes = [2, 32], strides = [1, 1]} : vector<2x128xf32> to vector<2x32xf32>
    %144 = vector.extract_strided_slice %141 {offsets = [0, 96], sizes = [2, 32], strides = [1, 1]} : vector<2x128xf32> to vector<2x32xf32>
    %145 = vector.extract_strided_slice %136 {offsets = [0, 64], sizes = [2, 32], strides = [1, 1]} : vector<2x128xf32> to vector<2x32xf32>
    %146 = math.tanh %145 : vector<2x32xf32>
    %147 = arith.mulf %143, %130 : vector<2x32xf32>
    %148 = arith.mulf %142, %146 : vector<2x32xf32>
    %149 = arith.addf %147, %148 : vector<2x32xf32>
    %150 = math.tanh %149 : vector<2x32xf32>
    %151 = arith.mulf %144, %150 : vector<2x32xf32>
    %c12_57 = arith.constant 12 : index
    %c0_58 = arith.constant 0 : index
    %152 = vector.load %arg11[%c12_57, %c0_58] : memref<16x32xf32, #tpu.memory_space<vmem>>, vector<2x32xf32>
    tpu.vector_store %arg11[%c12_57, %c0_58], %151 {strides = array<i32>} : memref<16x32xf32, #tpu.memory_space<vmem>>, vector<2x32xf32>,
    %c14 = arith.constant 14 : index
    %c0_59 = arith.constant 0 : index
    %153 = vector.load %arg12[%c14, %c0_59] : memref<16x128xf32, #tpu.memory_space<vmem>>, vector<2x128xf32>
    %cst_60 = arith.constant dense<0.000000e+00> : vector<2x128xf32>
    %154 = tpu.matmul %151, %17, %cst_60 {dimension_numbers = #tpu.dot_dimension_numbers<[1], [0], [0], [1], [0, 0, 1, 1], [], []>} : vector<2x32xf32>, vector<32x128xf32>, vector<2x128xf32> -> vector<2x128xf32>
    %155 = arith.addf %153, %154 : vector<2x128xf32>
    %156 = arith.negf %155 : vector<2x128xf32>
    %157 = math.exp %156 : vector<2x128xf32>
    %cst_61 = arith.constant 1.000000e+00 : f32
    %158 = vector.broadcast %cst_61 : f32 to vector<2x128xf32>
    %159 = arith.addf %158, %157 : vector<2x128xf32>
    %160 = arith.divf %158, %159 : vector<2x128xf32>
    %161 = vector.extract_strided_slice %160 {offsets = [0, 0], sizes = [2, 32], strides = [1, 1]} : vector<2x128xf32> to vector<2x32xf32>
    %162 = vector.extract_strided_slice %160 {offsets = [0, 32], sizes = [2, 32], strides = [1, 1]} : vector<2x128xf32> to vector<2x32xf32>
    %163 = vector.extract_strided_slice %160 {offsets = [0, 96], sizes = [2, 32], strides = [1, 1]} : vector<2x128xf32> to vector<2x32xf32>
    %164 = vector.extract_strided_slice %155 {offsets = [0, 64], sizes = [2, 32], strides = [1, 1]} : vector<2x128xf32> to vector<2x32xf32>
    %165 = math.tanh %164 : vector<2x32xf32>
    %166 = arith.mulf %162, %149 : vector<2x32xf32>
    %167 = arith.mulf %161, %165 : vector<2x32xf32>
    %168 = arith.addf %166, %167 : vector<2x32xf32>
    %169 = math.tanh %168 : vector<2x32xf32>
    %170 = arith.mulf %163, %169 : vector<2x32xf32>
    %c14_62 = arith.constant 14 : index
    %c0_63 = arith.constant 0 : index
    %171 = vector.load %arg11[%c14_62, %c0_63] : memref<16x32xf32, #tpu.memory_space<vmem>>, vector<2x32xf32>
    tpu.vector_store %arg11[%c14_62, %c0_63], %170 {strides = array<i32>} : memref<16x32xf32, #tpu.memory_space<vmem>>, vector<2x32xf32>,
    %c0_64 = arith.constant 0 : index
    %c0_65 = arith.constant 0 : index
    %c0_66 = arith.constant 0 : index
    %172 = vector.load %arg9[%c0_64, %c0_65, %c0_66] : memref<4x2x32xf32, #tpu.memory_space<vmem>>, vector<1x2x32xf32>
    %173 = vector.shape_cast %172 : vector<1x2x32xf32> to vector<2x32xf32>
    %174 = vector.shape_cast %170 : vector<2x32xf32> to vector<1x2x32xf32>
    tpu.vector_store %arg9[%c0_64, %c0_65, %c0_66], %174 {strides = array<i32>} : memref<4x2x32xf32, #tpu.memory_space<vmem>>, vector<1x2x32xf32>,
    %c0_67 = arith.constant 0 : index
    %c0_68 = arith.constant 0 : index
    %c0_69 = arith.constant 0 : index
    %175 = vector.load %arg10[%c0_67, %c0_68, %c0_69] : memref<4x2x32xf32, #tpu.memory_space<vmem>>, vector<1x2x32xf32>
    %176 = vector.shape_cast %175 : vector<1x2x32xf32> to vector<2x32xf32>
    %177 = vector.shape_cast %168 : vector<2x32xf32> to vector<1x2x32xf32>
    tpu.vector_store %arg10[%c0_67, %c0_68, %c0_69], %177 {strides = array<i32>} : memref<4x2x32xf32, #tpu.memory_space<vmem>>, vector<1x2x32xf32>,
    %c0_70 = arith.constant 0 : index
    %c0_71 = arith.constant 0 : index
    %178 = vector.load %arg11[%c0_70, %c0_71] : memref<16x32xf32, #tpu.memory_space<vmem>>, vector<16x32xf32>
    %c1 = arith.constant 1 : index
    %c0_72 = arith.constant 0 : index
    %c0_73 = arith.constant 0 : index
    %179 = vector.load %arg3[%c1, %c0_72, %c0_73] : memref<4x32x128xf32, #tpu.memory_space<vmem>>, vector<1x32x128xf32>
    %180 = vector.shape_cast %179 : vector<1x32x128xf32> to vector<32x128xf32>
    %cst_74 = arith.constant dense<0.000000e+00> : vector<16x128xf32>
    %181 = tpu.matmul %178, %180, %cst_74 {dimension_numbers = #tpu.dot_dimension_numbers<[1], [0], [0], [1], [0, 0, 1, 1], [], []>} : vector<16x32xf32>, vector<32x128xf32>, vector<16x128xf32> -> vector<16x128xf32>
    %c1_75 = arith.constant 1 : index
    %c0_76 = arith.constant 0 : index
    %c0_77 = arith.constant 0 : index
    %182 = vector.load %arg5[%c1_75, %c0_76, %c0_77] : memref<4x1x128xf32, #tpu.memory_space<vmem>>, vector<1x1x128xf32>
    %183 = vector.shape_cast %182 : vector<1x1x128xf32> to vector<1x128xf32>
    %184 = vector.broadcast %183 : vector<1x128xf32> to vector<16x128xf32>
    %185 = arith.addf %181, %184 : vector<16x128xf32>
    %c0_78 = arith.constant 0 : index
    %c0_79 = arith.constant 0 : index
    %186 = vector.load %arg12[%c0_78, %c0_79] : memref<16x128xf32, #tpu.memory_space<vmem>>, vector<16x128xf32>
    tpu.vector_store %arg12[%c0_78, %c0_79], %185 {strides = array<i32>} : memref<16x128xf32, #tpu.memory_space<vmem>>, vector<16x128xf32>,
    %c1_80 = arith.constant 1 : index
    %c0_81 = arith.constant 0 : index
    %c0_82 = arith.constant 0 : index
    %187 = vector.load %arg4[%c1_80, %c0_81, %c0_82] : memref<4x32x128xf32, #tpu.memory_space<vmem>>, vector<1x32x128xf32>
    %188 = vector.shape_cast %187 : vector<1x32x128xf32> to vector<32x128xf32>
    %cst_83 = arith.constant 0.000000e+00 : f32
    %189 = vector.broadcast %cst_83 : f32 to vector<2x32xf32>
    %cst_84 = arith.constant 0.000000e+00 : f32
    %190 = vector.broadcast %cst_84 : f32 to vector<2x32xf32>
    %c0_85 = arith.constant 0 : index
    %c0_86 = arith.constant 0 : index
    %191 = vector.load %arg12[%c0_85, %c0_86] : memref<16x128xf32, #tpu.memory_space<vmem>>, vector<2x128xf32>
    %cst_87 = arith.constant dense<0.000000e+00> : vector<2x128xf32>
    %192 = tpu.matmul %189, %188, %cst_87 {dimension_numbers = #tpu.dot_dimension_numbers<[1], [0], [0], [1], [0, 0, 1, 1], [], []>} : vector<2x32xf32>, vector<32x128xf32>, vector<2x128xf32> -> vector<2x128xf32>
    %193 = arith.addf %191, %192 : vector<2x128xf32>
    %194 = arith.negf %193 : vector<2x128xf32>
    %195 = math.exp %194 : vector<2x128xf32>
    %cst_88 = arith.constant 1.000000e+00 : f32
    %196 = vector.broadcast %cst_88 : f32 to vector<2x128xf32>
    %197 = arith.addf %196, %195 : vector<2x128xf32>
    %198 = arith.divf %196, %197 : vector<2x128xf32>
    %199 = vector.extract_strided_slice %198 {offsets = [0, 0], sizes = [2, 32], strides = [1, 1]} : vector<2x128xf32> to vector<2x32xf32>
    %200 = vector.extract_strided_slice %198 {offsets = [0, 32], sizes = [2, 32], strides = [1, 1]} : vector<2x128xf32> to vector<2x32xf32>
    %201 = vector.extract_strided_slice %198 {offsets = [0, 96], sizes = [2, 32], strides = [1, 1]} : vector<2x128xf32> to vector<2x32xf32>
    %202 = vector.extract_strided_slice %193 {offsets = [0, 64], sizes = [2, 32], strides = [1, 1]} : vector<2x128xf32> to vector<2x32xf32>
    %203 = math.tanh %202 : vector<2x32xf32>
    %204 = arith.mulf %200, %190 : vector<2x32xf32>
    %205 = arith.mulf %199, %203 : vector<2x32xf32>
    %206 = arith.addf %204, %205 : vector<2x32xf32>
    %207 = math.tanh %206 : vector<2x32xf32>
    %208 = arith.mulf %201, %207 : vector<2x32xf32>
    %c0_89 = arith.constant 0 : index
    %c0_90 = arith.constant 0 : index
    %209 = vector.load %arg11[%c0_89, %c0_90] : memref<16x32xf32, #tpu.memory_space<vmem>>, vector<2x32xf32>
    tpu.vector_store %arg11[%c0_89, %c0_90], %208 {strides = array<i32>} : memref<16x32xf32, #tpu.memory_space<vmem>>, vector<2x32xf32>,
    %c2_91 = arith.constant 2 : index
    %c0_92 = arith.constant 0 : index
    %210 = vector.load %arg12[%c2_91, %c0_92] : memref<16x128xf32, #tpu.memory_space<vmem>>, vector<2x128xf32>
    %cst_93 = arith.constant dense<0.000000e+00> : vector<2x128xf32>
    %211 = tpu.matmul %208, %188, %cst_93 {dimension_numbers = #tpu.dot_dimension_numbers<[1], [0], [0], [1], [0, 0, 1, 1], [], []>} : vector<2x32xf32>, vector<32x128xf32>, vector<2x128xf32> -> vector<2x128xf32>
    %212 = arith.addf %210, %211 : vector<2x128xf32>
    %213 = arith.negf %212 : vector<2x128xf32>
    %214 = math.exp %213 : vector<2x128xf32>
    %cst_94 = arith.constant 1.000000e+00 : f32
    %215 = vector.broadcast %cst_94 : f32 to vector<2x128xf32>
    %216 = arith.addf %215, %214 : vector<2x128xf32>
    %217 = arith.divf %215, %216 : vector<2x128xf32>
    %218 = vector.extract_strided_slice %217 {offsets = [0, 0], sizes = [2, 32], strides = [1, 1]} : vector<2x128xf32> to vector<2x32xf32>
    %219 = vector.extract_strided_slice %217 {offsets = [0, 32], sizes = [2, 32], strides = [1, 1]} : vector<2x128xf32> to vector<2x32xf32>
    %220 = vector.extract_strided_slice %217 {offsets = [0, 96], sizes = [2, 32], strides = [1, 1]} : vector<2x128xf32> to vector<2x32xf32>
    %221 = vector.extract_strided_slice %212 {offsets = [0, 64], sizes = [2, 32], strides = [1, 1]} : vector<2x128xf32> to vector<2x32xf32>
    %222 = math.tanh %221 : vector<2x32xf32>
    %223 = arith.mulf %219, %206 : vector<2x32xf32>
    %224 = arith.mulf %218, %222 : vector<2x32xf32>
    %225 = arith.addf %223, %224 : vector<2x32xf32>
    %226 = math.tanh %225 : vector<2x32xf32>
    %227 = arith.mulf %220, %226 : vector<2x32xf32>
    %c2_95 = arith.constant 2 : index
    %c0_96 = arith.constant 0 : index
    %228 = vector.load %arg11[%c2_95, %c0_96] : memref<16x32xf32, #tpu.memory_space<vmem>>, vector<2x32xf32>
    tpu.vector_store %arg11[%c2_95, %c0_96], %227 {strides = array<i32>} : memref<16x32xf32, #tpu.memory_space<vmem>>, vector<2x32xf32>,
    %c4_97 = arith.constant 4 : index
    %c0_98 = arith.constant 0 : index
    %229 = vector.load %arg12[%c4_97, %c0_98] : memref<16x128xf32, #tpu.memory_space<vmem>>, vector<2x128xf32>
    %cst_99 = arith.constant dense<0.000000e+00> : vector<2x128xf32>
    %230 = tpu.matmul %227, %188, %cst_99 {dimension_numbers = #tpu.dot_dimension_numbers<[1], [0], [0], [1], [0, 0, 1, 1], [], []>} : vector<2x32xf32>, vector<32x128xf32>, vector<2x128xf32> -> vector<2x128xf32>
    %231 = arith.addf %229, %230 : vector<2x128xf32>
    %232 = arith.negf %231 : vector<2x128xf32>
    %233 = math.exp %232 : vector<2x128xf32>
    %cst_100 = arith.constant 1.000000e+00 : f32
    %234 = vector.broadcast %cst_100 : f32 to vector<2x128xf32>
    %235 = arith.addf %234, %233 : vector<2x128xf32>
    %236 = arith.divf %234, %235 : vector<2x128xf32>
    %237 = vector.extract_strided_slice %236 {offsets = [0, 0], sizes = [2, 32], strides = [1, 1]} : vector<2x128xf32> to vector<2x32xf32>
    %238 = vector.extract_strided_slice %236 {offsets = [0, 32], sizes = [2, 32], strides = [1, 1]} : vector<2x128xf32> to vector<2x32xf32>
    %239 = vector.extract_strided_slice %236 {offsets = [0, 96], sizes = [2, 32], strides = [1, 1]} : vector<2x128xf32> to vector<2x32xf32>
    %240 = vector.extract_strided_slice %231 {offsets = [0, 64], sizes = [2, 32], strides = [1, 1]} : vector<2x128xf32> to vector<2x32xf32>
    %241 = math.tanh %240 : vector<2x32xf32>
    %242 = arith.mulf %238, %225 : vector<2x32xf32>
    %243 = arith.mulf %237, %241 : vector<2x32xf32>
    %244 = arith.addf %242, %243 : vector<2x32xf32>
    %245 = math.tanh %244 : vector<2x32xf32>
    %246 = arith.mulf %239, %245 : vector<2x32xf32>
    %c4_101 = arith.constant 4 : index
    %c0_102 = arith.constant 0 : index
    %247 = vector.load %arg11[%c4_101, %c0_102] : memref<16x32xf32, #tpu.memory_space<vmem>>, vector<2x32xf32>
    tpu.vector_store %arg11[%c4_101, %c0_102], %246 {strides = array<i32>} : memref<16x32xf32, #tpu.memory_space<vmem>>, vector<2x32xf32>,
    %c6_103 = arith.constant 6 : index
    %c0_104 = arith.constant 0 : index
    %248 = vector.load %arg12[%c6_103, %c0_104] : memref<16x128xf32, #tpu.memory_space<vmem>>, vector<2x128xf32>
    %cst_105 = arith.constant dense<0.000000e+00> : vector<2x128xf32>
    %249 = tpu.matmul %246, %188, %cst_105 {dimension_numbers = #tpu.dot_dimension_numbers<[1], [0], [0], [1], [0, 0, 1, 1], [], []>} : vector<2x32xf32>, vector<32x128xf32>, vector<2x128xf32> -> vector<2x128xf32>
    %250 = arith.addf %248, %249 : vector<2x128xf32>
    %251 = arith.negf %250 : vector<2x128xf32>
    %252 = math.exp %251 : vector<2x128xf32>
    %cst_106 = arith.constant 1.000000e+00 : f32
    %253 = vector.broadcast %cst_106 : f32 to vector<2x128xf32>
    %254 = arith.addf %253, %252 : vector<2x128xf32>
    %255 = arith.divf %253, %254 : vector<2x128xf32>
    %256 = vector.extract_strided_slice %255 {offsets = [0, 0], sizes = [2, 32], strides = [1, 1]} : vector<2x128xf32> to vector<2x32xf32>
    %257 = vector.extract_strided_slice %255 {offsets = [0, 32], sizes = [2, 32], strides = [1, 1]} : vector<2x128xf32> to vector<2x32xf32>
    %258 = vector.extract_strided_slice %255 {offsets = [0, 96], sizes = [2, 32], strides = [1, 1]} : vector<2x128xf32> to vector<2x32xf32>
    %259 = vector.extract_strided_slice %250 {offsets = [0, 64], sizes = [2, 32], strides = [1, 1]} : vector<2x128xf32> to vector<2x32xf32>
    %260 = math.tanh %259 : vector<2x32xf32>
    %261 = arith.mulf %257, %244 : vector<2x32xf32>
    %262 = arith.mulf %256, %260 : vector<2x32xf32>
    %263 = arith.addf %261, %262 : vector<2x32xf32>
    %264 = math.tanh %263 : vector<2x32xf32>
    %265 = arith.mulf %258, %264 : vector<2x32xf32>
    %c6_107 = arith.constant 6 : index
    %c0_108 = arith.constant 0 : index
    %266 = vector.load %arg11[%c6_107, %c0_108] : memref<16x32xf32, #tpu.memory_space<vmem>>, vector<2x32xf32>
    tpu.vector_store %arg11[%c6_107, %c0_108], %265 {strides = array<i32>} : memref<16x32xf32, #tpu.memory_space<vmem>>, vector<2x32xf32>,
    %c8_109 = arith.constant 8 : index
    %c0_110 = arith.constant 0 : index
    %267 = vector.load %arg12[%c8_109, %c0_110] : memref<16x128xf32, #tpu.memory_space<vmem>>, vector<2x128xf32>
    %cst_111 = arith.constant dense<0.000000e+00> : vector<2x128xf32>
    %268 = tpu.matmul %265, %188, %cst_111 {dimension_numbers = #tpu.dot_dimension_numbers<[1], [0], [0], [1], [0, 0, 1, 1], [], []>} : vector<2x32xf32>, vector<32x128xf32>, vector<2x128xf32> -> vector<2x128xf32>
    %269 = arith.addf %267, %268 : vector<2x128xf32>
    %270 = arith.negf %269 : vector<2x128xf32>
    %271 = math.exp %270 : vector<2x128xf32>
    %cst_112 = arith.constant 1.000000e+00 : f32
    %272 = vector.broadcast %cst_112 : f32 to vector<2x128xf32>
    %273 = arith.addf %272, %271 : vector<2x128xf32>
    %274 = arith.divf %272, %273 : vector<2x128xf32>
    %275 = vector.extract_strided_slice %274 {offsets = [0, 0], sizes = [2, 32], strides = [1, 1]} : vector<2x128xf32> to vector<2x32xf32>
    %276 = vector.extract_strided_slice %274 {offsets = [0, 32], sizes = [2, 32], strides = [1, 1]} : vector<2x128xf32> to vector<2x32xf32>
    %277 = vector.extract_strided_slice %274 {offsets = [0, 96], sizes = [2, 32], strides = [1, 1]} : vector<2x128xf32> to vector<2x32xf32>
    %278 = vector.extract_strided_slice %269 {offsets = [0, 64], sizes = [2, 32], strides = [1, 1]} : vector<2x128xf32> to vector<2x32xf32>
    %279 = math.tanh %278 : vector<2x32xf32>
    %280 = arith.mulf %276, %263 : vector<2x32xf32>
    %281 = arith.mulf %275, %279 : vector<2x32xf32>
    %282 = arith.addf %280, %281 : vector<2x32xf32>
    %283 = math.tanh %282 : vector<2x32xf32>
    %284 = arith.mulf %277, %283 : vector<2x32xf32>
    %c8_113 = arith.constant 8 : index
    %c0_114 = arith.constant 0 : index
    %285 = vector.load %arg11[%c8_113, %c0_114] : memref<16x32xf32, #tpu.memory_space<vmem>>, vector<2x32xf32>
    tpu.vector_store %arg11[%c8_113, %c0_114], %284 {strides = array<i32>} : memref<16x32xf32, #tpu.memory_space<vmem>>, vector<2x32xf32>,
    %c10_115 = arith.constant 10 : index
    %c0_116 = arith.constant 0 : index
    %286 = vector.load %arg12[%c10_115, %c0_116] : memref<16x128xf32, #tpu.memory_space<vmem>>, vector<2x128xf32>
    %cst_117 = arith.constant dense<0.000000e+00> : vector<2x128xf32>
    %287 = tpu.matmul %284, %188, %cst_117 {dimension_numbers = #tpu.dot_dimension_numbers<[1], [0], [0], [1], [0, 0, 1, 1], [], []>} : vector<2x32xf32>, vector<32x128xf32>, vector<2x128xf32> -> vector<2x128xf32>
    %288 = arith.addf %286, %287 : vector<2x128xf32>
    %289 = arith.negf %288 : vector<2x128xf32>
    %290 = math.exp %289 : vector<2x128xf32>
    %cst_118 = arith.constant 1.000000e+00 : f32
    %291 = vector.broadcast %cst_118 : f32 to vector<2x128xf32>
    %292 = arith.addf %291, %290 : vector<2x128xf32>
    %293 = arith.divf %291, %292 : vector<2x128xf32>
    %294 = vector.extract_strided_slice %293 {offsets = [0, 0], sizes = [2, 32], strides = [1, 1]} : vector<2x128xf32> to vector<2x32xf32>
    %295 = vector.extract_strided_slice %293 {offsets = [0, 32], sizes = [2, 32], strides = [1, 1]} : vector<2x128xf32> to vector<2x32xf32>
    %296 = vector.extract_strided_slice %293 {offsets = [0, 96], sizes = [2, 32], strides = [1, 1]} : vector<2x128xf32> to vector<2x32xf32>
    %297 = vector.extract_strided_slice %288 {offsets = [0, 64], sizes = [2, 32], strides = [1, 1]} : vector<2x128xf32> to vector<2x32xf32>
    %298 = math.tanh %297 : vector<2x32xf32>
    %299 = arith.mulf %295, %282 : vector<2x32xf32>
    %300 = arith.mulf %294, %298 : vector<2x32xf32>
    %301 = arith.addf %299, %300 : vector<2x32xf32>
    %302 = math.tanh %301 : vector<2x32xf32>
    %303 = arith.mulf %296, %302 : vector<2x32xf32>
    %c10_119 = arith.constant 10 : index
    %c0_120 = arith.constant 0 : index
    %304 = vector.load %arg11[%c10_119, %c0_120] : memref<16x32xf32, #tpu.memory_space<vmem>>, vector<2x32xf32>
    tpu.vector_store %arg11[%c10_119, %c0_120], %303 {strides = array<i32>} : memref<16x32xf32, #tpu.memory_space<vmem>>, vector<2x32xf32>,
    %c12_121 = arith.constant 12 : index
    %c0_122 = arith.constant 0 : index
    %305 = vector.load %arg12[%c12_121, %c0_122] : memref<16x128xf32, #tpu.memory_space<vmem>>, vector<2x128xf32>
    %cst_123 = arith.constant dense<0.000000e+00> : vector<2x128xf32>
    %306 = tpu.matmul %303, %188, %cst_123 {dimension_numbers = #tpu.dot_dimension_numbers<[1], [0], [0], [1], [0, 0, 1, 1], [], []>} : vector<2x32xf32>, vector<32x128xf32>, vector<2x128xf32> -> vector<2x128xf32>
    %307 = arith.addf %305, %306 : vector<2x128xf32>
    %308 = arith.negf %307 : vector<2x128xf32>
    %309 = math.exp %308 : vector<2x128xf32>
    %cst_124 = arith.constant 1.000000e+00 : f32
    %310 = vector.broadcast %cst_124 : f32 to vector<2x128xf32>
    %311 = arith.addf %310, %309 : vector<2x128xf32>
    %312 = arith.divf %310, %311 : vector<2x128xf32>
    %313 = vector.extract_strided_slice %312 {offsets = [0, 0], sizes = [2, 32], strides = [1, 1]} : vector<2x128xf32> to vector<2x32xf32>
    %314 = vector.extract_strided_slice %312 {offsets = [0, 32], sizes = [2, 32], strides = [1, 1]} : vector<2x128xf32> to vector<2x32xf32>
    %315 = vector.extract_strided_slice %312 {offsets = [0, 96], sizes = [2, 32], strides = [1, 1]} : vector<2x128xf32> to vector<2x32xf32>
    %316 = vector.extract_strided_slice %307 {offsets = [0, 64], sizes = [2, 32], strides = [1, 1]} : vector<2x128xf32> to vector<2x32xf32>
    %317 = math.tanh %316 : vector<2x32xf32>
    %318 = arith.mulf %314, %301 : vector<2x32xf32>
    %319 = arith.mulf %313, %317 : vector<2x32xf32>
    %320 = arith.addf %318, %319 : vector<2x32xf32>
    %321 = math.tanh %320 : vector<2x32xf32>
    %322 = arith.mulf %315, %321 : vector<2x32xf32>
    %c12_125 = arith.constant 12 : index
    %c0_126 = arith.constant 0 : index
    %323 = vector.load %arg11[%c12_125, %c0_126] : memref<16x32xf32, #tpu.memory_space<vmem>>, vector<2x32xf32>
    tpu.vector_store %arg11[%c12_125, %c0_126], %322 {strides = array<i32>} : memref<16x32xf32, #tpu.memory_space<vmem>>, vector<2x32xf32>,
    %c14_127 = arith.constant 14 : index
    %c0_128 = arith.constant 0 : index
    %324 = vector.load %arg12[%c14_127, %c0_128] : memref<16x128xf32, #tpu.memory_space<vmem>>, vector<2x128xf32>
    %cst_129 = arith.constant dense<0.000000e+00> : vector<2x128xf32>
    %325 = tpu.matmul %322, %188, %cst_129 {dimension_numbers = #tpu.dot_dimension_numbers<[1], [0], [0], [1], [0, 0, 1, 1], [], []>} : vector<2x32xf32>, vector<32x128xf32>, vector<2x128xf32> -> vector<2x128xf32>
    %326 = arith.addf %324, %325 : vector<2x128xf32>
    %327 = arith.negf %326 : vector<2x128xf32>
    %328 = math.exp %327 : vector<2x128xf32>
    %cst_130 = arith.constant 1.000000e+00 : f32
    %329 = vector.broadcast %cst_130 : f32 to vector<2x128xf32>
    %330 = arith.addf %329, %328 : vector<2x128xf32>
    %331 = arith.divf %329, %330 : vector<2x128xf32>
    %332 = vector.extract_strided_slice %331 {offsets = [0, 0], sizes = [2, 32], strides = [1, 1]} : vector<2x128xf32> to vector<2x32xf32>
    %333 = vector.extract_strided_slice %331 {offsets = [0, 32], sizes = [2, 32], strides = [1, 1]} : vector<2x128xf32> to vector<2x32xf32>
    %334 = vector.extract_strided_slice %331 {offsets = [0, 96], sizes = [2, 32], strides = [1, 1]} : vector<2x128xf32> to vector<2x32xf32>
    %335 = vector.extract_strided_slice %326 {offsets = [0, 64], sizes = [2, 32], strides = [1, 1]} : vector<2x128xf32> to vector<2x32xf32>
    %336 = math.tanh %335 : vector<2x32xf32>
    %337 = arith.mulf %333, %320 : vector<2x32xf32>
    %338 = arith.mulf %332, %336 : vector<2x32xf32>
    %339 = arith.addf %337, %338 : vector<2x32xf32>
    %340 = math.tanh %339 : vector<2x32xf32>
    %341 = arith.mulf %334, %340 : vector<2x32xf32>
    %c14_131 = arith.constant 14 : index
    %c0_132 = arith.constant 0 : index
    %342 = vector.load %arg11[%c14_131, %c0_132] : memref<16x32xf32, #tpu.memory_space<vmem>>, vector<2x32xf32>
    tpu.vector_store %arg11[%c14_131, %c0_132], %341 {strides = array<i32>} : memref<16x32xf32, #tpu.memory_space<vmem>>, vector<2x32xf32>,
    %c1_133 = arith.constant 1 : index
    %c0_134 = arith.constant 0 : index
    %c0_135 = arith.constant 0 : index
    %343 = vector.load %arg9[%c1_133, %c0_134, %c0_135] : memref<4x2x32xf32, #tpu.memory_space<vmem>>, vector<1x2x32xf32>
    %344 = vector.shape_cast %343 : vector<1x2x32xf32> to vector<2x32xf32>
    %345 = vector.shape_cast %341 : vector<2x32xf32> to vector<1x2x32xf32>
    tpu.vector_store %arg9[%c1_133, %c0_134, %c0_135], %345 {strides = array<i32>} : memref<4x2x32xf32, #tpu.memory_space<vmem>>, vector<1x2x32xf32>,
    %c1_136 = arith.constant 1 : index
    %c0_137 = arith.constant 0 : index
    %c0_138 = arith.constant 0 : index
    %346 = vector.load %arg10[%c1_136, %c0_137, %c0_138] : memref<4x2x32xf32, #tpu.memory_space<vmem>>, vector<1x2x32xf32>
    %347 = vector.shape_cast %346 : vector<1x2x32xf32> to vector<2x32xf32>
    %348 = vector.shape_cast %339 : vector<2x32xf32> to vector<1x2x32xf32>
    tpu.vector_store %arg10[%c1_136, %c0_137, %c0_138], %348 {strides = array<i32>} : memref<4x2x32xf32, #tpu.memory_space<vmem>>, vector<1x2x32xf32>,
    %c0_139 = arith.constant 0 : index
    %c0_140 = arith.constant 0 : index
    %349 = vector.load %arg11[%c0_139, %c0_140] : memref<16x32xf32, #tpu.memory_space<vmem>>, vector<16x32xf32>
    %c2_141 = arith.constant 2 : index
    %c0_142 = arith.constant 0 : index
    %c0_143 = arith.constant 0 : index
    %350 = vector.load %arg3[%c2_141, %c0_142, %c0_143] : memref<4x32x128xf32, #tpu.memory_space<vmem>>, vector<1x32x128xf32>
    %351 = vector.shape_cast %350 : vector<1x32x128xf32> to vector<32x128xf32>
    %cst_144 = arith.constant dense<0.000000e+00> : vector<16x128xf32>
    %352 = tpu.matmul %349, %351, %cst_144 {dimension_numbers = #tpu.dot_dimension_numbers<[1], [0], [0], [1], [0, 0, 1, 1], [], []>} : vector<16x32xf32>, vector<32x128xf32>, vector<16x128xf32> -> vector<16x128xf32>
    %c2_145 = arith.constant 2 : index
    %c0_146 = arith.constant 0 : index
    %c0_147 = arith.constant 0 : index
    %353 = vector.load %arg5[%c2_145, %c0_146, %c0_147] : memref<4x1x128xf32, #tpu.memory_space<vmem>>, vector<1x1x128xf32>
    %354 = vector.shape_cast %353 : vector<1x1x128xf32> to vector<1x128xf32>
    %355 = vector.broadcast %354 : vector<1x128xf32> to vector<16x128xf32>
    %356 = arith.addf %352, %355 : vector<16x128xf32>
    %c0_148 = arith.constant 0 : index
    %c0_149 = arith.constant 0 : index
    %357 = vector.load %arg12[%c0_148, %c0_149] : memref<16x128xf32, #tpu.memory_space<vmem>>, vector<16x128xf32>
    tpu.vector_store %arg12[%c0_148, %c0_149], %356 {strides = array<i32>} : memref<16x128xf32, #tpu.memory_space<vmem>>, vector<16x128xf32>,
    %c2_150 = arith.constant 2 : index
    %c0_151 = arith.constant 0 : index
    %c0_152 = arith.constant 0 : index
    %358 = vector.load %arg4[%c2_150, %c0_151, %c0_152] : memref<4x32x128xf32, #tpu.memory_space<vmem>>, vector<1x32x128xf32>
    %359 = vector.shape_cast %358 : vector<1x32x128xf32> to vector<32x128xf32>
    %cst_153 = arith.constant 0.000000e+00 : f32
    %360 = vector.broadcast %cst_153 : f32 to vector<2x32xf32>
    %cst_154 = arith.constant 0.000000e+00 : f32
    %361 = vector.broadcast %cst_154 : f32 to vector<2x32xf32>
    %c0_155 = arith.constant 0 : index
    %c0_156 = arith.constant 0 : index
    %362 = vector.load %arg12[%c0_155, %c0_156] : memref<16x128xf32, #tpu.memory_space<vmem>>, vector<2x128xf32>
    %cst_157 = arith.constant dense<0.000000e+00> : vector<2x128xf32>
    %363 = tpu.matmul %360, %359, %cst_157 {dimension_numbers = #tpu.dot_dimension_numbers<[1], [0], [0], [1], [0, 0, 1, 1], [], []>} : vector<2x32xf32>, vector<32x128xf32>, vector<2x128xf32> -> vector<2x128xf32>
    %364 = arith.addf %362, %363 : vector<2x128xf32>
    %365 = arith.negf %364 : vector<2x128xf32>
    %366 = math.exp %365 : vector<2x128xf32>
    %cst_158 = arith.constant 1.000000e+00 : f32
    %367 = vector.broadcast %cst_158 : f32 to vector<2x128xf32>
    %368 = arith.addf %367, %366 : vector<2x128xf32>
    %369 = arith.divf %367, %368 : vector<2x128xf32>
    %370 = vector.extract_strided_slice %369 {offsets = [0, 0], sizes = [2, 32], strides = [1, 1]} : vector<2x128xf32> to vector<2x32xf32>
    %371 = vector.extract_strided_slice %369 {offsets = [0, 32], sizes = [2, 32], strides = [1, 1]} : vector<2x128xf32> to vector<2x32xf32>
    %372 = vector.extract_strided_slice %369 {offsets = [0, 96], sizes = [2, 32], strides = [1, 1]} : vector<2x128xf32> to vector<2x32xf32>
    %373 = vector.extract_strided_slice %364 {offsets = [0, 64], sizes = [2, 32], strides = [1, 1]} : vector<2x128xf32> to vector<2x32xf32>
    %374 = math.tanh %373 : vector<2x32xf32>
    %375 = arith.mulf %371, %361 : vector<2x32xf32>
    %376 = arith.mulf %370, %374 : vector<2x32xf32>
    %377 = arith.addf %375, %376 : vector<2x32xf32>
    %378 = math.tanh %377 : vector<2x32xf32>
    %379 = arith.mulf %372, %378 : vector<2x32xf32>
    %c0_159 = arith.constant 0 : index
    %c0_160 = arith.constant 0 : index
    %380 = vector.load %arg11[%c0_159, %c0_160] : memref<16x32xf32, #tpu.memory_space<vmem>>, vector<2x32xf32>
    tpu.vector_store %arg11[%c0_159, %c0_160], %379 {strides = array<i32>} : memref<16x32xf32, #tpu.memory_space<vmem>>, vector<2x32xf32>,
    %c2_161 = arith.constant 2 : index
    %c0_162 = arith.constant 0 : index
    %381 = vector.load %arg12[%c2_161, %c0_162] : memref<16x128xf32, #tpu.memory_space<vmem>>, vector<2x128xf32>
    %cst_163 = arith.constant dense<0.000000e+00> : vector<2x128xf32>
    %382 = tpu.matmul %379, %359, %cst_163 {dimension_numbers = #tpu.dot_dimension_numbers<[1], [0], [0], [1], [0, 0, 1, 1], [], []>} : vector<2x32xf32>, vector<32x128xf32>, vector<2x128xf32> -> vector<2x128xf32>
    %383 = arith.addf %381, %382 : vector<2x128xf32>
    %384 = arith.negf %383 : vector<2x128xf32>
    %385 = math.exp %384 : vector<2x128xf32>
    %cst_164 = arith.constant 1.000000e+00 : f32
    %386 = vector.broadcast %cst_164 : f32 to vector<2x128xf32>
    %387 = arith.addf %386, %385 : vector<2x128xf32>
    %388 = arith.divf %386, %387 : vector<2x128xf32>
    %389 = vector.extract_strided_slice %388 {offsets = [0, 0], sizes = [2, 32], strides = [1, 1]} : vector<2x128xf32> to vector<2x32xf32>
    %390 = vector.extract_strided_slice %388 {offsets = [0, 32], sizes = [2, 32], strides = [1, 1]} : vector<2x128xf32> to vector<2x32xf32>
    %391 = vector.extract_strided_slice %388 {offsets = [0, 96], sizes = [2, 32], strides = [1, 1]} : vector<2x128xf32> to vector<2x32xf32>
    %392 = vector.extract_strided_slice %383 {offsets = [0, 64], sizes = [2, 32], strides = [1, 1]} : vector<2x128xf32> to vector<2x32xf32>
    %393 = math.tanh %392 : vector<2x32xf32>
    %394 = arith.mulf %390, %377 : vector<2x32xf32>
    %395 = arith.mulf %389, %393 : vector<2x32xf32>
    %396 = arith.addf %394, %395 : vector<2x32xf32>
    %397 = math.tanh %396 : vector<2x32xf32>
    %398 = arith.mulf %391, %397 : vector<2x32xf32>
    %c2_165 = arith.constant 2 : index
    %c0_166 = arith.constant 0 : index
    %399 = vector.load %arg11[%c2_165, %c0_166] : memref<16x32xf32, #tpu.memory_space<vmem>>, vector<2x32xf32>
    tpu.vector_store %arg11[%c2_165, %c0_166], %398 {strides = array<i32>} : memref<16x32xf32, #tpu.memory_space<vmem>>, vector<2x32xf32>,
    %c4_167 = arith.constant 4 : index
    %c0_168 = arith.constant 0 : index
    %400 = vector.load %arg12[%c4_167, %c0_168] : memref<16x128xf32, #tpu.memory_space<vmem>>, vector<2x128xf32>
    %cst_169 = arith.constant dense<0.000000e+00> : vector<2x128xf32>
    %401 = tpu.matmul %398, %359, %cst_169 {dimension_numbers = #tpu.dot_dimension_numbers<[1], [0], [0], [1], [0, 0, 1, 1], [], []>} : vector<2x32xf32>, vector<32x128xf32>, vector<2x128xf32> -> vector<2x128xf32>
    %402 = arith.addf %400, %401 : vector<2x128xf32>
    %403 = arith.negf %402 : vector<2x128xf32>
    %404 = math.exp %403 : vector<2x128xf32>
    %cst_170 = arith.constant 1.000000e+00 : f32
    %405 = vector.broadcast %cst_170 : f32 to vector<2x128xf32>
    %406 = arith.addf %405, %404 : vector<2x128xf32>
    %407 = arith.divf %405, %406 : vector<2x128xf32>
    %408 = vector.extract_strided_slice %407 {offsets = [0, 0], sizes = [2, 32], strides = [1, 1]} : vector<2x128xf32> to vector<2x32xf32>
    %409 = vector.extract_strided_slice %407 {offsets = [0, 32], sizes = [2, 32], strides = [1, 1]} : vector<2x128xf32> to vector<2x32xf32>
    %410 = vector.extract_strided_slice %407 {offsets = [0, 96], sizes = [2, 32], strides = [1, 1]} : vector<2x128xf32> to vector<2x32xf32>
    %411 = vector.extract_strided_slice %402 {offsets = [0, 64], sizes = [2, 32], strides = [1, 1]} : vector<2x128xf32> to vector<2x32xf32>
    %412 = math.tanh %411 : vector<2x32xf32>
    %413 = arith.mulf %409, %396 : vector<2x32xf32>
    %414 = arith.mulf %408, %412 : vector<2x32xf32>
    %415 = arith.addf %413, %414 : vector<2x32xf32>
    %416 = math.tanh %415 : vector<2x32xf32>
    %417 = arith.mulf %410, %416 : vector<2x32xf32>
    %c4_171 = arith.constant 4 : index
    %c0_172 = arith.constant 0 : index
    %418 = vector.load %arg11[%c4_171, %c0_172] : memref<16x32xf32, #tpu.memory_space<vmem>>, vector<2x32xf32>
    tpu.vector_store %arg11[%c4_171, %c0_172], %417 {strides = array<i32>} : memref<16x32xf32, #tpu.memory_space<vmem>>, vector<2x32xf32>,
    %c6_173 = arith.constant 6 : index
    %c0_174 = arith.constant 0 : index
    %419 = vector.load %arg12[%c6_173, %c0_174] : memref<16x128xf32, #tpu.memory_space<vmem>>, vector<2x128xf32>
    %cst_175 = arith.constant dense<0.000000e+00> : vector<2x128xf32>
    %420 = tpu.matmul %417, %359, %cst_175 {dimension_numbers = #tpu.dot_dimension_numbers<[1], [0], [0], [1], [0, 0, 1, 1], [], []>} : vector<2x32xf32>, vector<32x128xf32>, vector<2x128xf32> -> vector<2x128xf32>
    %421 = arith.addf %419, %420 : vector<2x128xf32>
    %422 = arith.negf %421 : vector<2x128xf32>
    %423 = math.exp %422 : vector<2x128xf32>
    %cst_176 = arith.constant 1.000000e+00 : f32
    %424 = vector.broadcast %cst_176 : f32 to vector<2x128xf32>
    %425 = arith.addf %424, %423 : vector<2x128xf32>
    %426 = arith.divf %424, %425 : vector<2x128xf32>
    %427 = vector.extract_strided_slice %426 {offsets = [0, 0], sizes = [2, 32], strides = [1, 1]} : vector<2x128xf32> to vector<2x32xf32>
    %428 = vector.extract_strided_slice %426 {offsets = [0, 32], sizes = [2, 32], strides = [1, 1]} : vector<2x128xf32> to vector<2x32xf32>
    %429 = vector.extract_strided_slice %426 {offsets = [0, 96], sizes = [2, 32], strides = [1, 1]} : vector<2x128xf32> to vector<2x32xf32>
    %430 = vector.extract_strided_slice %421 {offsets = [0, 64], sizes = [2, 32], strides = [1, 1]} : vector<2x128xf32> to vector<2x32xf32>
    %431 = math.tanh %430 : vector<2x32xf32>
    %432 = arith.mulf %428, %415 : vector<2x32xf32>
    %433 = arith.mulf %427, %431 : vector<2x32xf32>
    %434 = arith.addf %432, %433 : vector<2x32xf32>
    %435 = math.tanh %434 : vector<2x32xf32>
    %436 = arith.mulf %429, %435 : vector<2x32xf32>
    %c6_177 = arith.constant 6 : index
    %c0_178 = arith.constant 0 : index
    %437 = vector.load %arg11[%c6_177, %c0_178] : memref<16x32xf32, #tpu.memory_space<vmem>>, vector<2x32xf32>
    tpu.vector_store %arg11[%c6_177, %c0_178], %436 {strides = array<i32>} : memref<16x32xf32, #tpu.memory_space<vmem>>, vector<2x32xf32>,
    %c8_179 = arith.constant 8 : index
    %c0_180 = arith.constant 0 : index
    %438 = vector.load %arg12[%c8_179, %c0_180] : memref<16x128xf32, #tpu.memory_space<vmem>>, vector<2x128xf32>
    %cst_181 = arith.constant dense<0.000000e+00> : vector<2x128xf32>
    %439 = tpu.matmul %436, %359, %cst_181 {dimension_numbers = #tpu.dot_dimension_numbers<[1], [0], [0], [1], [0, 0, 1, 1], [], []>} : vector<2x32xf32>, vector<32x128xf32>, vector<2x128xf32> -> vector<2x128xf32>
    %440 = arith.addf %438, %439 : vector<2x128xf32>
    %441 = arith.negf %440 : vector<2x128xf32>
    %442 = math.exp %441 : vector<2x128xf32>
    %cst_182 = arith.constant 1.000000e+00 : f32
    %443 = vector.broadcast %cst_182 : f32 to vector<2x128xf32>
    %444 = arith.addf %443, %442 : vector<2x128xf32>
    %445 = arith.divf %443, %444 : vector<2x128xf32>
    %446 = vector.extract_strided_slice %445 {offsets = [0, 0], sizes = [2, 32], strides = [1, 1]} : vector<2x128xf32> to vector<2x32xf32>
    %447 = vector.extract_strided_slice %445 {offsets = [0, 32], sizes = [2, 32], strides = [1, 1]} : vector<2x128xf32> to vector<2x32xf32>
    %448 = vector.extract_strided_slice %445 {offsets = [0, 96], sizes = [2, 32], strides = [1, 1]} : vector<2x128xf32> to vector<2x32xf32>
    %449 = vector.extract_strided_slice %440 {offsets = [0, 64], sizes = [2, 32], strides = [1, 1]} : vector<2x128xf32> to vector<2x32xf32>
    %450 = math.tanh %449 : vector<2x32xf32>
    %451 = arith.mulf %447, %434 : vector<2x32xf32>
    %452 = arith.mulf %446, %450 : vector<2x32xf32>
    %453 = arith.addf %451, %452 : vector<2x32xf32>
    %454 = math.tanh %453 : vector<2x32xf32>
    %455 = arith.mulf %448, %454 : vector<2x32xf32>
    %c8_183 = arith.constant 8 : index
    %c0_184 = arith.constant 0 : index
    %456 = vector.load %arg11[%c8_183, %c0_184] : memref<16x32xf32, #tpu.memory_space<vmem>>, vector<2x32xf32>
    tpu.vector_store %arg11[%c8_183, %c0_184], %455 {strides = array<i32>} : memref<16x32xf32, #tpu.memory_space<vmem>>, vector<2x32xf32>,
    %c10_185 = arith.constant 10 : index
    %c0_186 = arith.constant 0 : index
    %457 = vector.load %arg12[%c10_185, %c0_186] : memref<16x128xf32, #tpu.memory_space<vmem>>, vector<2x128xf32>
    %cst_187 = arith.constant dense<0.000000e+00> : vector<2x128xf32>
    %458 = tpu.matmul %455, %359, %cst_187 {dimension_numbers = #tpu.dot_dimension_numbers<[1], [0], [0], [1], [0, 0, 1, 1], [], []>} : vector<2x32xf32>, vector<32x128xf32>, vector<2x128xf32> -> vector<2x128xf32>
    %459 = arith.addf %457, %458 : vector<2x128xf32>
    %460 = arith.negf %459 : vector<2x128xf32>
    %461 = math.exp %460 : vector<2x128xf32>
    %cst_188 = arith.constant 1.000000e+00 : f32
    %462 = vector.broadcast %cst_188 : f32 to vector<2x128xf32>
    %463 = arith.addf %462, %461 : vector<2x128xf32>
    %464 = arith.divf %462, %463 : vector<2x128xf32>
    %465 = vector.extract_strided_slice %464 {offsets = [0, 0], sizes = [2, 32], strides = [1, 1]} : vector<2x128xf32> to vector<2x32xf32>
    %466 = vector.extract_strided_slice %464 {offsets = [0, 32], sizes = [2, 32], strides = [1, 1]} : vector<2x128xf32> to vector<2x32xf32>
    %467 = vector.extract_strided_slice %464 {offsets = [0, 96], sizes = [2, 32], strides = [1, 1]} : vector<2x128xf32> to vector<2x32xf32>
    %468 = vector.extract_strided_slice %459 {offsets = [0, 64], sizes = [2, 32], strides = [1, 1]} : vector<2x128xf32> to vector<2x32xf32>
    %469 = math.tanh %468 : vector<2x32xf32>
    %470 = arith.mulf %466, %453 : vector<2x32xf32>
    %471 = arith.mulf %465, %469 : vector<2x32xf32>
    %472 = arith.addf %470, %471 : vector<2x32xf32>
    %473 = math.tanh %472 : vector<2x32xf32>
    %474 = arith.mulf %467, %473 : vector<2x32xf32>
    %c10_189 = arith.constant 10 : index
    %c0_190 = arith.constant 0 : index
    %475 = vector.load %arg11[%c10_189, %c0_190] : memref<16x32xf32, #tpu.memory_space<vmem>>, vector<2x32xf32>
    tpu.vector_store %arg11[%c10_189, %c0_190], %474 {strides = array<i32>} : memref<16x32xf32, #tpu.memory_space<vmem>>, vector<2x32xf32>,
    %c12_191 = arith.constant 12 : index
    %c0_192 = arith.constant 0 : index
    %476 = vector.load %arg12[%c12_191, %c0_192] : memref<16x128xf32, #tpu.memory_space<vmem>>, vector<2x128xf32>
    %cst_193 = arith.constant dense<0.000000e+00> : vector<2x128xf32>
    %477 = tpu.matmul %474, %359, %cst_193 {dimension_numbers = #tpu.dot_dimension_numbers<[1], [0], [0], [1], [0, 0, 1, 1], [], []>} : vector<2x32xf32>, vector<32x128xf32>, vector<2x128xf32> -> vector<2x128xf32>
    %478 = arith.addf %476, %477 : vector<2x128xf32>
    %479 = arith.negf %478 : vector<2x128xf32>
    %480 = math.exp %479 : vector<2x128xf32>
    %cst_194 = arith.constant 1.000000e+00 : f32
    %481 = vector.broadcast %cst_194 : f32 to vector<2x128xf32>
    %482 = arith.addf %481, %480 : vector<2x128xf32>
    %483 = arith.divf %481, %482 : vector<2x128xf32>
    %484 = vector.extract_strided_slice %483 {offsets = [0, 0], sizes = [2, 32], strides = [1, 1]} : vector<2x128xf32> to vector<2x32xf32>
    %485 = vector.extract_strided_slice %483 {offsets = [0, 32], sizes = [2, 32], strides = [1, 1]} : vector<2x128xf32> to vector<2x32xf32>
    %486 = vector.extract_strided_slice %483 {offsets = [0, 96], sizes = [2, 32], strides = [1, 1]} : vector<2x128xf32> to vector<2x32xf32>
    %487 = vector.extract_strided_slice %478 {offsets = [0, 64], sizes = [2, 32], strides = [1, 1]} : vector<2x128xf32> to vector<2x32xf32>
    %488 = math.tanh %487 : vector<2x32xf32>
    %489 = arith.mulf %485, %472 : vector<2x32xf32>
    %490 = arith.mulf %484, %488 : vector<2x32xf32>
    %491 = arith.addf %489, %490 : vector<2x32xf32>
    %492 = math.tanh %491 : vector<2x32xf32>
    %493 = arith.mulf %486, %492 : vector<2x32xf32>
    %c12_195 = arith.constant 12 : index
    %c0_196 = arith.constant 0 : index
    %494 = vector.load %arg11[%c12_195, %c0_196] : memref<16x32xf32, #tpu.memory_space<vmem>>, vector<2x32xf32>
    tpu.vector_store %arg11[%c12_195, %c0_196], %493 {strides = array<i32>} : memref<16x32xf32, #tpu.memory_space<vmem>>, vector<2x32xf32>,
    %c14_197 = arith.constant 14 : index
    %c0_198 = arith.constant 0 : index
    %495 = vector.load %arg12[%c14_197, %c0_198] : memref<16x128xf32, #tpu.memory_space<vmem>>, vector<2x128xf32>
    %cst_199 = arith.constant dense<0.000000e+00> : vector<2x128xf32>
    %496 = tpu.matmul %493, %359, %cst_199 {dimension_numbers = #tpu.dot_dimension_numbers<[1], [0], [0], [1], [0, 0, 1, 1], [], []>} : vector<2x32xf32>, vector<32x128xf32>, vector<2x128xf32> -> vector<2x128xf32>
    %497 = arith.addf %495, %496 : vector<2x128xf32>
    %498 = arith.negf %497 : vector<2x128xf32>
    %499 = math.exp %498 : vector<2x128xf32>
    %cst_200 = arith.constant 1.000000e+00 : f32
    %500 = vector.broadcast %cst_200 : f32 to vector<2x128xf32>
    %501 = arith.addf %500, %499 : vector<2x128xf32>
    %502 = arith.divf %500, %501 : vector<2x128xf32>
    %503 = vector.extract_strided_slice %502 {offsets = [0, 0], sizes = [2, 32], strides = [1, 1]} : vector<2x128xf32> to vector<2x32xf32>
    %504 = vector.extract_strided_slice %502 {offsets = [0, 32], sizes = [2, 32], strides = [1, 1]} : vector<2x128xf32> to vector<2x32xf32>
    %505 = vector.extract_strided_slice %502 {offsets = [0, 96], sizes = [2, 32], strides = [1, 1]} : vector<2x128xf32> to vector<2x32xf32>
    %506 = vector.extract_strided_slice %497 {offsets = [0, 64], sizes = [2, 32], strides = [1, 1]} : vector<2x128xf32> to vector<2x32xf32>
    %507 = math.tanh %506 : vector<2x32xf32>
    %508 = arith.mulf %504, %491 : vector<2x32xf32>
    %509 = arith.mulf %503, %507 : vector<2x32xf32>
    %510 = arith.addf %508, %509 : vector<2x32xf32>
    %511 = math.tanh %510 : vector<2x32xf32>
    %512 = arith.mulf %505, %511 : vector<2x32xf32>
    %c14_201 = arith.constant 14 : index
    %c0_202 = arith.constant 0 : index
    %513 = vector.load %arg11[%c14_201, %c0_202] : memref<16x32xf32, #tpu.memory_space<vmem>>, vector<2x32xf32>
    tpu.vector_store %arg11[%c14_201, %c0_202], %512 {strides = array<i32>} : memref<16x32xf32, #tpu.memory_space<vmem>>, vector<2x32xf32>,
    %c2_203 = arith.constant 2 : index
    %c0_204 = arith.constant 0 : index
    %c0_205 = arith.constant 0 : index
    %514 = vector.load %arg9[%c2_203, %c0_204, %c0_205] : memref<4x2x32xf32, #tpu.memory_space<vmem>>, vector<1x2x32xf32>
    %515 = vector.shape_cast %514 : vector<1x2x32xf32> to vector<2x32xf32>
    %516 = vector.shape_cast %512 : vector<2x32xf32> to vector<1x2x32xf32>
    tpu.vector_store %arg9[%c2_203, %c0_204, %c0_205], %516 {strides = array<i32>} : memref<4x2x32xf32, #tpu.memory_space<vmem>>, vector<1x2x32xf32>,
    %c2_206 = arith.constant 2 : index
    %c0_207 = arith.constant 0 : index
    %c0_208 = arith.constant 0 : index
    %517 = vector.load %arg10[%c2_206, %c0_207, %c0_208] : memref<4x2x32xf32, #tpu.memory_space<vmem>>, vector<1x2x32xf32>
    %518 = vector.shape_cast %517 : vector<1x2x32xf32> to vector<2x32xf32>
    %519 = vector.shape_cast %510 : vector<2x32xf32> to vector<1x2x32xf32>
    tpu.vector_store %arg10[%c2_206, %c0_207, %c0_208], %519 {strides = array<i32>} : memref<4x2x32xf32, #tpu.memory_space<vmem>>, vector<1x2x32xf32>,
    %c0_209 = arith.constant 0 : index
    %c0_210 = arith.constant 0 : index
    %520 = vector.load %arg11[%c0_209, %c0_210] : memref<16x32xf32, #tpu.memory_space<vmem>>, vector<16x32xf32>
    %c3 = arith.constant 3 : index
    %c0_211 = arith.constant 0 : index
    %c0_212 = arith.constant 0 : index
    %521 = vector.load %arg3[%c3, %c0_211, %c0_212] : memref<4x32x128xf32, #tpu.memory_space<vmem>>, vector<1x32x128xf32>
    %522 = vector.shape_cast %521 : vector<1x32x128xf32> to vector<32x128xf32>
    %cst_213 = arith.constant dense<0.000000e+00> : vector<16x128xf32>
    %523 = tpu.matmul %520, %522, %cst_213 {dimension_numbers = #tpu.dot_dimension_numbers<[1], [0], [0], [1], [0, 0, 1, 1], [], []>} : vector<16x32xf32>, vector<32x128xf32>, vector<16x128xf32> -> vector<16x128xf32>
    %c3_214 = arith.constant 3 : index
    %c0_215 = arith.constant 0 : index
    %c0_216 = arith.constant 0 : index
    %524 = vector.load %arg5[%c3_214, %c0_215, %c0_216] : memref<4x1x128xf32, #tpu.memory_space<vmem>>, vector<1x1x128xf32>
    %525 = vector.shape_cast %524 : vector<1x1x128xf32> to vector<1x128xf32>
    %526 = vector.broadcast %525 : vector<1x128xf32> to vector<16x128xf32>
    %527 = arith.addf %523, %526 : vector<16x128xf32>
    %c0_217 = arith.constant 0 : index
    %c0_218 = arith.constant 0 : index
    %528 = vector.load %arg12[%c0_217, %c0_218] : memref<16x128xf32, #tpu.memory_space<vmem>>, vector<16x128xf32>
    tpu.vector_store %arg12[%c0_217, %c0_218], %527 {strides = array<i32>} : memref<16x128xf32, #tpu.memory_space<vmem>>, vector<16x128xf32>,
    %c3_219 = arith.constant 3 : index
    %c0_220 = arith.constant 0 : index
    %c0_221 = arith.constant 0 : index
    %529 = vector.load %arg4[%c3_219, %c0_220, %c0_221] : memref<4x32x128xf32, #tpu.memory_space<vmem>>, vector<1x32x128xf32>
    %530 = vector.shape_cast %529 : vector<1x32x128xf32> to vector<32x128xf32>
    %cst_222 = arith.constant 0.000000e+00 : f32
    %531 = vector.broadcast %cst_222 : f32 to vector<2x32xf32>
    %cst_223 = arith.constant 0.000000e+00 : f32
    %532 = vector.broadcast %cst_223 : f32 to vector<2x32xf32>
    %c0_224 = arith.constant 0 : index
    %c0_225 = arith.constant 0 : index
    %533 = vector.load %arg12[%c0_224, %c0_225] : memref<16x128xf32, #tpu.memory_space<vmem>>, vector<2x128xf32>
    %cst_226 = arith.constant dense<0.000000e+00> : vector<2x128xf32>
    %534 = tpu.matmul %531, %530, %cst_226 {dimension_numbers = #tpu.dot_dimension_numbers<[1], [0], [0], [1], [0, 0, 1, 1], [], []>} : vector<2x32xf32>, vector<32x128xf32>, vector<2x128xf32> -> vector<2x128xf32>
    %535 = arith.addf %533, %534 : vector<2x128xf32>
    %536 = arith.negf %535 : vector<2x128xf32>
    %537 = math.exp %536 : vector<2x128xf32>
    %cst_227 = arith.constant 1.000000e+00 : f32
    %538 = vector.broadcast %cst_227 : f32 to vector<2x128xf32>
    %539 = arith.addf %538, %537 : vector<2x128xf32>
    %540 = arith.divf %538, %539 : vector<2x128xf32>
    %541 = vector.extract_strided_slice %540 {offsets = [0, 0], sizes = [2, 32], strides = [1, 1]} : vector<2x128xf32> to vector<2x32xf32>
    %542 = vector.extract_strided_slice %540 {offsets = [0, 32], sizes = [2, 32], strides = [1, 1]} : vector<2x128xf32> to vector<2x32xf32>
    %543 = vector.extract_strided_slice %540 {offsets = [0, 96], sizes = [2, 32], strides = [1, 1]} : vector<2x128xf32> to vector<2x32xf32>
    %544 = vector.extract_strided_slice %535 {offsets = [0, 64], sizes = [2, 32], strides = [1, 1]} : vector<2x128xf32> to vector<2x32xf32>
    %545 = math.tanh %544 : vector<2x32xf32>
    %546 = arith.mulf %542, %532 : vector<2x32xf32>
    %547 = arith.mulf %541, %545 : vector<2x32xf32>
    %548 = arith.addf %546, %547 : vector<2x32xf32>
    %549 = math.tanh %548 : vector<2x32xf32>
    %550 = arith.mulf %543, %549 : vector<2x32xf32>
    %c0_228 = arith.constant 0 : index
    %c0_229 = arith.constant 0 : index
    %551 = vector.load %arg11[%c0_228, %c0_229] : memref<16x32xf32, #tpu.memory_space<vmem>>, vector<2x32xf32>
    tpu.vector_store %arg11[%c0_228, %c0_229], %550 {strides = array<i32>} : memref<16x32xf32, #tpu.memory_space<vmem>>, vector<2x32xf32>,
    %c2_230 = arith.constant 2 : index
    %c0_231 = arith.constant 0 : index
    %552 = vector.load %arg12[%c2_230, %c0_231] : memref<16x128xf32, #tpu.memory_space<vmem>>, vector<2x128xf32>
    %cst_232 = arith.constant dense<0.000000e+00> : vector<2x128xf32>
    %553 = tpu.matmul %550, %530, %cst_232 {dimension_numbers = #tpu.dot_dimension_numbers<[1], [0], [0], [1], [0, 0, 1, 1], [], []>} : vector<2x32xf32>, vector<32x128xf32>, vector<2x128xf32> -> vector<2x128xf32>
    %554 = arith.addf %552, %553 : vector<2x128xf32>
    %555 = arith.negf %554 : vector<2x128xf32>
    %556 = math.exp %555 : vector<2x128xf32>
    %cst_233 = arith.constant 1.000000e+00 : f32
    %557 = vector.broadcast %cst_233 : f32 to vector<2x128xf32>
    %558 = arith.addf %557, %556 : vector<2x128xf32>
    %559 = arith.divf %557, %558 : vector<2x128xf32>
    %560 = vector.extract_strided_slice %559 {offsets = [0, 0], sizes = [2, 32], strides = [1, 1]} : vector<2x128xf32> to vector<2x32xf32>
    %561 = vector.extract_strided_slice %559 {offsets = [0, 32], sizes = [2, 32], strides = [1, 1]} : vector<2x128xf32> to vector<2x32xf32>
    %562 = vector.extract_strided_slice %559 {offsets = [0, 96], sizes = [2, 32], strides = [1, 1]} : vector<2x128xf32> to vector<2x32xf32>
    %563 = vector.extract_strided_slice %554 {offsets = [0, 64], sizes = [2, 32], strides = [1, 1]} : vector<2x128xf32> to vector<2x32xf32>
    %564 = math.tanh %563 : vector<2x32xf32>
    %565 = arith.mulf %561, %548 : vector<2x32xf32>
    %566 = arith.mulf %560, %564 : vector<2x32xf32>
    %567 = arith.addf %565, %566 : vector<2x32xf32>
    %568 = math.tanh %567 : vector<2x32xf32>
    %569 = arith.mulf %562, %568 : vector<2x32xf32>
    %c2_234 = arith.constant 2 : index
    %c0_235 = arith.constant 0 : index
    %570 = vector.load %arg11[%c2_234, %c0_235] : memref<16x32xf32, #tpu.memory_space<vmem>>, vector<2x32xf32>
    tpu.vector_store %arg11[%c2_234, %c0_235], %569 {strides = array<i32>} : memref<16x32xf32, #tpu.memory_space<vmem>>, vector<2x32xf32>,
    %c4_236 = arith.constant 4 : index
    %c0_237 = arith.constant 0 : index
    %571 = vector.load %arg12[%c4_236, %c0_237] : memref<16x128xf32, #tpu.memory_space<vmem>>, vector<2x128xf32>
    %cst_238 = arith.constant dense<0.000000e+00> : vector<2x128xf32>
    %572 = tpu.matmul %569, %530, %cst_238 {dimension_numbers = #tpu.dot_dimension_numbers<[1], [0], [0], [1], [0, 0, 1, 1], [], []>} : vector<2x32xf32>, vector<32x128xf32>, vector<2x128xf32> -> vector<2x128xf32>
    %573 = arith.addf %571, %572 : vector<2x128xf32>
    %574 = arith.negf %573 : vector<2x128xf32>
    %575 = math.exp %574 : vector<2x128xf32>
    %cst_239 = arith.constant 1.000000e+00 : f32
    %576 = vector.broadcast %cst_239 : f32 to vector<2x128xf32>
    %577 = arith.addf %576, %575 : vector<2x128xf32>
    %578 = arith.divf %576, %577 : vector<2x128xf32>
    %579 = vector.extract_strided_slice %578 {offsets = [0, 0], sizes = [2, 32], strides = [1, 1]} : vector<2x128xf32> to vector<2x32xf32>
    %580 = vector.extract_strided_slice %578 {offsets = [0, 32], sizes = [2, 32], strides = [1, 1]} : vector<2x128xf32> to vector<2x32xf32>
    %581 = vector.extract_strided_slice %578 {offsets = [0, 96], sizes = [2, 32], strides = [1, 1]} : vector<2x128xf32> to vector<2x32xf32>
    %582 = vector.extract_strided_slice %573 {offsets = [0, 64], sizes = [2, 32], strides = [1, 1]} : vector<2x128xf32> to vector<2x32xf32>
    %583 = math.tanh %582 : vector<2x32xf32>
    %584 = arith.mulf %580, %567 : vector<2x32xf32>
    %585 = arith.mulf %579, %583 : vector<2x32xf32>
    %586 = arith.addf %584, %585 : vector<2x32xf32>
    %587 = math.tanh %586 : vector<2x32xf32>
    %588 = arith.mulf %581, %587 : vector<2x32xf32>
    %c4_240 = arith.constant 4 : index
    %c0_241 = arith.constant 0 : index
    %589 = vector.load %arg11[%c4_240, %c0_241] : memref<16x32xf32, #tpu.memory_space<vmem>>, vector<2x32xf32>
    tpu.vector_store %arg11[%c4_240, %c0_241], %588 {strides = array<i32>} : memref<16x32xf32, #tpu.memory_space<vmem>>, vector<2x32xf32>,
    %c6_242 = arith.constant 6 : index
    %c0_243 = arith.constant 0 : index
    %590 = vector.load %arg12[%c6_242, %c0_243] : memref<16x128xf32, #tpu.memory_space<vmem>>, vector<2x128xf32>
    %cst_244 = arith.constant dense<0.000000e+00> : vector<2x128xf32>
    %591 = tpu.matmul %588, %530, %cst_244 {dimension_numbers = #tpu.dot_dimension_numbers<[1], [0], [0], [1], [0, 0, 1, 1], [], []>} : vector<2x32xf32>, vector<32x128xf32>, vector<2x128xf32> -> vector<2x128xf32>
    %592 = arith.addf %590, %591 : vector<2x128xf32>
    %593 = arith.negf %592 : vector<2x128xf32>
    %594 = math.exp %593 : vector<2x128xf32>
    %cst_245 = arith.constant 1.000000e+00 : f32
    %595 = vector.broadcast %cst_245 : f32 to vector<2x128xf32>
    %596 = arith.addf %595, %594 : vector<2x128xf32>
    %597 = arith.divf %595, %596 : vector<2x128xf32>
    %598 = vector.extract_strided_slice %597 {offsets = [0, 0], sizes = [2, 32], strides = [1, 1]} : vector<2x128xf32> to vector<2x32xf32>
    %599 = vector.extract_strided_slice %597 {offsets = [0, 32], sizes = [2, 32], strides = [1, 1]} : vector<2x128xf32> to vector<2x32xf32>
    %600 = vector.extract_strided_slice %597 {offsets = [0, 96], sizes = [2, 32], strides = [1, 1]} : vector<2x128xf32> to vector<2x32xf32>
    %601 = vector.extract_strided_slice %592 {offsets = [0, 64], sizes = [2, 32], strides = [1, 1]} : vector<2x128xf32> to vector<2x32xf32>
    %602 = math.tanh %601 : vector<2x32xf32>
    %603 = arith.mulf %599, %586 : vector<2x32xf32>
    %604 = arith.mulf %598, %602 : vector<2x32xf32>
    %605 = arith.addf %603, %604 : vector<2x32xf32>
    %606 = math.tanh %605 : vector<2x32xf32>
    %607 = arith.mulf %600, %606 : vector<2x32xf32>
    %c6_246 = arith.constant 6 : index
    %c0_247 = arith.constant 0 : index
    %608 = vector.load %arg11[%c6_246, %c0_247] : memref<16x32xf32, #tpu.memory_space<vmem>>, vector<2x32xf32>
    tpu.vector_store %arg11[%c6_246, %c0_247], %607 {strides = array<i32>} : memref<16x32xf32, #tpu.memory_space<vmem>>, vector<2x32xf32>,
    %c8_248 = arith.constant 8 : index
    %c0_249 = arith.constant 0 : index
    %609 = vector.load %arg12[%c8_248, %c0_249] : memref<16x128xf32, #tpu.memory_space<vmem>>, vector<2x128xf32>
    %cst_250 = arith.constant dense<0.000000e+00> : vector<2x128xf32>
    %610 = tpu.matmul %607, %530, %cst_250 {dimension_numbers = #tpu.dot_dimension_numbers<[1], [0], [0], [1], [0, 0, 1, 1], [], []>} : vector<2x32xf32>, vector<32x128xf32>, vector<2x128xf32> -> vector<2x128xf32>
    %611 = arith.addf %609, %610 : vector<2x128xf32>
    %612 = arith.negf %611 : vector<2x128xf32>
    %613 = math.exp %612 : vector<2x128xf32>
    %cst_251 = arith.constant 1.000000e+00 : f32
    %614 = vector.broadcast %cst_251 : f32 to vector<2x128xf32>
    %615 = arith.addf %614, %613 : vector<2x128xf32>
    %616 = arith.divf %614, %615 : vector<2x128xf32>
    %617 = vector.extract_strided_slice %616 {offsets = [0, 0], sizes = [2, 32], strides = [1, 1]} : vector<2x128xf32> to vector<2x32xf32>
    %618 = vector.extract_strided_slice %616 {offsets = [0, 32], sizes = [2, 32], strides = [1, 1]} : vector<2x128xf32> to vector<2x32xf32>
    %619 = vector.extract_strided_slice %616 {offsets = [0, 96], sizes = [2, 32], strides = [1, 1]} : vector<2x128xf32> to vector<2x32xf32>
    %620 = vector.extract_strided_slice %611 {offsets = [0, 64], sizes = [2, 32], strides = [1, 1]} : vector<2x128xf32> to vector<2x32xf32>
    %621 = math.tanh %620 : vector<2x32xf32>
    %622 = arith.mulf %618, %605 : vector<2x32xf32>
    %623 = arith.mulf %617, %621 : vector<2x32xf32>
    %624 = arith.addf %622, %623 : vector<2x32xf32>
    %625 = math.tanh %624 : vector<2x32xf32>
    %626 = arith.mulf %619, %625 : vector<2x32xf32>
    %c8_252 = arith.constant 8 : index
    %c0_253 = arith.constant 0 : index
    %627 = vector.load %arg11[%c8_252, %c0_253] : memref<16x32xf32, #tpu.memory_space<vmem>>, vector<2x32xf32>
    tpu.vector_store %arg11[%c8_252, %c0_253], %626 {strides = array<i32>} : memref<16x32xf32, #tpu.memory_space<vmem>>, vector<2x32xf32>,
    %c10_254 = arith.constant 10 : index
    %c0_255 = arith.constant 0 : index
    %628 = vector.load %arg12[%c10_254, %c0_255] : memref<16x128xf32, #tpu.memory_space<vmem>>, vector<2x128xf32>
    %cst_256 = arith.constant dense<0.000000e+00> : vector<2x128xf32>
    %629 = tpu.matmul %626, %530, %cst_256 {dimension_numbers = #tpu.dot_dimension_numbers<[1], [0], [0], [1], [0, 0, 1, 1], [], []>} : vector<2x32xf32>, vector<32x128xf32>, vector<2x128xf32> -> vector<2x128xf32>
    %630 = arith.addf %628, %629 : vector<2x128xf32>
    %631 = arith.negf %630 : vector<2x128xf32>
    %632 = math.exp %631 : vector<2x128xf32>
    %cst_257 = arith.constant 1.000000e+00 : f32
    %633 = vector.broadcast %cst_257 : f32 to vector<2x128xf32>
    %634 = arith.addf %633, %632 : vector<2x128xf32>
    %635 = arith.divf %633, %634 : vector<2x128xf32>
    %636 = vector.extract_strided_slice %635 {offsets = [0, 0], sizes = [2, 32], strides = [1, 1]} : vector<2x128xf32> to vector<2x32xf32>
    %637 = vector.extract_strided_slice %635 {offsets = [0, 32], sizes = [2, 32], strides = [1, 1]} : vector<2x128xf32> to vector<2x32xf32>
    %638 = vector.extract_strided_slice %635 {offsets = [0, 96], sizes = [2, 32], strides = [1, 1]} : vector<2x128xf32> to vector<2x32xf32>
    %639 = vector.extract_strided_slice %630 {offsets = [0, 64], sizes = [2, 32], strides = [1, 1]} : vector<2x128xf32> to vector<2x32xf32>
    %640 = math.tanh %639 : vector<2x32xf32>
    %641 = arith.mulf %637, %624 : vector<2x32xf32>
    %642 = arith.mulf %636, %640 : vector<2x32xf32>
    %643 = arith.addf %641, %642 : vector<2x32xf32>
    %644 = math.tanh %643 : vector<2x32xf32>
    %645 = arith.mulf %638, %644 : vector<2x32xf32>
    %c10_258 = arith.constant 10 : index
    %c0_259 = arith.constant 0 : index
    %646 = vector.load %arg11[%c10_258, %c0_259] : memref<16x32xf32, #tpu.memory_space<vmem>>, vector<2x32xf32>
    tpu.vector_store %arg11[%c10_258, %c0_259], %645 {strides = array<i32>} : memref<16x32xf32, #tpu.memory_space<vmem>>, vector<2x32xf32>,
    %c12_260 = arith.constant 12 : index
    %c0_261 = arith.constant 0 : index
    %647 = vector.load %arg12[%c12_260, %c0_261] : memref<16x128xf32, #tpu.memory_space<vmem>>, vector<2x128xf32>
    %cst_262 = arith.constant dense<0.000000e+00> : vector<2x128xf32>
    %648 = tpu.matmul %645, %530, %cst_262 {dimension_numbers = #tpu.dot_dimension_numbers<[1], [0], [0], [1], [0, 0, 1, 1], [], []>} : vector<2x32xf32>, vector<32x128xf32>, vector<2x128xf32> -> vector<2x128xf32>
    %649 = arith.addf %647, %648 : vector<2x128xf32>
    %650 = arith.negf %649 : vector<2x128xf32>
    %651 = math.exp %650 : vector<2x128xf32>
    %cst_263 = arith.constant 1.000000e+00 : f32
    %652 = vector.broadcast %cst_263 : f32 to vector<2x128xf32>
    %653 = arith.addf %652, %651 : vector<2x128xf32>
    %654 = arith.divf %652, %653 : vector<2x128xf32>
    %655 = vector.extract_strided_slice %654 {offsets = [0, 0], sizes = [2, 32], strides = [1, 1]} : vector<2x128xf32> to vector<2x32xf32>
    %656 = vector.extract_strided_slice %654 {offsets = [0, 32], sizes = [2, 32], strides = [1, 1]} : vector<2x128xf32> to vector<2x32xf32>
    %657 = vector.extract_strided_slice %654 {offsets = [0, 96], sizes = [2, 32], strides = [1, 1]} : vector<2x128xf32> to vector<2x32xf32>
    %658 = vector.extract_strided_slice %649 {offsets = [0, 64], sizes = [2, 32], strides = [1, 1]} : vector<2x128xf32> to vector<2x32xf32>
    %659 = math.tanh %658 : vector<2x32xf32>
    %660 = arith.mulf %656, %643 : vector<2x32xf32>
    %661 = arith.mulf %655, %659 : vector<2x32xf32>
    %662 = arith.addf %660, %661 : vector<2x32xf32>
    %663 = math.tanh %662 : vector<2x32xf32>
    %664 = arith.mulf %657, %663 : vector<2x32xf32>
    %c12_264 = arith.constant 12 : index
    %c0_265 = arith.constant 0 : index
    %665 = vector.load %arg11[%c12_264, %c0_265] : memref<16x32xf32, #tpu.memory_space<vmem>>, vector<2x32xf32>
    tpu.vector_store %arg11[%c12_264, %c0_265], %664 {strides = array<i32>} : memref<16x32xf32, #tpu.memory_space<vmem>>, vector<2x32xf32>,
    %c14_266 = arith.constant 14 : index
    %c0_267 = arith.constant 0 : index
    %666 = vector.load %arg12[%c14_266, %c0_267] : memref<16x128xf32, #tpu.memory_space<vmem>>, vector<2x128xf32>
    %cst_268 = arith.constant dense<0.000000e+00> : vector<2x128xf32>
    %667 = tpu.matmul %664, %530, %cst_268 {dimension_numbers = #tpu.dot_dimension_numbers<[1], [0], [0], [1], [0, 0, 1, 1], [], []>} : vector<2x32xf32>, vector<32x128xf32>, vector<2x128xf32> -> vector<2x128xf32>
    %668 = arith.addf %666, %667 : vector<2x128xf32>
    %669 = arith.negf %668 : vector<2x128xf32>
    %670 = math.exp %669 : vector<2x128xf32>
    %cst_269 = arith.constant 1.000000e+00 : f32
    %671 = vector.broadcast %cst_269 : f32 to vector<2x128xf32>
    %672 = arith.addf %671, %670 : vector<2x128xf32>
    %673 = arith.divf %671, %672 : vector<2x128xf32>
    %674 = vector.extract_strided_slice %673 {offsets = [0, 0], sizes = [2, 32], strides = [1, 1]} : vector<2x128xf32> to vector<2x32xf32>
    %675 = vector.extract_strided_slice %673 {offsets = [0, 32], sizes = [2, 32], strides = [1, 1]} : vector<2x128xf32> to vector<2x32xf32>
    %676 = vector.extract_strided_slice %673 {offsets = [0, 96], sizes = [2, 32], strides = [1, 1]} : vector<2x128xf32> to vector<2x32xf32>
    %677 = vector.extract_strided_slice %668 {offsets = [0, 64], sizes = [2, 32], strides = [1, 1]} : vector<2x128xf32> to vector<2x32xf32>
    %678 = math.tanh %677 : vector<2x32xf32>
    %679 = arith.mulf %675, %662 : vector<2x32xf32>
    %680 = arith.mulf %674, %678 : vector<2x32xf32>
    %681 = arith.addf %679, %680 : vector<2x32xf32>
    %682 = math.tanh %681 : vector<2x32xf32>
    %683 = arith.mulf %676, %682 : vector<2x32xf32>
    %c14_270 = arith.constant 14 : index
    %c0_271 = arith.constant 0 : index
    %684 = vector.load %arg11[%c14_270, %c0_271] : memref<16x32xf32, #tpu.memory_space<vmem>>, vector<2x32xf32>
    tpu.vector_store %arg11[%c14_270, %c0_271], %683 {strides = array<i32>} : memref<16x32xf32, #tpu.memory_space<vmem>>, vector<2x32xf32>,
    %c3_272 = arith.constant 3 : index
    %c0_273 = arith.constant 0 : index
    %c0_274 = arith.constant 0 : index
    %685 = vector.load %arg9[%c3_272, %c0_273, %c0_274] : memref<4x2x32xf32, #tpu.memory_space<vmem>>, vector<1x2x32xf32>
    %686 = vector.shape_cast %685 : vector<1x2x32xf32> to vector<2x32xf32>
    %687 = vector.shape_cast %683 : vector<2x32xf32> to vector<1x2x32xf32>
    tpu.vector_store %arg9[%c3_272, %c0_273, %c0_274], %687 {strides = array<i32>} : memref<4x2x32xf32, #tpu.memory_space<vmem>>, vector<1x2x32xf32>,
    %c3_275 = arith.constant 3 : index
    %c0_276 = arith.constant 0 : index
    %c0_277 = arith.constant 0 : index
    %688 = vector.load %arg10[%c3_275, %c0_276, %c0_277] : memref<4x2x32xf32, #tpu.memory_space<vmem>>, vector<1x2x32xf32>
    %689 = vector.shape_cast %688 : vector<1x2x32xf32> to vector<2x32xf32>
    %690 = vector.shape_cast %681 : vector<2x32xf32> to vector<1x2x32xf32>
    tpu.vector_store %arg10[%c3_275, %c0_276, %c0_277], %690 {strides = array<i32>} : memref<4x2x32xf32, #tpu.memory_space<vmem>>, vector<1x2x32xf32>,
    %c0_278 = arith.constant 0 : index
    %c0_279 = arith.constant 0 : index
    %691 = vector.load %arg11[%c0_278, %c0_279] : memref<16x32xf32, #tpu.memory_space<vmem>>, vector<16x32xf32>
    %c0_280 = arith.constant 0 : index
    %c0_281 = arith.constant 0 : index
    %692 = vector.load %arg6[%c0_280, %c0_281] : memref<32x16xf32, #tpu.memory_space<vmem>>, vector<32x16xf32>
    %cst_282 = arith.constant dense<0.000000e+00> : vector<16x16xf32>
    %693 = tpu.matmul %691, %692, %cst_282 {dimension_numbers = #tpu.dot_dimension_numbers<[1], [0], [0], [1], [0, 0, 1, 1], [], []>} : vector<16x32xf32>, vector<32x16xf32>, vector<16x16xf32> -> vector<16x16xf32>
    %c0_283 = arith.constant 0 : index
    %c0_284 = arith.constant 0 : index
    %694 = vector.load %arg7[%c0_283, %c0_284] : memref<1x16xf32, #tpu.memory_space<vmem>>, vector<1x16xf32>
    %695 = vector.broadcast %694 : vector<1x16xf32> to vector<16x16xf32>
    %696 = arith.addf %693, %695 : vector<16x16xf32>
    %c0_285 = arith.constant 0 : index
    %c0_286 = arith.constant 0 : index
    %697 = vector.load %arg8[%c0_285, %c0_286] : memref<16x16xf32, #tpu.memory_space<vmem>>, vector<16x16xf32>
    tpu.vector_store %arg8[%c0_285, %c0_286], %696 {strides = array<i32>} : memref<16x16xf32, #tpu.memory_space<vmem>>, vector<16x16xf32>,
    return
  }
}

</mosaic_0001>

<bundles_post_ra>
// kernel: tpu_custom_call.1
= control target key start
LH: loop header
LB: loop body
LE: loop exit
PB: predicated region body
PF: predicated region fallthrough
CT: control target
= control target key end

     0   :  { %16 = vsyncpa [#allocation5], 0  ;;  %s5973_s0 = inlined_call_operand.vmem [shape: f32[16,12], index: 0, kind: input, shape index: {}]   ;;  %s5974_s1 = inlined_call_operand.vmem [shape: f32[12,32], index: 1, kind: input, shape index: {}]   ;;  %s5975_s2 = inlined_call_operand.vmem [shape: f32[1,32], index: 2, kind: input, shape index: {}]   ;;  %s5976_s3 = inlined_call_operand.hbm [shape: f32[4,32,128], index: 3, kind: input, shape index: {}]   ;;  %s5977_s4 = inlined_call_operand.hbm [shape: f32[4,32,128], index: 4, kind: input, shape index: {}]   ;;  %s5978_s5 = inlined_call_operand.vmem [shape: f32[4,1,128], index: 5, kind: input, shape index: {}]   ;;  %s5979_s6 = inlined_call_operand.vmem [shape: f32[32,16], index: 6, kind: input, shape index: {}]   ;;  %s5980_s7 = inlined_call_operand.vmem [shape: f32[1,16], index: 7, kind: input, shape index: {}]   ;;  %s5981_s8 = inlined_call_operand.hbm [shape: f32[16,16], index: 8, kind: output, shape index: {0}]   ;;  %s5982_s9 = inlined_call_operand.hbm [shape: f32[4,2,32], index: 9, kind: output, shape index: {1}]   ;;  %s5983_s10 = inlined_call_operand.hbm [shape: f32[4,2,32], index: 10, kind: output, shape index: {2}]  }
   0x1   :  { %17 = vsyncpa [#allocation8], 0 }
   0x2   :  { %18 = vsyncpa [#allocation6], 0 }
   0x3   :  { %19 = vsyncpa [#allocation11], 0  ;;  %s5356_s13 = smov [#allocation4]   ;;  %s5238_s17 = scalar_lea.hbm %s5976_s3, 2048 }
   0x4   :  { %s31_s14 = sshll.u32 %s5356_s13, 4  ;;  %p5239_p0 = scmp.ne.s32.totalorder %s5976_s3, %s5238_s17  ;;  %s32_s14 = int_to_ptr.vmem [resolvable:$true] %s31_s14 }
   0x5   :  { %p5242_p1 = scmp.lt.u32.totalorder %s5238_s17, %s5976_s3 }
   0x7   :  { %p5244_p2 = pnand %p5242_p1, %p5239_p0 }
   0x9   :  { %5247 = shalt.err (!%p5244_p2)
}
   0xa   :  { %s5248_s22 = scalar_lea.vmem %s32_s14, 2048  ;;  %p5253_p4 = scmp.lt.s32.totalorder %s32_s14, %s32_s14 }
   0xb   :  { %p5249_p3 = scmp.ne.s32.totalorder %s32_s14, %s5248_s22  ;;  %p5254_p5 = scmp.lt.s32.totalorder %s5248_s22, %s5248_s22 }
   0xd   :  { %p5255_p6 = por %p5254_p5, %p5253_p4 }
   0xf   :  { %p5256_p7 = pnand %p5255_p6, %p5249_p3 }
  0x11   :  { %5259 = shalt.err (!%p5256_p7)
}
  0x12   :  { %s5357_s23 = smov 128   ;;  %s5358_s24 = smov 8  }
  0x13   :  { %37 = dma.hbm_to_vmem [thread:$0]  %s5976_s3, 2048, %s32_s14, [#allocation5], %s5357_s23, %s5357_s23, %s5358_s24  }
  0x14   :  { %s5359_s27 = smov [#allocation7]   ;;  %s5260_s11 = scalar_lea.hbm %s5977_s4, 2048 }
  0x15   :  { %s43_s28 = sshll.u32 %s5359_s27, 4  ;;  %p5261_p8 = scmp.ne.s32.totalorder %s5977_s4, %s5260_s11  ;;  %s44_s28 = int_to_ptr.vmem [resolvable:$true] %s43_s28 }
  0x16   :  { %p5264_p9 = scmp.lt.u32.totalorder %s5260_s11, %s5977_s4 }
  0x18   :  { %p5266_p10 = pnand %p5264_p9, %p5261_p8 }
  0x1a   :  { %5269 = shalt.err (!%p5266_p10)
}
  0x1b   :  { %s5270_s17 = scalar_lea.vmem %s44_s28, 2048  ;;  %p5275_p12 = scmp.lt.s32.totalorder %s44_s28, %s44_s28 }
  0x1c   :  { %p5271_p11 = scmp.ne.s32.totalorder %s44_s28, %s5270_s17  ;;  %p5276_p13 = scmp.lt.s32.totalorder %s5270_s17, %s5270_s17 }
  0x1e   :  { %p5277_p0 = por %p5276_p13, %p5275_p12 }
  0x20   :  { %p5278_p1 = pnand %p5277_p0, %p5271_p11 }
  0x22   :  { %5281 = shalt.err (!%p5278_p1)
}
  0x23   :  { %49 = dma.hbm_to_vmem [thread:$0]  %s5977_s4, 2048, %s44_s28, [#allocation8], %s5357_s23, %s5357_s23, %s5358_s24  }
  0x24   :  { %5348 = dma.done.wait [#allocation5], 2048  }
  0x25   :  { %5349 = vsyncadd [#allocation5], 4294965248 }
  0x26   :  { %5350 = dma.done.wait [#allocation8], 2048  }
  0x27   :  { %5351 = vsyncadd [#allocation8], 4294965248  ;;  %vm80_vm0 = vcmask 1043456   ;;  %vm73_vm1 = vcmask 97280   ;;  %vm5360_vm2 = vmmov 1   ;;  %v64_v0 = vld [vmem:[%s5974_s1] sm:$0xff] }
  0x28   :  { %vm4730_vm3 = vmpackc.low %vm80_vm0, %vm5360_vm2  ;;  %v65_v1 = vld [vmem:[%s5974_s1 + $0x8] sm:$0xf]  ;;  %v62_v2 = vld [vmem:[%s5973_s0] sm:$0xff]  ;;  %v5361_v14 = vmov 0.0|0.0   ;;  %vm5362_vm4 = vmmov 0   ;;  %v5363_v17 = vmov 0.0  }
  0x29   :  { %v4729_v3 = vpack.c.bf16 %v65_v1, %v64_v0  ;;  %4319 = vmatprep.mubr.msk.f32.mxu0 %vm73_vm1, %v62_v2  ;;  %v63_v4 = vld [vmem:[%s5973_s0 + $0x8] sm:$0xff]  ;;  %v164_v5 = vld [vmem:[#allocation4] sm:$0xff]  ;;  %v166_v8 = vld [vmem:[#allocation4 + $0x10] sm:$0xff]  ;;  %vm159_vm5 = vcmask 261120   ;;  %s5364_s28 = smov 64   ;;  %s5365_s29 = smov 32  }
  0x2a   :  { %v165_v6 = vld [vmem:[#allocation4 + $0x8] sm:$0xff]  ;;  %v167_v9 = vld [vmem:[#allocation4 + $0x18] sm:$0xff]  ;;  %v258_v11 = vld [vmem:[#allocation7] sm:$0xff]  ;;  %vm365_vm6 = vcmask 254976  }
  0x2b   :  { %4731 = vmatprep.subr.msk.bf16.mxu0 %vm4730_vm3, %v4729_v3  ;;  %v4735_v7 = vpack.c.bf16 %v165_v6, %v164_v5  ;;  %v4739_v10 = vpack.c.bf16 %v167_v9, %v166_v8  ;;  %v259_v12 = vld [vmem:[#allocation7 + $0x8] sm:$0xff]  ;;  %v260_v13 = vld [vmem:[#allocation7 + $0x10] sm:$0xff]  ;;  %v261_v16 = vld [vmem:[#allocation7 + $0x18] sm:$0xff] }
  0x2c   :  { %4734 = vmatpush3.bf16.msk.msra.mxu0 %vm4730_vm3, %v4729_v3  ;;  %v5469_v15 = vpack.c.bf16 %v259_v12, %v258_v11  ;;  %v5475_v18 = vpack.c.bf16 %v261_v16, %v260_v13  ;;  %v4039_v19 = vld [vmem:[%s5975_s2] ss:$0 sm:$0xff] }
  0x2d   :  { %4736 = vmatprep.subr.bf16.mxu1 %v4735_v7  ;;  %4743 = vmatprep.subr.bf16.mxu0 %v5361_v14  ;;  %v4043_v28 = vld [vmem:[%s5978_s5] ss:$0 sm:$0xff] }
  0x2e   :  { %4738 = vmatpush3.bf16.msra.mxu1 %v4735_v7 }
  0x2f   :  { %4320 = vmatmul.mubr.msk.f32.vlgmr.msra.gmra.mrb[0].mxu0 %vm73_vm1, %v63_v4  ;;  %4740 = vmatprep.subr.bf16.mxu1 %v4739_v10 }
  0x30   :  { %4341 = vmatprep.mubr.msk.f32.mxu0 %vm5362_vm4, %v5363_v17  ;;  %4745 = vmatpush3.bf16.msra.mxu0 %v5469_v15 }
  0x31   :  { %4746 = vmatprep.subr.bf16.mxu0 %v5361_v14 }
  0x32   :  { %4742 = vmatpush3.bf16.msra.mxu1 %v4739_v10 }
  0x33   :  { %4749 = vmatprep.subr.bf16.mxu1 %v5361_v14 }
  0x34   :  { %4748 = vmatpush3.bf16.msra.mxu0 %v5475_v18 }
  0x35   :  { %4755 = vmatprep.subr.bf16.mxu0 %v5361_v14 }
  0x37   :  { %4342 = vmatmul.mubr.f32.vlgmr.msra.gmra.mrb[2].mxu0 %v5363_v17 }
  0x38   :  { %4757 = vmatpush3.bf16.msra.mxu0 %v5469_v15  ;;  %4363 = vmatprep.mubr.msk.f32.mxu0 %vm5362_vm4, %v5363_v17 }
  0x39   :  { %4758 = vmatprep.subr.bf16.mxu0 %v5361_v14 }
  0x3c   :  { %4760 = vmatpush3.bf16.msra.mxu0 %v5475_v18 }
  0x3d   :  { %4767 = vmatprep.subr.bf16.mxu0 %v5361_v14 }
 0x102   :  { %v4321_v20 = vpop.f32.mrb[0].mxu0 }
 0x103   :  { %v156_v21 = vadd.f32 %v4321_v20, %v4039_v19  ;;  %v150_v22 = vpop.f32.mrb[1].mxu0 }
 0x104   :  { %v151_v23 = vadd.f32 %v4039_v19, %v150_v22 }
 0x105   :  { %161 = vst.msk [vmem:[#allocation2 + $0x8] sm:$0xff] %vm159_vm5, %v156_v21 }
 0x106   :  { %160 = vst.msk [vmem:[#allocation2] sm:$0xff] %vm159_vm5, %v151_v23 }
 0x10a   :  { %v332_v26 = vpop.f32.mrb[2].mxu0 }
 0x10b   :  { %v4343_v27 = vpop.f32.mrb[3].mxu0 }
 0x10c   :  { %v163_v25 = vld [vmem:[#allocation2 + $0x8] sm:$0xff] }
 0x10d   :  { %v162_v24 = vld [vmem:[#allocation2] sm:$0xff] }
 0x10e   :  { %4330 = vmatprep.mubr.msk.f32.mxu1 %vm159_vm5, %v162_v24 }
 0x10f   :  { %4331 = vmatmul.mubr.msk.f32.vlgmr.msra.gmra.mrb[0].mxu1 %vm159_vm5, %v163_v25 }
 0x110   :  { %4751 = vmatpush3.bf16.msra.mxu1 %v5469_v15  ;;  %4352 = vmatprep.mubr.msk.f32.mxu1 %vm5362_vm4, %v5363_v17 }
 0x111   :  { %4752 = vmatprep.subr.bf16.mxu1 %v5361_v14 }
 0x114   :  { %4754 = vmatpush3.bf16.msra.mxu1 %v5475_v18 }
 0x115   :  { %4761 = vmatprep.subr.bf16.mxu1 %v5361_v14 }
 0x1e2   :  { %v4332_v29 = vpop.f32.mrb[0].mxu1 }
 0x1e3   :  { %v253_v30 = vadd.f32 %v4332_v29, %v4043_v28  ;;  %v247_v31 = vpop.f32.mrb[1].mxu1 }
 0x1e4   :  { %v248_v32 = vadd.f32 %v4043_v28, %v247_v31 }
 0x1e5   :  { %257 = vst [vmem:[#allocation3 + $0x8] sm:$0xff] %v253_v30 }
 0x1e6   :  { %256 = vst [vmem:[#allocation3] sm:$0xff] %v248_v32 }
 0x1ed   :  { %v262_v33 = vld [vmem:[#allocation3] sm:$0x3]  ;;  %v367_v49 = vld [vmem:[#allocation3 + $0x2] sm:$0x3]  ;;  %v470_v3 = vld [vmem:[#allocation3 + $0x4] sm:$0x3] }
 0x1ee   :  { %v336_v34 = vadd.f32 %v332_v26, %v262_v33  ;;  %v573_v25 = vld [vmem:[#allocation3 + $0x6] sm:$0x3] }
 0x1f0   :  { %4982 = vtanh.f32 %v336_v34  ;;  %v4046_v36 = vmul.f32 -1.442695, %v336_v34 }
 0x1f2   :  { %4984 = vpow2.f32 %v4046_v36 }
 0x1fa   :  { %v4983_v35 = vpop.eup %4982 }
 0x1fb   :  { %346 = vrot.lane.b32.xlu0 %v4983_v35, %s5364_s28 }
 0x1fc   :  { %v4985_v37 = vpop.eup %4984 }
 0x1fd   :  { %v340_v38 = vadd.f32 1.0, %v4985_v37 }
 0x1ff   :  { %4986 = vrcp.f32 %v340_v38 }
 0x209   :  { %v4987_v39 = vpop.eup %4986 }
 0x20a   :  { %v344_v42 = vmul.f32 0.0, %v4987_v39 }
 0x26d   :  { %v347_v40 = vpop.permute.xlu0 %346 }
 0x26e   :  { %v349_v41 = vmul.f32 %v4987_v39, %v347_v40 }
 0x270   :  { %351 = vrot.lane.b32.xlu0 %v349_v41, %s5365_s29 }
 0x2e2   :  { %v352_v43 = vpop.permute.xlu0 %351 }
 0x2e3   :  { %v354_v44 = vadd.f32 %v352_v43, %v344_v42  ;;  %v676_v43 = vld [vmem:[#allocation3 + $0x8] sm:$0x3] }
 0x2e5   :  { %4988 = vtanh.f32 %v354_v44 }
 0x2ef   :  { %v4989_v45 = vpop.eup %4988 }
 0x2f0   :  { %357 = vrot.lane.b32.xlu1 %v4989_v45, %s5364_s28 }
 0x362   :  { %v358_v46 = vpop.permute.xlu1 %357 }
 0x363   :  { %v360_v47 = vmul.f32 %v4987_v39, %v358_v46 }
 0x365   :  { %362 = vrot.lane.b32.xlu1 %v360_v47, %s5365_s29 }
 0x3d7   :  { %v363_v48 = vpop.permute.xlu1 %362 }
 0x3d8   :  { %366 = vst.msk [vmem:[#allocation2] sm:$0x3] %vm365_vm6, %v363_v48  ;;  %4353 = vmatmul.mubr.msk.f32.vlgmr.msra.gmra.mrb[2].mxu1 %vm159_vm5, %v363_v48 }
 0x3d9   :  { %4763 = vmatpush3.bf16.msra.mxu1 %v5469_v15  ;;  %4374 = vmatprep.mubr.msk.f32.mxu1 %vm5362_vm4, %v5363_v17 }
 0x3da   :  { %4764 = vmatprep.subr.bf16.mxu1 %v5361_v14 }
 0x3dd   :  { %4766 = vmatpush3.bf16.msra.mxu1 %v5475_v18 }
 0x3de   :  { %4773 = vmatprep.subr.bf16.mxu1 %v5361_v14 }
 0x4ab   :  { %v436_v50 = vpop.f32.mrb[2].mxu1 }
 0x4ac   :  { %v440_v51 = vadd.f32 %v436_v50, %v367_v49  ;;  %v4354_v52 = vpop.f32.mrb[3].mxu1 }
 0x4ae   :  { %4990 = vtanh.f32 %v440_v51  ;;  %v4048_v54 = vmul.f32 -1.442695, %v440_v51 }
 0x4b0   :  { %4992 = vpow2.f32 %v4048_v54 }
 0x4b8   :  { %v4991_v53 = vpop.eup %4990 }
 0x4b9   :  { %450 = vrot.lane.b32.xlu0 %v4991_v53, %s5364_s28 }
 0x4ba   :  { %v4993_v55 = vpop.eup %4992 }
 0x4bb   :  { %v444_v56 = vadd.f32 1.0, %v4993_v55 }
 0x4bd   :  { %4994 = vrcp.f32 %v444_v56 }
 0x4c7   :  { %v4995_v57 = vpop.eup %4994 }
 0x4c8   :  { %v448_v60 = vmul.f32 %v4995_v57, %v354_v44 }
 0x52b   :  { %v451_v58 = vpop.permute.xlu0 %450 }
 0x52c   :  { %v453_v59 = vmul.f32 %v4995_v57, %v451_v58 }
 0x52e   :  { %455 = vrot.lane.b32.xlu1 %v453_v59, %s5365_s29 }
 0x5a0   :  { %v456_v61 = vpop.permute.xlu1 %455 }
 0x5a1   :  { %v458_v62 = vadd.f32 %v456_v61, %v448_v60  ;;  %v779_v61 = vld [vmem:[#allocation3 + $0xa] sm:$0x3] }
 0x5a3   :  { %4996 = vtanh.f32 %v458_v62 }
 0x5ad   :  { %v4997_v63 = vpop.eup %4996 }
 0x5ae   :  { %461 = vrot.lane.b32.xlu0 %v4997_v63, %s5364_s28 }
 0x620   :  { %v462_v0 = vpop.permute.xlu0 %461 }
 0x621   :  { %v464_v1 = vmul.f32 %v4995_v57, %v462_v0 }
 0x623   :  { %466 = vrot.lane.b32.xlu1 %v464_v1, %s5365_s29 }
 0x695   :  { %v467_v2 = vpop.permute.xlu1 %466 }
 0x696   :  { %469 = vst.msk [vmem:[#allocation2 + $0x2] sm:$0x3] %vm365_vm6, %v467_v2  ;;  %4364 = vmatmul.mubr.msk.f32.vlgmr.msra.gmra.mrb[4].mxu0 %vm159_vm5, %v467_v2 }
 0x697   :  { %4769 = vmatpush3.bf16.msra.mxu0 %v5469_v15  ;;  %4385 = vmatprep.mubr.msk.f32.mxu0 %vm5362_vm4, %v5363_v17 }
 0x698   :  { %4770 = vmatprep.subr.bf16.mxu0 %v5361_v14 }
 0x69b   :  { %4772 = vmatpush3.bf16.msra.mxu0 %v5475_v18 }
 0x69c   :  { %4779 = vmatprep.subr.bf16.mxu0 %v5361_v14 }
 0x769   :  { %v539_v4 = vpop.f32.mrb[4].mxu0 }
 0x76a   :  { %v543_v5 = vadd.f32 %v539_v4, %v470_v3  ;;  %v4365_v6 = vpop.f32.mrb[5].mxu0 }
 0x76c   :  { %4998 = vtanh.f32 %v543_v5  ;;  %v4050_v8 = vmul.f32 -1.442695, %v543_v5 }
 0x76e   :  { %5000 = vpow2.f32 %v4050_v8 }
 0x776   :  { %v4999_v7 = vpop.eup %4998 }
 0x777   :  { %553 = vrot.lane.b32.xlu0 %v4999_v7, %s5364_s28 }
 0x778   :  { %v5001_v9 = vpop.eup %5000 }
 0x779   :  { %v547_v10 = vadd.f32 1.0, %v5001_v9 }
 0x77b   :  { %5002 = vrcp.f32 %v547_v10 }
 0x785   :  { %v5003_v11 = vpop.eup %5002 }
 0x786   :  { %v551_v16 = vmul.f32 %v5003_v11, %v458_v62 }
 0x7e9   :  { %v554_v12 = vpop.permute.xlu0 %553 }
 0x7ea   :  { %v556_v13 = vmul.f32 %v5003_v11, %v554_v12 }
 0x7ec   :  { %558 = vrot.lane.b32.xlu1 %v556_v13, %s5365_s29 }
 0x85e   :  { %v559_v19 = vpop.permute.xlu1 %558 }
 0x85f   :  { %v561_v20 = vadd.f32 %v559_v19, %v551_v16  ;;  %v882_v16 = vld [vmem:[#allocation3 + $0xc] sm:$0x3] }
 0x861   :  { %5004 = vtanh.f32 %v561_v20 }
 0x86b   :  { %v5005_v21 = vpop.eup %5004 }
 0x86c   :  { %564 = vrot.lane.b32.xlu0 %v5005_v21, %s5364_s28 }
 0x8de   :  { %v565_v22 = vpop.permute.xlu0 %564 }
 0x8df   :  { %v567_v23 = vmul.f32 %v5003_v11, %v565_v22 }
 0x8e1   :  { %569 = vrot.lane.b32.xlu1 %v567_v23, %s5365_s29 }
 0x953   :  { %v570_v24 = vpop.permute.xlu1 %569 }
 0x954   :  { %572 = vst.msk [vmem:[#allocation2 + $0x4] sm:$0x3] %vm365_vm6, %v570_v24  ;;  %4375 = vmatmul.mubr.msk.f32.vlgmr.msra.gmra.mrb[4].mxu1 %vm159_vm5, %v570_v24 }
 0x955   :  { %4775 = vmatpush3.bf16.msra.mxu1 %v5469_v15  ;;  %4396 = vmatprep.mubr.msk.f32.mxu1 %vm5362_vm4, %v5363_v17 }
 0x956   :  { %4776 = vmatprep.subr.bf16.mxu1 %v5361_v14 }
 0x959   :  { %4778 = vmatpush3.bf16.msra.mxu1 %v5475_v18 }
 0x95a   :  { %4785 = vmatprep.subr.bf16.mxu1 %v5361_v14 }
 0xa27   :  { %v642_v26 = vpop.f32.mrb[4].mxu1 }
 0xa28   :  { %v646_v27 = vadd.f32 %v642_v26, %v573_v25  ;;  %v4376_v28 = vpop.f32.mrb[5].mxu1 }
 0xa2a   :  { %5006 = vtanh.f32 %v646_v27  ;;  %v4052_v30 = vmul.f32 -1.442695, %v646_v27 }
 0xa2c   :  { %5008 = vpow2.f32 %v4052_v30 }
 0xa34   :  { %v5007_v29 = vpop.eup %5006 }
 0xa35   :  { %656 = vrot.lane.b32.xlu0 %v5007_v29, %s5364_s28 }
 0xa36   :  { %v5009_v31 = vpop.eup %5008 }
 0xa37   :  { %v650_v32 = vadd.f32 1.0, %v5009_v31 }
 0xa39   :  { %5010 = vrcp.f32 %v650_v32 }
 0xa43   :  { %v5011_v33 = vpop.eup %5010 }
 0xa44   :  { %v654_v36 = vmul.f32 %v5011_v33, %v561_v20 }
 0xaa7   :  { %v657_v34 = vpop.permute.xlu0 %656 }
 0xaa8   :  { %v659_v35 = vmul.f32 %v5011_v33, %v657_v34 }
 0xaaa   :  { %661 = vrot.lane.b32.xlu1 %v659_v35, %s5365_s29 }
 0xb1c   :  { %v662_v37 = vpop.permute.xlu1 %661 }
 0xb1d   :  { %v664_v38 = vadd.f32 %v662_v37, %v654_v36  ;;  %v985_v36 = vld [vmem:[#allocation3 + $0xe] sm:$0x3] }
 0xb1f   :  { %5012 = vtanh.f32 %v664_v38 }
 0xb29   :  { %v5013_v39 = vpop.eup %5012 }
 0xb2a   :  { %667 = vrot.lane.b32.xlu0 %v5013_v39, %s5364_s28 }
 0xb9c   :  { %v668_v40 = vpop.permute.xlu0 %667 }
 0xb9d   :  { %v670_v41 = vmul.f32 %v5011_v33, %v668_v40 }
 0xb9f   :  { %672 = vrot.lane.b32.xlu1 %v670_v41, %s5365_s29 }
 0xc11   :  { %v673_v42 = vpop.permute.xlu1 %672 }
 0xc12   :  { %675 = vst.msk [vmem:[#allocation2 + $0x6] sm:$0x3] %vm365_vm6, %v673_v42  ;;  %4386 = vmatmul.mubr.msk.f32.vlgmr.msra.gmra.mrb[6].mxu0 %vm159_vm5, %v673_v42 }
 0xc13   :  { %4781 = vmatpush3.bf16.msra.mxu0 %v5469_v15  ;;  %4407 = vmatprep.mubr.msk.f32.mxu0 %vm5362_vm4, %v5363_v17 }
 0xc14   :  { %4782 = vmatprep.subr.bf16.mxu0 %v5361_v14 }
 0xc17   :  { %4784 = vmatpush3.bf16.msra.mxu0 %v5475_v18 }
 0xc19   :  { %v1094_v13 = vld [vmem:[#allocation2] sm:$0xff] }
 0xce5   :  { %v745_v44 = vpop.f32.mrb[6].mxu0 }
 0xce6   :  { %v749_v45 = vadd.f32 %v745_v44, %v676_v43  ;;  %v4387_v46 = vpop.f32.mrb[7].mxu0 }
 0xce8   :  { %5014 = vtanh.f32 %v749_v45  ;;  %v4054_v48 = vmul.f32 -1.442695, %v749_v45 }
 0xcea   :  { %5016 = vpow2.f32 %v4054_v48 }
 0xcf2   :  { %v5015_v47 = vpop.eup %5014 }
 0xcf3   :  { %759 = vrot.lane.b32.xlu0 %v5015_v47, %s5364_s28 }
 0xcf4   :  { %v5017_v49 = vpop.eup %5016 }
 0xcf5   :  { %v753_v50 = vadd.f32 1.0, %v5017_v49 }
 0xcf7   :  { %5018 = vrcp.f32 %v753_v50 }
 0xd01   :  { %v5019_v51 = vpop.eup %5018 }
 0xd02   :  { %v757_v54 = vmul.f32 %v5019_v51, %v664_v38 }
 0xd65   :  { %v760_v52 = vpop.permute.xlu0 %759 }
 0xd66   :  { %v762_v53 = vmul.f32 %v5019_v51, %v760_v52  ;;  %v1098_v52 = vld [vmem:[#allocation4 + $0x28] sm:$0xff] }
 0xd68   :  { %764 = vrot.lane.b32.xlu1 %v762_v53, %s5365_s29 }
 0xdda   :  { %v765_v55 = vpop.permute.xlu1 %764 }
 0xddb   :  { %v767_v56 = vadd.f32 %v765_v55, %v757_v54  ;;  %v1099_v54 = vld [vmem:[#allocation4 + $0x30] sm:$0xff]  ;;  %v1100_v55 = vld [vmem:[#allocation4 + $0x38] sm:$0xff] }
 0xddd   :  { %5020 = vtanh.f32 %v767_v56 }
 0xde7   :  { %v5021_v57 = vpop.eup %5020 }
 0xde8   :  { %770 = vrot.lane.b32.xlu0 %v5021_v57, %s5364_s28  ;;  %v1193_v57 = vld [vmem:[#allocation7 + $0x20] sm:$0xff] }
 0xe5a   :  { %v771_v58 = vpop.permute.xlu0 %770 }
 0xe5b   :  { %v773_v59 = vmul.f32 %v5019_v51, %v771_v58  ;;  %v1097_v51 = vld [vmem:[#allocation4 + $0x20] sm:$0xff]  ;;  %v1194_v58 = vld [vmem:[#allocation7 + $0x28] sm:$0xff] }
 0xe5c   :  { %v4791_v53 = vpack.c.bf16 %v1098_v52, %v1097_v51 }
 0xe5d   :  { %775 = vrot.lane.b32.xlu1 %v773_v59, %s5365_s29  ;;  %v1195_v59 = vld [vmem:[#allocation7 + $0x30] sm:$0xff] }
 0xe5e   :  { %4792 = vmatprep.subr.bf16.mxu0 %v4791_v53 }
 0xecf   :  { %v776_v60 = vpop.permute.xlu1 %775 }
 0xed0   :  { %778 = vst.msk [vmem:[#allocation2 + $0x8] sm:$0x3] %vm365_vm6, %v776_v60  ;;  %4397 = vmatmul.mubr.msk.f32.vlgmr.msra.gmra.mrb[6].mxu1 %vm159_vm5, %v776_v60  ;;  %v5584_v60 = vpack.c.bf16 %v1194_v58, %v1193_v57 }
 0xed1   :  { %4787 = vmatpush3.bf16.msra.mxu1 %v5469_v15  ;;  %4418 = vmatprep.mubr.msk.f32.mxu1 %vm5362_vm4, %v5363_v17 }
 0xed2   :  { %4788 = vmatprep.subr.bf16.mxu1 %v5361_v14 }
 0xed5   :  { %4790 = vmatpush3.bf16.msra.mxu1 %v5475_v18 }
 0xed6   :  { %4799 = vmatprep.subr.bf16.mxu1 %v5361_v14 }
 0xfa3   :  { %v848_v62 = vpop.f32.mrb[6].mxu1 }
 0xfa4   :  { %v852_v63 = vadd.f32 %v848_v62, %v779_v61  ;;  %v4398_v0 = vpop.f32.mrb[7].mxu1  ;;  %v1196_v61 = vld [vmem:[#allocation7 + $0x38] sm:$0xff] }
 0xfa5   :  { %v5587_v0 = vpack.c.bf16 %v1196_v61, %v1195_v59 }
 0xfa6   :  { %5022 = vtanh.f32 %v852_v63  ;;  %v4056_v2 = vmul.f32 -1.442695, %v852_v63 }
 0xfa8   :  { %5024 = vpow2.f32 %v4056_v2 }
 0xfb0   :  { %v5023_v1 = vpop.eup %5022 }
 0xfb1   :  { %862 = vrot.lane.b32.xlu0 %v5023_v1, %s5364_s28 }
 0xfb2   :  { %v5025_v15 = vpop.eup %5024 }
 0xfb3   :  { %v856_v3 = vadd.f32 1.0, %v5025_v15 }
 0xfb5   :  { %5026 = vrcp.f32 %v856_v3 }
 0xfbf   :  { %v5027_v4 = vpop.eup %5026 }
 0xfc0   :  { %v860_v18 = vmul.f32 %v5027_v4, %v767_v56  ;;  %v4795_v56 = vpack.c.bf16 %v1100_v55, %v1099_v54 }
0x1023   :  { %v863_v5 = vpop.permute.xlu0 %862 }
0x1024   :  { %v865_v6 = vmul.f32 %v5027_v4, %v863_v5 }
0x1026   :  { %867 = vrot.lane.b32.xlu1 %v865_v6, %s5365_s29 }
0x1098   :  { %v868_v7 = vpop.permute.xlu1 %867 }
0x1099   :  { %v870_v8 = vadd.f32 %v868_v7, %v860_v18 }
0x109b   :  { %5028 = vtanh.f32 %v870_v8 }
0x10a5   :  { %v5029_v9 = vpop.eup %5028 }
0x10a6   :  { %873 = vrot.lane.b32.xlu0 %v5029_v9, %s5364_s28 }
0x1118   :  { %v874_v10 = vpop.permute.xlu0 %873 }
0x1119   :  { %v876_v11 = vmul.f32 %v5027_v4, %v874_v10  ;;  %v4062_v4 = vld [vmem:[%s5978_s5 + $0x1] ss:$0 sm:$0xff] }
0x111b   :  { %878 = vrot.lane.b32.xlu1 %v876_v11, %s5365_s29 }
0x118d   :  { %v879_v12 = vpop.permute.xlu1 %878 }
0x118e   :  { %881 = vst.msk [vmem:[#allocation2 + $0xa] sm:$0x3] %vm365_vm6, %v879_v12  ;;  %4408 = vmatmul.mubr.msk.f32.vlgmr.msra.gmra.mrb[8].mxu0 %vm159_vm5, %v879_v12 }
0x118f   :  { %4429 = vmatprep.mubr.msk.f32.mxu0 %vm159_vm5, %v1094_v13  ;;  %4794 = vmatpush3.bf16.msra.mxu0 %v4791_v53 }
0x1190   :  { %4796 = vmatprep.subr.bf16.mxu0 %v4795_v56 }
0x1193   :  { %4798 = vmatpush3.bf16.msra.mxu0 %v4795_v56 }
0x1194   :  { %4805 = vmatprep.subr.bf16.mxu0 %v5361_v14 }
0x1261   :  { %v951_v19 = vpop.f32.mrb[8].mxu0 }
0x1262   :  { %v955_v20 = vadd.f32 %v951_v19, %v882_v16  ;;  %v4409_v21 = vpop.f32.mrb[9].mxu0 }
0x1264   :  { %5030 = vtanh.f32 %v955_v20  ;;  %v4058_v23 = vmul.f32 -1.442695, %v955_v20 }
0x1266   :  { %5032 = vpow2.f32 %v4058_v23 }
0x126e   :  { %v5031_v22 = vpop.eup %5030 }
0x126f   :  { %965 = vrot.lane.b32.xlu0 %v5031_v22, %s5364_s28 }
0x1270   :  { %v5033_v24 = vpop.eup %5032 }
0x1271   :  { %v959_v25 = vadd.f32 1.0, %v5033_v24 }
0x1273   :  { %5034 = vrcp.f32 %v959_v25 }
0x127d   :  { %v5035_v26 = vpop.eup %5034 }
0x127e   :  { %v963_v29 = vmul.f32 %v5035_v26, %v870_v8 }
0x12e1   :  { %v966_v27 = vpop.permute.xlu0 %965 }
0x12e2   :  { %v968_v28 = vmul.f32 %v5035_v26, %v966_v27 }
0x12e4   :  { %970 = vrot.lane.b32.xlu1 %v968_v28, %s5365_s29 }
0x1356   :  { %v971_v30 = vpop.permute.xlu1 %970 }
0x1357   :  { %v973_v31 = vadd.f32 %v971_v30, %v963_v29 }
0x1359   :  { %5036 = vtanh.f32 %v973_v31 }
0x1363   :  { %v5037_v32 = vpop.eup %5036 }
0x1364   :  { %976 = vrot.lane.b32.xlu0 %v5037_v32, %s5364_s28 }
0x13d6   :  { %v977_v33 = vpop.permute.xlu0 %976 }
0x13d7   :  { %v979_v34 = vmul.f32 %v5035_v26, %v977_v33 }
0x13d9   :  { %981 = vrot.lane.b32.xlu1 %v979_v34, %s5365_s29 }
0x144b   :  { %v982_v35 = vpop.permute.xlu1 %981 }
0x144c   :  { %984 = vst.msk [vmem:[#allocation2 + $0xc] sm:$0x3] %vm365_vm6, %v982_v35  ;;  %4419 = vmatmul.mubr.msk.f32.vlgmr.msra.gmra.mrb[8].mxu1 %vm159_vm5, %v982_v35 }
0x144d   :  { %4440 = vmatprep.mubr.msk.f32.mxu1 %vm5362_vm4, %v5363_v17  ;;  %4801 = vmatpush3.bf16.msra.mxu1 %v5584_v60 }
0x144e   :  { %4802 = vmatprep.subr.bf16.mxu1 %v5361_v14 }
0x1451   :  { %4804 = vmatpush3.bf16.msra.mxu1 %v5587_v0 }
0x1452   :  { %4811 = vmatprep.subr.bf16.mxu1 %v5361_v14 }
0x1454   :  { %4441 = vmatmul.mubr.f32.vlgmr.msra.gmra.mrb[10].mxu1 %v5363_v17 }
0x1455   :  { %4813 = vmatpush3.bf16.msra.mxu1 %v5584_v60  ;;  %4462 = vmatprep.mubr.msk.f32.mxu1 %vm5362_vm4, %v5363_v17 }
0x1456   :  { %4814 = vmatprep.subr.bf16.mxu1 %v5361_v14 }
0x1459   :  { %4816 = vmatpush3.bf16.msra.mxu1 %v5587_v0 }
0x145a   :  { %4823 = vmatprep.subr.bf16.mxu1 %v5361_v14 }
0x151f   :  { %v1054_v37 = vpop.f32.mrb[8].mxu1 }
0x1520   :  { %v1058_v38 = vadd.f32 %v1054_v37, %v985_v36  ;;  %v4420_v39 = vpop.f32.mrb[9].mxu1 }
0x1522   :  { %5038 = vtanh.f32 %v1058_v38  ;;  %v4060_v41 = vmul.f32 -1.442695, %v1058_v38 }
0x1524   :  { %5040 = vpow2.f32 %v4060_v41 }
0x1527   :  { %v1264_v15 = vpop.f32.mrb[10].mxu1 }
0x1528   :  { %v4442_v3 = vpop.f32.mrb[11].mxu1 }
0x152c   :  { %v5039_v40 = vpop.eup %5038 }
0x152d   :  { %1068 = vrot.lane.b32.xlu0 %v5039_v40, %s5364_s28 }
0x152e   :  { %v5041_v42 = vpop.eup %5040 }
0x152f   :  { %v1062_v43 = vadd.f32 1.0, %v5041_v42 }
0x1531   :  { %5042 = vrcp.f32 %v1062_v43 }
0x153b   :  { %v5043_v44 = vpop.eup %5042 }
0x153c   :  { %v1066_v47 = vmul.f32 %v5043_v44, %v973_v31 }
0x159f   :  { %v1069_v45 = vpop.permute.xlu0 %1068 }
0x15a0   :  { %v1071_v46 = vmul.f32 %v5043_v44, %v1069_v45 }
0x15a2   :  { %1073 = vrot.lane.b32.xlu1 %v1071_v46, %s5365_s29 }
0x1614   :  { %v1074_v48 = vpop.permute.xlu1 %1073 }
0x1615   :  { %v5579_v49 = vadd.f32 %v1074_v48, %v1066_v47 }
0x1617   :  { %5044 = vtanh.f32 %v5579_v49 }
0x1621   :  { %v5045_v50 = vpop.eup %5044 }
0x1622   :  { %1079 = vrot.lane.b32.xlu0 %v5045_v50, %s5364_s28 }
0x1694   :  { %v1080_v62 = vpop.permute.xlu0 %1079 }
0x1695   :  { %v1082_v63 = vmul.f32 %v5043_v44, %v1080_v62 }
0x1697   :  { %1084 = vrot.lane.b32.xlu1 %v1082_v63, %s5365_s29 }
0x1709   :  { %v1085_v1 = vpop.permute.xlu1 %1084 }
0x170a   :  { %1087 = vst.msk [vmem:[#allocation2 + $0xe] sm:$0x3] %vm365_vm6, %v1085_v1  ;;  %1088 = vst.msk [vmem:[#allocation10] sm:$0x3] %vm365_vm6, %v1085_v1 }
0x1711   :  { %v1095_v2 = vld [vmem:[#allocation2 + $0x8] sm:$0xff] }
0x1712   :  { %4430 = vmatmul.mubr.msk.f32.vlgmr.msra.gmra.mrb[10].mxu0 %vm159_vm5, %v1095_v2 }
0x1713   :  { %4807 = vmatpush3.bf16.msra.mxu0 %v5584_v60  ;;  %4451 = vmatprep.mubr.msk.f32.mxu0 %vm5362_vm4, %v5363_v17 }
0x1714   :  { %4808 = vmatprep.subr.bf16.mxu0 %v5361_v14 }
0x1717   :  { %4810 = vmatpush3.bf16.msra.mxu0 %v5587_v0 }
0x1718   :  { %4817 = vmatprep.subr.bf16.mxu0 %v5361_v14 }
0x17e5   :  { %v4431_v5 = vpop.f32.mrb[10].mxu0 }
0x17e6   :  { %v1187_v6 = vadd.f32 %v4431_v5, %v4062_v4  ;;  %v1181_v18 = vpop.f32.mrb[11].mxu0 }
0x17e7   :  { %v1182_v7 = vadd.f32 %v4062_v4, %v1181_v18 }
0x17e8   :  { %1191 = vst [vmem:[#allocation3 + $0x8] sm:$0xff] %v1187_v6 }
0x17e9   :  { %1190 = vst [vmem:[#allocation3] sm:$0xff] %v1182_v7 }
0x17f0   :  { %v1197_v8 = vld [vmem:[#allocation3] sm:$0x3]  ;;  %v1298_v28 = vld [vmem:[#allocation3 + $0x2] sm:$0x3]  ;;  %v1401_v46 = vld [vmem:[#allocation3 + $0x4] sm:$0x3] }
0x17f1   :  { %v1268_v9 = vadd.f32 %v1264_v15, %v1197_v8  ;;  %v1504_v15 = vld [vmem:[#allocation3 + $0x6] sm:$0x3] }
0x17f3   :  { %5046 = vtanh.f32 %v1268_v9  ;;  %v4065_v11 = vmul.f32 -1.442695, %v1268_v9 }
0x17f5   :  { %5048 = vpow2.f32 %v4065_v11 }
0x17fd   :  { %v5047_v10 = vpop.eup %5046 }
0x17fe   :  { %1278 = vrot.lane.b32.xlu0 %v5047_v10, %s5364_s28 }
0x17ff   :  { %v5049_v12 = vpop.eup %5048 }
0x1800   :  { %v1272_v13 = vadd.f32 1.0, %v5049_v12 }
0x1802   :  { %5050 = vrcp.f32 %v1272_v13 }
0x180c   :  { %v5051_v16 = vpop.eup %5050 }
0x180d   :  { %v1276_v21 = vmul.f32 0.0, %v5051_v16 }
0x1870   :  { %v1279_v19 = vpop.permute.xlu0 %1278 }
0x1871   :  { %v1281_v20 = vmul.f32 %v5051_v16, %v1279_v19 }
0x1873   :  { %1283 = vrot.lane.b32.xlu1 %v1281_v20, %s5365_s29 }
0x18e5   :  { %v1284_v22 = vpop.permute.xlu1 %1283 }
0x18e6   :  { %v1286_v23 = vadd.f32 %v1284_v22, %v1276_v21 }
0x18e8   :  { %5052 = vtanh.f32 %v1286_v23 }
0x18f2   :  { %v5053_v24 = vpop.eup %5052 }
0x18f3   :  { %1289 = vrot.lane.b32.xlu0 %v5053_v24, %s5364_s28 }
0x1965   :  { %v1290_v25 = vpop.permute.xlu0 %1289 }
0x1966   :  { %v1292_v26 = vmul.f32 %v5051_v16, %v1290_v25 }
0x1968   :  { %1294 = vrot.lane.b32.xlu1 %v1292_v26, %s5365_s29 }
0x19da   :  { %v1295_v27 = vpop.permute.xlu1 %1294 }
0x19db   :  { %1297 = vst.msk [vmem:[#allocation2] sm:$0x3] %vm365_vm6, %v1295_v27  ;;  %4452 = vmatmul.mubr.msk.f32.vlgmr.msra.gmra.mrb[12].mxu0 %vm159_vm5, %v1295_v27 }
0x19dc   :  { %4819 = vmatpush3.bf16.msra.mxu0 %v5584_v60  ;;  %4473 = vmatprep.mubr.msk.f32.mxu0 %vm5362_vm4, %v5363_v17 }
0x19dd   :  { %4820 = vmatprep.subr.bf16.mxu0 %v5361_v14 }
0x19e0   :  { %4822 = vmatpush3.bf16.msra.mxu0 %v5587_v0 }
0x19e1   :  { %4829 = vmatprep.subr.bf16.mxu0 %v5361_v14 }
0x1aae   :  { %v1367_v29 = vpop.f32.mrb[12].mxu0 }
0x1aaf   :  { %v1371_v30 = vadd.f32 %v1367_v29, %v1298_v28  ;;  %v4453_v31 = vpop.f32.mrb[13].mxu0 }
0x1ab1   :  { %5054 = vtanh.f32 %v1371_v30  ;;  %v4067_v33 = vmul.f32 -1.442695, %v1371_v30 }
0x1ab3   :  { %5056 = vpow2.f32 %v4067_v33 }
0x1abb   :  { %v5055_v32 = vpop.eup %5054 }
0x1abc   :  { %1381 = vrot.lane.b32.xlu0 %v5055_v32, %s5364_s28 }
0x1abd   :  { %v5057_v34 = vpop.eup %5056 }
0x1abe   :  { %v1375_v35 = vadd.f32 1.0, %v5057_v34 }
0x1ac0   :  { %5058 = vrcp.f32 %v1375_v35 }
0x1aca   :  { %v5059_v36 = vpop.eup %5058 }
0x1acb   :  { %v1379_v39 = vmul.f32 %v5059_v36, %v1286_v23  ;;  %v1607_v23 = vld [vmem:[#allocation3 + $0x8] sm:$0x3] }
0x1b2e   :  { %v1382_v37 = vpop.permute.xlu0 %1381 }
0x1b2f   :  { %v1384_v38 = vmul.f32 %v5059_v36, %v1382_v37 }
0x1b31   :  { %1386 = vrot.lane.b32.xlu1 %v1384_v38, %s5365_s29 }
0x1ba3   :  { %v1387_v40 = vpop.permute.xlu1 %1386 }
0x1ba4   :  { %v1389_v41 = vadd.f32 %v1387_v40, %v1379_v39 }
0x1ba6   :  { %5060 = vtanh.f32 %v1389_v41 }
0x1bb0   :  { %v5061_v42 = vpop.eup %5060 }
0x1bb1   :  { %1392 = vrot.lane.b32.xlu0 %v5061_v42, %s5364_s28 }
0x1c23   :  { %v1393_v43 = vpop.permute.xlu0 %1392 }
0x1c24   :  { %v1395_v44 = vmul.f32 %v5059_v36, %v1393_v43 }
0x1c26   :  { %1397 = vrot.lane.b32.xlu1 %v1395_v44, %s5365_s29 }
0x1c98   :  { %v1398_v45 = vpop.permute.xlu1 %1397 }
0x1c99   :  { %1400 = vst.msk [vmem:[#allocation2 + $0x2] sm:$0x3] %vm365_vm6, %v1398_v45  ;;  %4463 = vmatmul.mubr.msk.f32.vlgmr.msra.gmra.mrb[12].mxu1 %vm159_vm5, %v1398_v45 }
0x1c9a   :  { %4825 = vmatpush3.bf16.msra.mxu1 %v5584_v60  ;;  %4484 = vmatprep.mubr.msk.f32.mxu1 %vm5362_vm4, %v5363_v17 }
0x1c9b   :  { %4826 = vmatprep.subr.bf16.mxu1 %v5361_v14 }
0x1c9e   :  { %4828 = vmatpush3.bf16.msra.mxu1 %v5587_v0 }
0x1c9f   :  { %4835 = vmatprep.subr.bf16.mxu1 %v5361_v14 }
0x1d6c   :  { %v1470_v47 = vpop.f32.mrb[12].mxu1 }
0x1d6d   :  { %v1474_v48 = vadd.f32 %v1470_v47, %v1401_v46  ;;  %v4464_v50 = vpop.f32.mrb[13].mxu1 }
0x1d6f   :  { %5062 = vtanh.f32 %v1474_v48  ;;  %v4069_v52 = vmul.f32 -1.442695, %v1474_v48 }
0x1d71   :  { %5064 = vpow2.f32 %v4069_v52 }
0x1d79   :  { %v5063_v51 = vpop.eup %5062 }
0x1d7a   :  { %1484 = vrot.lane.b32.xlu0 %v5063_v51, %s5364_s28 }
0x1d7b   :  { %v5065_v53 = vpop.eup %5064 }
0x1d7c   :  { %v1478_v54 = vadd.f32 1.0, %v5065_v53 }
0x1d7e   :  { %5066 = vrcp.f32 %v1478_v54 }
0x1d88   :  { %v5067_v55 = vpop.eup %5066 }
0x1d89   :  { %v1482_v58 = vmul.f32 %v5067_v55, %v1389_v41  ;;  %v1710_v41 = vld [vmem:[#allocation3 + $0xa] sm:$0x3] }
0x1dec   :  { %v1485_v56 = vpop.permute.xlu0 %1484 }
0x1ded   :  { %v1487_v57 = vmul.f32 %v5067_v55, %v1485_v56 }
0x1def   :  { %1489 = vrot.lane.b32.xlu1 %v1487_v57, %s5365_s29 }
0x1e61   :  { %v1490_v59 = vpop.permute.xlu1 %1489 }
0x1e62   :  { %v1492_v61 = vadd.f32 %v1490_v59, %v1482_v58  ;;  %v1813_v59 = vld [vmem:[#allocation3 + $0xc] sm:$0x3] }
0x1e64   :  { %5068 = vtanh.f32 %v1492_v61 }
0x1e6e   :  { %v5069_v62 = vpop.eup %5068 }
0x1e6f   :  { %1495 = vrot.lane.b32.xlu0 %v5069_v62, %s5364_s28 }
0x1ee1   :  { %v1496_v63 = vpop.permute.xlu0 %1495 }
0x1ee2   :  { %v1498_v1 = vmul.f32 %v5067_v55, %v1496_v63 }
0x1ee4   :  { %1500 = vrot.lane.b32.xlu1 %v1498_v1, %s5365_s29 }
0x1f56   :  { %v1501_v2 = vpop.permute.xlu1 %1500 }
0x1f57   :  { %1503 = vst.msk [vmem:[#allocation2 + $0x4] sm:$0x3] %vm365_vm6, %v1501_v2  ;;  %4474 = vmatmul.mubr.msk.f32.vlgmr.msra.gmra.mrb[14].mxu0 %vm159_vm5, %v1501_v2 }
0x1f58   :  { %4831 = vmatpush3.bf16.msra.mxu0 %v5584_v60  ;;  %4495 = vmatprep.mubr.msk.f32.mxu0 %vm5362_vm4, %v5363_v17 }
0x1f59   :  { %4832 = vmatprep.subr.bf16.mxu0 %v5361_v14 }
0x1f5c   :  { %4834 = vmatpush3.bf16.msra.mxu0 %v5587_v0 }
0x1f5d   :  { %4841 = vmatprep.subr.bf16.mxu0 %v5361_v14 }
0x202a   :  { %v1573_v3 = vpop.f32.mrb[14].mxu0 }
0x202b   :  { %v1577_v4 = vadd.f32 %v1573_v3, %v1504_v15  ;;  %v4475_v5 = vpop.f32.mrb[15].mxu0 }
0x202d   :  { %5070 = vtanh.f32 %v1577_v4  ;;  %v4071_v18 = vmul.f32 -1.442695, %v1577_v4 }
0x202f   :  { %5072 = vpow2.f32 %v4071_v18 }
0x2037   :  { %v5071_v6 = vpop.eup %5070 }
0x2038   :  { %1587 = vrot.lane.b32.xlu0 %v5071_v6, %s5364_s28 }
0x2039   :  { %v5073_v7 = vpop.eup %5072 }
0x203a   :  { %v1581_v8 = vadd.f32 1.0, %v5073_v7 }
0x203c   :  { %5074 = vrcp.f32 %v1581_v8 }
0x2046   :  { %v5075_v9 = vpop.eup %5074 }
0x2047   :  { %v1585_v12 = vmul.f32 %v5075_v9, %v1492_v61 }
0x20aa   :  { %v1588_v10 = vpop.permute.xlu0 %1587 }
0x20ab   :  { %v1590_v11 = vmul.f32 %v5075_v9, %v1588_v10 }
0x20ad   :  { %1592 = vrot.lane.b32.xlu1 %v1590_v11, %s5365_s29 }
0x211f   :  { %v1593_v13 = vpop.permute.xlu1 %1592 }
0x2120   :  { %v1595_v16 = vadd.f32 %v1593_v13, %v1585_v12  ;;  %v1916_v13 = vld [vmem:[#allocation3 + $0xe] sm:$0x3] }
0x2122   :  { %5076 = vtanh.f32 %v1595_v16 }
0x212c   :  { %v5077_v19 = vpop.eup %5076 }
0x212d   :  { %1598 = vrot.lane.b32.xlu0 %v5077_v19, %s5364_s28 }
0x219f   :  { %v1599_v20 = vpop.permute.xlu0 %1598 }
0x21a0   :  { %v1601_v21 = vmul.f32 %v5075_v9, %v1599_v20 }
0x21a2   :  { %1603 = vrot.lane.b32.xlu1 %v1601_v21, %s5365_s29 }
0x2214   :  { %v1604_v22 = vpop.permute.xlu1 %1603 }
0x2215   :  { %1606 = vst.msk [vmem:[#allocation2 + $0x6] sm:$0x3] %vm365_vm6, %v1604_v22  ;;  %4485 = vmatmul.mubr.msk.f32.vlgmr.msra.gmra.mrb[14].mxu1 %vm159_vm5, %v1604_v22 }
0x2216   :  { %4837 = vmatpush3.bf16.msra.mxu1 %v5584_v60  ;;  %4506 = vmatprep.mubr.msk.f32.mxu1 %vm5362_vm4, %v5363_v17 }
0x2217   :  { %4838 = vmatprep.subr.bf16.mxu1 %v5361_v14 }
0x221a   :  { %4840 = vmatpush3.bf16.msra.mxu1 %v5587_v0 }
0x221c   :  { %v2027_v58 = vld [vmem:[#allocation2] sm:$0xff] }
0x22e8   :  { %v1676_v24 = vpop.f32.mrb[14].mxu1 }
0x22e9   :  { %v1680_v25 = vadd.f32 %v1676_v24, %v1607_v23  ;;  %v4486_v26 = vpop.f32.mrb[15].mxu1 }
0x22eb   :  { %5078 = vtanh.f32 %v1680_v25  ;;  %v4073_v28 = vmul.f32 -1.442695, %v1680_v25 }
0x22ed   :  { %5080 = vpow2.f32 %v4073_v28 }
0x22f5   :  { %v5079_v27 = vpop.eup %5078 }
0x22f6   :  { %1690 = vrot.lane.b32.xlu0 %v5079_v27, %s5364_s28 }
0x22f7   :  { %v5081_v29 = vpop.eup %5080 }
0x22f8   :  { %v1684_v30 = vadd.f32 1.0, %v5081_v29 }
0x22fa   :  { %5082 = vrcp.f32 %v1684_v30 }
0x2304   :  { %v5083_v31 = vpop.eup %5082 }
0x2305   :  { %v1688_v34 = vmul.f32 %v5083_v31, %v1595_v16 }
0x2368   :  { %v1691_v32 = vpop.permute.xlu0 %1690 }
0x2369   :  { %v1693_v33 = vmul.f32 %v5083_v31, %v1691_v32  ;;  %v2030_v32 = vld [vmem:[#allocation4 + $0x40] sm:$0xff] }
0x236b   :  { %1695 = vrot.lane.b32.xlu1 %v1693_v33, %s5365_s29  ;;  %v2031_v33 = vld [vmem:[#allocation4 + $0x48] sm:$0xff] }
0x23dd   :  { %v1696_v35 = vpop.permute.xlu1 %1695 }
0x23de   :  { %v1698_v36 = vadd.f32 %v1696_v35, %v1688_v34  ;;  %v4847_v34 = vpack.c.bf16 %v2031_v33, %v2030_v32  ;;  %v2032_v35 = vld [vmem:[#allocation4 + $0x50] sm:$0xff] }
0x23e0   :  { %5084 = vtanh.f32 %v1698_v36  ;;  %4848 = vmatprep.subr.bf16.mxu1 %v4847_v34 }
0x23ea   :  { %v5085_v37 = vpop.eup %5084 }
0x23eb   :  { %1701 = vrot.lane.b32.xlu0 %v5085_v37, %s5364_s28 }
0x245d   :  { %v1702_v38 = vpop.permute.xlu0 %1701 }
0x245e   :  { %v1704_v39 = vmul.f32 %v5083_v31, %v1702_v38  ;;  %v2126_v38 = vld [vmem:[#allocation7 + $0x40] sm:$0xff] }
0x2460   :  { %1706 = vrot.lane.b32.xlu1 %v1704_v39, %s5365_s29  ;;  %v2127_v39 = vld [vmem:[#allocation7 + $0x48] sm:$0xff] }
0x24d2   :  { %v1707_v40 = vpop.permute.xlu1 %1706 }
0x24d3   :  { %1709 = vst.msk [vmem:[#allocation2 + $0x8] sm:$0x3] %vm365_vm6, %v1707_v40  ;;  %4496 = vmatmul.mubr.msk.f32.vlgmr.msra.gmra.mrb[16].mxu0 %vm159_vm5, %v1707_v40  ;;  %v2128_v40 = vld [vmem:[#allocation7 + $0x50] sm:$0xff] }
0x24d4   :  { %4843 = vmatpush3.bf16.msra.mxu0 %v5584_v60  ;;  %4517 = vmatprep.mubr.msk.f32.mxu0 %vm5362_vm4, %v5363_v17 }
0x24d5   :  { %4844 = vmatprep.subr.bf16.mxu0 %v5361_v14 }
0x24d8   :  { %4846 = vmatpush3.bf16.msra.mxu0 %v5587_v0 }
0x24d9   :  { %4855 = vmatprep.subr.bf16.mxu0 %v5361_v14 }
0x25a6   :  { %v1779_v42 = vpop.f32.mrb[16].mxu0 }
0x25a7   :  { %v1783_v43 = vadd.f32 %v1779_v42, %v1710_v41  ;;  %v4497_v44 = vpop.f32.mrb[17].mxu0  ;;  %v5693_v41 = vpack.c.bf16 %v2127_v39, %v2126_v38  ;;  %v2129_v42 = vld [vmem:[#allocation7 + $0x58] sm:$0xff] }
0x25a9   :  { %5086 = vtanh.f32 %v1783_v43  ;;  %v4075_v46 = vmul.f32 -1.442695, %v1783_v43 }
0x25ab   :  { %5088 = vpow2.f32 %v4075_v46 }
0x25b3   :  { %v5087_v45 = vpop.eup %5086 }
0x25b4   :  { %1793 = vrot.lane.b32.xlu0 %v5087_v45, %s5364_s28  ;;  %v5696_v45 = vpack.c.bf16 %v2129_v42, %v2128_v40 }
0x25b5   :  { %v5089_v60 = vpop.eup %5088 }
0x25b6   :  { %v1787_v47 = vadd.f32 1.0, %v5089_v60 }
0x25b8   :  { %5090 = vrcp.f32 %v1787_v47 }
0x25c2   :  { %v5091_v48 = vpop.eup %5090 }
0x25c3   :  { %v1791_v0 = vmul.f32 %v5091_v48, %v1698_v36  ;;  %v2033_v36 = vld [vmem:[#allocation4 + $0x58] sm:$0xff] }
0x25c4   :  { %v4851_v37 = vpack.c.bf16 %v2033_v36, %v2032_v35 }
0x2626   :  { %v1794_v50 = vpop.permute.xlu0 %1793 }
0x2627   :  { %v1796_v51 = vmul.f32 %v5091_v48, %v1794_v50  ;;  %v4081_v50 = vld [vmem:[%s5978_s5 + $0x2] ss:$0 sm:$0xff] }
0x2629   :  { %1798 = vrot.lane.b32.xlu1 %v1796_v51, %s5365_s29 }
0x269b   :  { %v1799_v52 = vpop.permute.xlu1 %1798 }
0x269c   :  { %v1801_v53 = vadd.f32 %v1799_v52, %v1791_v0 }
0x269e   :  { %5092 = vtanh.f32 %v1801_v53 }
0x26a8   :  { %v5093_v54 = vpop.eup %5092 }
0x26a9   :  { %1804 = vrot.lane.b32.xlu0 %v5093_v54, %s5364_s28 }
0x271b   :  { %v1805_v55 = vpop.permute.xlu0 %1804 }
0x271c   :  { %v1807_v56 = vmul.f32 %v5091_v48, %v1805_v55 }
0x271e   :  { %1809 = vrot.lane.b32.xlu1 %v1807_v56, %s5365_s29 }
0x2790   :  { %v1810_v57 = vpop.permute.xlu1 %1809 }
0x2791   :  { %1812 = vst.msk [vmem:[#allocation2 + $0xa] sm:$0x3] %vm365_vm6, %v1810_v57  ;;  %4507 = vmatmul.mubr.msk.f32.vlgmr.msra.gmra.mrb[16].mxu1 %vm159_vm5, %v1810_v57 }
0x2792   :  { %4528 = vmatprep.mubr.msk.f32.mxu1 %vm159_vm5, %v2027_v58  ;;  %4850 = vmatpush3.bf16.msra.mxu1 %v4847_v34 }
0x2793   :  { %4852 = vmatprep.subr.bf16.mxu1 %v4851_v37 }
0x2796   :  { %4854 = vmatpush3.bf16.msra.mxu1 %v4851_v37 }
0x2797   :  { %4861 = vmatprep.subr.bf16.mxu1 %v5361_v14 }
0x2864   :  { %v1882_v61 = vpop.f32.mrb[16].mxu1 }
0x2865   :  { %v1886_v62 = vadd.f32 %v1882_v61, %v1813_v59  ;;  %v4508_v63 = vpop.f32.mrb[17].mxu1 }
0x2867   :  { %5094 = vtanh.f32 %v1886_v62  ;;  %v4077_v2 = vmul.f32 -1.442695, %v1886_v62 }
0x2869   :  { %5096 = vpow2.f32 %v4077_v2 }
0x2871   :  { %v5095_v1 = vpop.eup %5094 }
0x2872   :  { %1896 = vrot.lane.b32.xlu0 %v5095_v1, %s5364_s28 }
0x2873   :  { %v5097_v15 = vpop.eup %5096 }
0x2874   :  { %v1890_v3 = vadd.f32 1.0, %v5097_v15 }
0x2876   :  { %5098 = vrcp.f32 %v1890_v3 }
0x2880   :  { %v5099_v4 = vpop.eup %5098 }
0x2881   :  { %v1894_v18 = vmul.f32 %v5099_v4, %v1801_v53 }
0x28e4   :  { %v1897_v5 = vpop.permute.xlu0 %1896 }
0x28e5   :  { %v1899_v6 = vmul.f32 %v5099_v4, %v1897_v5 }
0x28e7   :  { %1901 = vrot.lane.b32.xlu1 %v1899_v6, %s5365_s29 }
0x2959   :  { %v1902_v7 = vpop.permute.xlu1 %1901 }
0x295a   :  { %v1904_v8 = vadd.f32 %v1902_v7, %v1894_v18 }
0x295c   :  { %5100 = vtanh.f32 %v1904_v8 }
0x2966   :  { %v5101_v9 = vpop.eup %5100 }
0x2967   :  { %1907 = vrot.lane.b32.xlu0 %v5101_v9, %s5364_s28 }
0x29d9   :  { %v1908_v10 = vpop.permute.xlu0 %1907 }
0x29da   :  { %v1910_v11 = vmul.f32 %v5099_v4, %v1908_v10 }
0x29dc   :  { %1912 = vrot.lane.b32.xlu1 %v1910_v11, %s5365_s29 }
0x2a4e   :  { %v1913_v12 = vpop.permute.xlu1 %1912 }
0x2a4f   :  { %1915 = vst.msk [vmem:[#allocation2 + $0xc] sm:$0x3] %vm365_vm6, %v1913_v12  ;;  %4518 = vmatmul.mubr.msk.f32.vlgmr.msra.gmra.mrb[18].mxu0 %vm159_vm5, %v1913_v12 }
0x2a50   :  { %4539 = vmatprep.mubr.msk.f32.mxu0 %vm5362_vm4, %v5363_v17  ;;  %4857 = vmatpush3.bf16.msra.mxu0 %v5693_v41 }
0x2a51   :  { %4858 = vmatprep.subr.bf16.mxu0 %v5361_v14 }
0x2a54   :  { %4860 = vmatpush3.bf16.msra.mxu0 %v5696_v45 }
0x2a55   :  { %4867 = vmatprep.subr.bf16.mxu0 %v5361_v14 }
0x2a57   :  { %4540 = vmatmul.mubr.f32.vlgmr.msra.gmra.mrb[20].mxu0 %v5363_v17 }
0x2a58   :  { %4869 = vmatpush3.bf16.msra.mxu0 %v5693_v41  ;;  %4561 = vmatprep.mubr.msk.f32.mxu0 %vm5362_vm4, %v5363_v17 }
0x2a59   :  { %4870 = vmatprep.subr.bf16.mxu0 %v5361_v14 }
0x2a5c   :  { %4872 = vmatpush3.bf16.msra.mxu0 %v5696_v45 }
0x2a5d   :  { %4879 = vmatprep.subr.bf16.mxu0 %v5361_v14 }
0x2b22   :  { %v1985_v16 = vpop.f32.mrb[18].mxu0 }
0x2b23   :  { %v1989_v19 = vadd.f32 %v1985_v16, %v1916_v13  ;;  %v4519_v20 = vpop.f32.mrb[19].mxu0 }
0x2b25   :  { %5102 = vtanh.f32 %v1989_v19  ;;  %v4079_v22 = vmul.f32 -1.442695, %v1989_v19 }
0x2b27   :  { %5104 = vpow2.f32 %v4079_v22 }
0x2b2a   :  { %v2197_v47 = vpop.f32.mrb[20].mxu0 }
0x2b2b   :  { %v4541_v48 = vpop.f32.mrb[21].mxu0 }
0x2b2f   :  { %v5103_v21 = vpop.eup %5102 }
0x2b30   :  { %1999 = vrot.lane.b32.xlu0 %v5103_v21, %s5364_s28 }
0x2b31   :  { %v5105_v23 = vpop.eup %5104 }
0x2b32   :  { %v1993_v24 = vadd.f32 1.0, %v5105_v23 }
0x2b34   :  { %5106 = vrcp.f32 %v1993_v24 }
0x2b3e   :  { %v5107_v25 = vpop.eup %5106 }
0x2b3f   :  { %v1997_v28 = vmul.f32 %v5107_v25, %v1904_v8 }
0x2ba2   :  { %v2000_v26 = vpop.permute.xlu0 %1999 }
0x2ba3   :  { %v2002_v27 = vmul.f32 %v5107_v25, %v2000_v26 }
0x2ba5   :  { %2004 = vrot.lane.b32.xlu1 %v2002_v27, %s5365_s29 }
0x2c17   :  { %v2005_v29 = vpop.permute.xlu1 %2004 }
0x2c18   :  { %v5688_v30 = vadd.f32 %v2005_v29, %v1997_v28 }
0x2c1a   :  { %5108 = vtanh.f32 %v5688_v30 }
0x2c24   :  { %v5109_v31 = vpop.eup %5108 }
0x2c25   :  { %2010 = vrot.lane.b32.xlu0 %v5109_v31, %s5364_s28 }
0x2c97   :  { %v2011_v43 = vpop.permute.xlu0 %2010 }
0x2c98   :  { %v2013_v44 = vmul.f32 %v5107_v25, %v2011_v43 }
0x2c9a   :  { %2015 = vrot.lane.b32.xlu1 %v2013_v44, %s5365_s29 }
0x2d0c   :  { %v2016_v46 = vpop.permute.xlu1 %2015 }
0x2d0d   :  { %2018 = vst.msk [vmem:[#allocation2 + $0xe] sm:$0x3] %vm365_vm6, %v2016_v46  ;;  %2020 = vst.msk [vmem:[#allocation10 + $0x2] sm:$0x3] %vm365_vm6, %v2016_v46 }
0x2d14   :  { %v2028_v60 = vld [vmem:[#allocation2 + $0x8] sm:$0xff] }
0x2d15   :  { %4529 = vmatmul.mubr.msk.f32.vlgmr.msra.gmra.mrb[18].mxu1 %vm159_vm5, %v2028_v60 }
0x2d16   :  { %4863 = vmatpush3.bf16.msra.mxu1 %v5693_v41  ;;  %4550 = vmatprep.mubr.msk.f32.mxu1 %vm5362_vm4, %v5363_v17 }
0x2d17   :  { %4864 = vmatprep.subr.bf16.mxu1 %v5361_v14 }
0x2d1a   :  { %4866 = vmatpush3.bf16.msra.mxu1 %v5696_v45 }
0x2d1b   :  { %4873 = vmatprep.subr.bf16.mxu1 %v5361_v14 }
0x2de8   :  { %v4530_v51 = vpop.f32.mrb[18].mxu1 }
0x2de9   :  { %v2120_v0 = vadd.f32 %v4530_v51, %v4081_v50  ;;  %v2114_v52 = vpop.f32.mrb[19].mxu1 }
0x2dea   :  { %v2115_v53 = vadd.f32 %v4081_v50, %v2114_v52 }
0x2deb   :  { %2124 = vst [vmem:[#allocation3 + $0x8] sm:$0xff] %v2120_v0 }
0x2dec   :  { %2123 = vst [vmem:[#allocation3] sm:$0xff] %v2115_v53 }
0x2df3   :  { %v2130_v54 = vld [vmem:[#allocation3] sm:$0x3]  ;;  %v2231_v18 = vld [vmem:[#allocation3 + $0x2] sm:$0x3]  ;;  %v2334_v28 = vld [vmem:[#allocation3 + $0x4] sm:$0x3] }
0x2df4   :  { %v2201_v55 = vadd.f32 %v2197_v47, %v2130_v54  ;;  %v2437_v48 = vld [vmem:[#allocation3 + $0x6] sm:$0x3] }
0x2df6   :  { %5110 = vtanh.f32 %v2201_v55  ;;  %v4084_v57 = vmul.f32 -1.442695, %v2201_v55 }
0x2df8   :  { %5112 = vpow2.f32 %v4084_v57 }
0x2e00   :  { %v5111_v56 = vpop.eup %5110 }
0x2e01   :  { %2211 = vrot.lane.b32.xlu0 %v5111_v56, %s5364_s28 }
0x2e02   :  { %v5113_v58 = vpop.eup %5112 }
0x2e03   :  { %v2205_v59 = vadd.f32 1.0, %v5113_v58 }
0x2e05   :  { %5114 = vrcp.f32 %v2205_v59 }
0x2e0f   :  { %v5115_v61 = vpop.eup %5114 }
0x2e10   :  { %v2209_v1 = vmul.f32 0.0, %v5115_v61 }
0x2e73   :  { %v2212_v62 = vpop.permute.xlu0 %2211 }
0x2e74   :  { %v2214_v63 = vmul.f32 %v5115_v61, %v2212_v62 }
0x2e76   :  { %2216 = vrot.lane.b32.xlu1 %v2214_v63, %s5365_s29 }
0x2ee8   :  { %v2217_v2 = vpop.permute.xlu1 %2216 }
0x2ee9   :  { %v2219_v15 = vadd.f32 %v2217_v2, %v2209_v1 }
0x2eeb   :  { %5116 = vtanh.f32 %v2219_v15 }
0x2ef5   :  { %v5117_v3 = vpop.eup %5116 }
0x2ef6   :  { %2222 = vrot.lane.b32.xlu0 %v5117_v3, %s5364_s28  ;;  %v2540_v3 = vld [vmem:[#allocation3 + $0x8] sm:$0x3] }
0x2f68   :  { %v2223_v4 = vpop.permute.xlu0 %2222 }
0x2f69   :  { %v2225_v5 = vmul.f32 %v5115_v61, %v2223_v4 }
0x2f6b   :  { %2227 = vrot.lane.b32.xlu1 %v2225_v5, %s5365_s29 }
0x2fdd   :  { %v2228_v6 = vpop.permute.xlu1 %2227 }
0x2fde   :  { %2230 = vst.msk [vmem:[#allocation2] sm:$0x3] %vm365_vm6, %v2228_v6  ;;  %4551 = vmatmul.mubr.msk.f32.vlgmr.msra.gmra.mrb[20].mxu1 %vm159_vm5, %v2228_v6 }
0x2fdf   :  { %4875 = vmatpush3.bf16.msra.mxu1 %v5693_v41  ;;  %4572 = vmatprep.mubr.msk.f32.mxu1 %vm5362_vm4, %v5363_v17 }
0x2fe0   :  { %4876 = vmatprep.subr.bf16.mxu1 %v5361_v14 }
0x2fe3   :  { %4878 = vmatpush3.bf16.msra.mxu1 %v5696_v45 }
0x2fe4   :  { %4885 = vmatprep.subr.bf16.mxu1 %v5361_v14 }
0x30b1   :  { %v2300_v7 = vpop.f32.mrb[20].mxu1 }
0x30b2   :  { %v2304_v8 = vadd.f32 %v2300_v7, %v2231_v18  ;;  %v4552_v9 = vpop.f32.mrb[21].mxu1 }
0x30b4   :  { %5118 = vtanh.f32 %v2304_v8  ;;  %v4086_v11 = vmul.f32 -1.442695, %v2304_v8 }
0x30b6   :  { %5120 = vpow2.f32 %v4086_v11 }
0x30be   :  { %v5119_v10 = vpop.eup %5118 }
0x30bf   :  { %2314 = vrot.lane.b32.xlu0 %v5119_v10, %s5364_s28 }
0x30c0   :  { %v5121_v12 = vpop.eup %5120 }
0x30c1   :  { %v2308_v13 = vadd.f32 1.0, %v5121_v12 }
0x30c3   :  { %5122 = vrcp.f32 %v2308_v13 }
0x30cd   :  { %v5123_v16 = vpop.eup %5122 }
0x30ce   :  { %v2312_v21 = vmul.f32 %v5123_v16, %v2219_v15 }
0x3131   :  { %v2315_v19 = vpop.permute.xlu0 %2314 }
0x3132   :  { %v2317_v20 = vmul.f32 %v5123_v16, %v2315_v19 }
0x3134   :  { %2319 = vrot.lane.b32.xlu1 %v2317_v20, %s5365_s29 }
0x31a6   :  { %v2320_v22 = vpop.permute.xlu1 %2319 }
0x31a7   :  { %v2322_v23 = vadd.f32 %v2320_v22, %v2312_v21 }
0x31a9   :  { %5124 = vtanh.f32 %v2322_v23 }
0x31b3   :  { %v5125_v24 = vpop.eup %5124 }
0x31b4   :  { %2325 = vrot.lane.b32.xlu0 %v5125_v24, %s5364_s28  ;;  %v2643_v24 = vld [vmem:[#allocation3 + $0xa] sm:$0x3] }
0x3226   :  { %v2326_v25 = vpop.permute.xlu0 %2325 }
0x3227   :  { %v2328_v26 = vmul.f32 %v5123_v16, %v2326_v25 }
0x3229   :  { %2330 = vrot.lane.b32.xlu1 %v2328_v26, %s5365_s29 }
0x329b   :  { %v2331_v27 = vpop.permute.xlu1 %2330 }
0x329c   :  { %2333 = vst.msk [vmem:[#allocation2 + $0x2] sm:$0x3] %vm365_vm6, %v2331_v27  ;;  %4562 = vmatmul.mubr.msk.f32.vlgmr.msra.gmra.mrb[22].mxu0 %vm159_vm5, %v2331_v27 }
0x329d   :  { %4881 = vmatpush3.bf16.msra.mxu0 %v5693_v41  ;;  %4583 = vmatprep.mubr.msk.f32.mxu0 %vm5362_vm4, %v5363_v17 }
0x329e   :  { %4882 = vmatprep.subr.bf16.mxu0 %v5361_v14 }
0x32a1   :  { %4884 = vmatpush3.bf16.msra.mxu0 %v5696_v45 }
0x32a2   :  { %4891 = vmatprep.subr.bf16.mxu0 %v5361_v14 }
0x336f   :  { %v2403_v29 = vpop.f32.mrb[22].mxu0 }
0x3370   :  { %v2407_v31 = vadd.f32 %v2403_v29, %v2334_v28  ;;  %v4563_v32 = vpop.f32.mrb[23].mxu0 }
0x3372   :  { %5126 = vtanh.f32 %v2407_v31  ;;  %v4088_v34 = vmul.f32 -1.442695, %v2407_v31 }
0x3374   :  { %5128 = vpow2.f32 %v4088_v34 }
0x337c   :  { %v5127_v33 = vpop.eup %5126 }
0x337d   :  { %2417 = vrot.lane.b32.xlu0 %v5127_v33, %s5364_s28 }
0x337e   :  { %v5129_v35 = vpop.eup %5128 }
0x337f   :  { %v2411_v36 = vadd.f32 1.0, %v5129_v35 }
0x3381   :  { %5130 = vrcp.f32 %v2411_v36 }
0x338b   :  { %v5131_v37 = vpop.eup %5130 }
0x338c   :  { %v2415_v40 = vmul.f32 %v5131_v37, %v2322_v23 }
0x33ef   :  { %v2418_v38 = vpop.permute.xlu0 %2417 }
0x33f0   :  { %v2420_v39 = vmul.f32 %v5131_v37, %v2418_v38 }
0x33f2   :  { %2422 = vrot.lane.b32.xlu1 %v2420_v39, %s5365_s29 }
0x3464   :  { %v2423_v42 = vpop.permute.xlu1 %2422 }
0x3465   :  { %v2425_v43 = vadd.f32 %v2423_v42, %v2415_v40 }
0x3467   :  { %5132 = vtanh.f32 %v2425_v43 }
0x3471   :  { %v5133_v44 = vpop.eup %5132 }
0x3472   :  { %2428 = vrot.lane.b32.xlu0 %v5133_v44, %s5364_s28 }
0x34e4   :  { %v2429_v46 = vpop.permute.xlu0 %2428 }
0x34e5   :  { %v2431_v60 = vmul.f32 %v5131_v37, %v2429_v46 }
0x34e7   :  { %2433 = vrot.lane.b32.xlu1 %v2431_v60, %s5365_s29 }
0x3559   :  { %v2434_v47 = vpop.permute.xlu1 %2433 }
0x355a   :  { %2436 = vst.msk [vmem:[#allocation2 + $0x4] sm:$0x3] %vm365_vm6, %v2434_v47  ;;  %4573 = vmatmul.mubr.msk.f32.vlgmr.msra.gmra.mrb[22].mxu1 %vm159_vm5, %v2434_v47 }
0x355b   :  { %4887 = vmatpush3.bf16.msra.mxu1 %v5693_v41  ;;  %4594 = vmatprep.mubr.msk.f32.mxu1 %vm5362_vm4, %v5363_v17 }
0x355c   :  { %4888 = vmatprep.subr.bf16.mxu1 %v5361_v14 }
0x355f   :  { %4890 = vmatpush3.bf16.msra.mxu1 %v5696_v45 }
0x3560   :  { %4897 = vmatprep.subr.bf16.mxu1 %v5361_v14 }
0x362d   :  { %v2506_v50 = vpop.f32.mrb[22].mxu1 }
0x362e   :  { %v2510_v51 = vadd.f32 %v2506_v50, %v2437_v48  ;;  %v4574_v0 = vpop.f32.mrb[23].mxu1 }
0x3630   :  { %5134 = vtanh.f32 %v2510_v51  ;;  %v4090_v53 = vmul.f32 -1.442695, %v2510_v51 }
0x3632   :  { %5136 = vpow2.f32 %v4090_v53 }
0x363a   :  { %v5135_v52 = vpop.eup %5134 }
0x363b   :  { %2520 = vrot.lane.b32.xlu0 %v5135_v52, %s5364_s28 }
0x363c   :  { %v5137_v54 = vpop.eup %5136 }
0x363d   :  { %v2514_v55 = vadd.f32 1.0, %v5137_v54 }
0x363f   :  { %5138 = vrcp.f32 %v2514_v55 }
0x3649   :  { %v5139_v56 = vpop.eup %5138 }
0x364a   :  { %v2518_v59 = vmul.f32 %v5139_v56, %v2425_v43  ;;  %v2746_v43 = vld [vmem:[#allocation3 + $0xc] sm:$0x3] }
0x36ad   :  { %v2521_v57 = vpop.permute.xlu0 %2520 }
0x36ae   :  { %v2523_v58 = vmul.f32 %v5139_v56, %v2521_v57 }
0x36b0   :  { %2525 = vrot.lane.b32.xlu1 %v2523_v58, %s5365_s29 }
0x3722   :  { %v2526_v61 = vpop.permute.xlu1 %2525 }
0x3723   :  { %v2528_v62 = vadd.f32 %v2526_v61, %v2518_v59 }
0x3725   :  { %5140 = vtanh.f32 %v2528_v62 }
0x372f   :  { %v5141_v63 = vpop.eup %5140 }
0x3730   :  { %2531 = vrot.lane.b32.xlu0 %v5141_v63, %s5364_s28 }
0x37a2   :  { %v2532_v1 = vpop.permute.xlu0 %2531 }
0x37a3   :  { %v2534_v2 = vmul.f32 %v5139_v56, %v2532_v1 }
0x37a5   :  { %2536 = vrot.lane.b32.xlu1 %v2534_v2, %s5365_s29 }
0x3817   :  { %v2537_v15 = vpop.permute.xlu1 %2536 }
0x3818   :  { %2539 = vst.msk [vmem:[#allocation2 + $0x6] sm:$0x3] %vm365_vm6, %v2537_v15  ;;  %4584 = vmatmul.mubr.msk.f32.vlgmr.msra.gmra.mrb[24].mxu0 %vm159_vm5, %v2537_v15 }
0x3819   :  { %4893 = vmatpush3.bf16.msra.mxu0 %v5693_v41  ;;  %4605 = vmatprep.mubr.msk.f32.mxu0 %vm5362_vm4, %v5363_v17 }
0x381a   :  { %4894 = vmatprep.subr.bf16.mxu0 %v5361_v14 }
0x381d   :  { %4896 = vmatpush3.bf16.msra.mxu0 %v5696_v45 }
0x381f   :  { %v2960_v42 = vld [vmem:[#allocation2] sm:$0xff] }
0x38eb   :  { %v2609_v4 = vpop.f32.mrb[24].mxu0 }
0x38ec   :  { %v2613_v5 = vadd.f32 %v2609_v4, %v2540_v3  ;;  %v4585_v6 = vpop.f32.mrb[25].mxu0 }
0x38ee   :  { %5142 = vtanh.f32 %v2613_v5  ;;  %v4092_v7 = vmul.f32 -1.442695, %v2613_v5 }
0x38f0   :  { %5144 = vpow2.f32 %v4092_v7 }
0x38f8   :  { %v5143_v18 = vpop.eup %5142 }
0x38f9   :  { %2623 = vrot.lane.b32.xlu0 %v5143_v18, %s5364_s28 }
0x38fa   :  { %v5145_v8 = vpop.eup %5144 }
0x38fb   :  { %v2617_v9 = vadd.f32 1.0, %v5145_v8 }
0x38fd   :  { %5146 = vrcp.f32 %v2617_v9 }
0x3907   :  { %v5147_v10 = vpop.eup %5146 }
0x3908   :  { %v2621_v13 = vmul.f32 %v5147_v10, %v2528_v62  ;;  %v2849_v62 = vld [vmem:[#allocation3 + $0xe] sm:$0x3] }
0x396b   :  { %v2624_v11 = vpop.permute.xlu0 %2623 }
0x396c   :  { %v2626_v12 = vmul.f32 %v5147_v10, %v2624_v11 }
0x396e   :  { %2628 = vrot.lane.b32.xlu1 %v2626_v12, %s5365_s29  ;;  %v2963_v12 = vld [vmem:[#allocation4 + $0x60] sm:$0xff] }
0x39e0   :  { %v2629_v16 = vpop.permute.xlu1 %2628 }
0x39e1   :  { %v2631_v19 = vadd.f32 %v2629_v16, %v2621_v13  ;;  %v2964_v13 = vld [vmem:[#allocation4 + $0x68] sm:$0xff] }
0x39e2   :  { %v4903_v16 = vpack.c.bf16 %v2964_v13, %v2963_v12 }
0x39e3   :  { %5148 = vtanh.f32 %v2631_v19 }
0x39e4   :  { %4904 = vmatprep.subr.bf16.mxu0 %v4903_v16 }
0x39ed   :  { %v5149_v20 = vpop.eup %5148 }
0x39ee   :  { %2634 = vrot.lane.b32.xlu0 %v5149_v20, %s5364_s28  ;;  %v2966_v20 = vld [vmem:[#allocation4 + $0x78] sm:$0xff] }
0x3a60   :  { %v2635_v21 = vpop.permute.xlu0 %2634 }
0x3a61   :  { %v2637_v22 = vmul.f32 %v5147_v10, %v2635_v21 }
0x3a63   :  { %2639 = vrot.lane.b32.xlu1 %v2637_v22, %s5365_s29  ;;  %v3059_v22 = vld [vmem:[#allocation7 + $0x60] sm:$0xff] }
0x3ad5   :  { %v2640_v23 = vpop.permute.xlu1 %2639 }
0x3ad6   :  { %2642 = vst.msk [vmem:[#allocation2 + $0x8] sm:$0x3] %vm365_vm6, %v2640_v23  ;;  %4595 = vmatmul.mubr.msk.f32.vlgmr.msra.gmra.mrb[24].mxu1 %vm159_vm5, %v2640_v23  ;;  %v3060_v23 = vld [vmem:[#allocation7 + $0x68] sm:$0xff] }
0x3ad7   :  { %4899 = vmatpush3.bf16.msra.mxu1 %v5693_v41  ;;  %4616 = vmatprep.mubr.msk.f32.mxu1 %vm5362_vm4, %v5363_v17 }
0x3ad8   :  { %4900 = vmatprep.subr.bf16.mxu1 %v5361_v14 }
0x3adb   :  { %4902 = vmatpush3.bf16.msra.mxu1 %v5696_v45 }
0x3adc   :  { %4911 = vmatprep.subr.bf16.mxu1 %v5361_v14 }
0x3ba9   :  { %v2712_v25 = vpop.f32.mrb[24].mxu1 }
0x3baa   :  { %v2716_v26 = vadd.f32 %v2712_v25, %v2643_v24  ;;  %v4596_v27 = vpop.f32.mrb[25].mxu1  ;;  %v3061_v24 = vld [vmem:[#allocation7 + $0x70] sm:$0xff]  ;;  %v5802_v25 = vpack.c.bf16 %v3060_v23, %v3059_v22 }
0x3bac   :  { %5150 = vtanh.f32 %v2716_v26  ;;  %v4094_v29 = vmul.f32 -1.442695, %v2716_v26  ;;  %v3062_v26 = vld [vmem:[#allocation7 + $0x78] sm:$0xff] }
0x3bae   :  { %5152 = vpow2.f32 %v4094_v29  ;;  %v5805_v29 = vpack.c.bf16 %v3062_v26, %v3061_v24 }
0x3bb6   :  { %v5151_v28 = vpop.eup %5150 }
0x3bb7   :  { %2726 = vrot.lane.b32.xlu0 %v5151_v28, %s5364_s28 }
0x3bb8   :  { %v5153_v41 = vpop.eup %5152 }
0x3bb9   :  { %v2720_v31 = vadd.f32 1.0, %v5153_v41 }
0x3bbb   :  { %5154 = vrcp.f32 %v2720_v31 }
0x3bc5   :  { %v5155_v32 = vpop.eup %5154 }
0x3bc6   :  { %v2724_v45 = vmul.f32 %v5155_v32, %v2631_v19  ;;  %v2965_v19 = vld [vmem:[#allocation4 + $0x70] sm:$0xff] }
0x3bc7   :  { %v4907_v21 = vpack.c.bf16 %v2966_v20, %v2965_v19 }
0x3c29   :  { %v2727_v33 = vpop.permute.xlu0 %2726 }
0x3c2a   :  { %v2729_v34 = vmul.f32 %v5155_v32, %v2727_v33 }
0x3c2c   :  { %2731 = vrot.lane.b32.xlu1 %v2729_v34, %s5365_s29  ;;  %v4100_v34 = vld [vmem:[%s5978_s5 + $0x3] ss:$0 sm:$0xff]  ;;  %s5366_s5 = smov 96  }
0x3c9e   :  { %v2732_v35 = vpop.permute.xlu1 %2731 }
0x3c9f   :  { %v2734_v36 = vadd.f32 %v2732_v35, %v2724_v45 }
0x3ca1   :  { %5156 = vtanh.f32 %v2734_v36 }
0x3cab   :  { %v5157_v37 = vpop.eup %5156 }
0x3cac   :  { %2737 = vrot.lane.b32.xlu0 %v5157_v37, %s5364_s28 }
0x3d1e   :  { %v2738_v38 = vpop.permute.xlu0 %2737 }
0x3d1f   :  { %v2740_v39 = vmul.f32 %v5155_v32, %v2738_v38 }
0x3d21   :  { %2742 = vrot.lane.b32.xlu1 %v2740_v39, %s5365_s29 }
0x3d93   :  { %v2743_v40 = vpop.permute.xlu1 %2742 }
0x3d94   :  { %2745 = vst.msk [vmem:[#allocation2 + $0xa] sm:$0x3] %vm365_vm6, %v2743_v40  ;;  %4606 = vmatmul.mubr.msk.f32.vlgmr.msra.gmra.mrb[26].mxu0 %vm159_vm5, %v2743_v40 }
0x3d95   :  { %4627 = vmatprep.mubr.msk.f32.mxu0 %vm159_vm5, %v2960_v42  ;;  %4906 = vmatpush3.bf16.msra.mxu0 %v4903_v16 }
0x3d96   :  { %4908 = vmatprep.subr.bf16.mxu0 %v4907_v21 }
0x3d99   :  { %4910 = vmatpush3.bf16.msra.mxu0 %v4907_v21 }
0x3d9a   :  { %4917 = vmatprep.subr.bf16.mxu0 %v5361_v14 }
0x3e67   :  { %v2815_v44 = vpop.f32.mrb[26].mxu0 }
0x3e68   :  { %v2819_v46 = vadd.f32 %v2815_v44, %v2746_v43  ;;  %v4607_v60 = vpop.f32.mrb[27].mxu0 }
0x3e6a   :  { %5158 = vtanh.f32 %v2819_v46  ;;  %v4096_v48 = vmul.f32 -1.442695, %v2819_v46 }
0x3e6c   :  { %5160 = vpow2.f32 %v4096_v48 }
0x3e74   :  { %v5159_v47 = vpop.eup %5158 }
0x3e75   :  { %2829 = vrot.lane.b32.xlu0 %v5159_v47, %s5364_s28 }
0x3e76   :  { %v5161_v50 = vpop.eup %5160 }
0x3e77   :  { %v2823_v51 = vadd.f32 1.0, %v5161_v50 }
0x3e79   :  { %5162 = vrcp.f32 %v2823_v51 }
0x3e83   :  { %v5163_v0 = vpop.eup %5162 }
0x3e84   :  { %v2827_v54 = vmul.f32 %v5163_v0, %v2734_v36 }
0x3ee7   :  { %v2830_v52 = vpop.permute.xlu0 %2829 }
0x3ee8   :  { %v2832_v53 = vmul.f32 %v5163_v0, %v2830_v52 }
0x3eea   :  { %2834 = vrot.lane.b32.xlu1 %v2832_v53, %s5365_s29 }
0x3f5c   :  { %v2835_v55 = vpop.permute.xlu1 %2834 }
0x3f5d   :  { %v2837_v56 = vadd.f32 %v2835_v55, %v2827_v54 }
0x3f5f   :  { %5164 = vtanh.f32 %v2837_v56 }
0x3f69   :  { %v5165_v57 = vpop.eup %5164 }
0x3f6a   :  { %2840 = vrot.lane.b32.xlu0 %v5165_v57, %s5364_s28 }
0x3fdc   :  { %v2841_v58 = vpop.permute.xlu0 %2840 }
0x3fdd   :  { %v2843_v59 = vmul.f32 %v5163_v0, %v2841_v58 }
0x3fdf   :  { %2845 = vrot.lane.b32.xlu1 %v2843_v59, %s5365_s29 }
0x4051   :  { %v2846_v61 = vpop.permute.xlu1 %2845 }
0x4052   :  { %2848 = vst.msk [vmem:[#allocation2 + $0xc] sm:$0x3] %vm365_vm6, %v2846_v61  ;;  %4617 = vmatmul.mubr.msk.f32.vlgmr.msra.gmra.mrb[26].mxu1 %vm159_vm5, %v2846_v61 }
0x4053   :  { %4638 = vmatprep.mubr.msk.f32.mxu1 %vm5362_vm4, %v5363_v17  ;;  %4913 = vmatpush3.bf16.msra.mxu1 %v5802_v25 }
0x4054   :  { %4914 = vmatprep.subr.bf16.mxu1 %v5361_v14 }
0x4057   :  { %4916 = vmatpush3.bf16.msra.mxu1 %v5805_v29 }
0x4058   :  { %4923 = vmatprep.subr.bf16.mxu1 %v5361_v14 }
0x405a   :  { %4639 = vmatmul.mubr.f32.vlgmr.msra.gmra.mrb[28].mxu1 %v5363_v17 }
0x405b   :  { %4925 = vmatpush3.bf16.msra.mxu1 %v5802_v25  ;;  %4660 = vmatprep.mubr.msk.f32.mxu1 %vm5362_vm4, %v5363_v17 }
0x405c   :  { %4926 = vmatprep.subr.bf16.mxu1 %v5361_v14 }
0x405f   :  { %4928 = vmatpush3.bf16.msra.mxu1 %v5805_v29 }
0x4060   :  { %4935 = vmatprep.subr.bf16.mxu1 %v5361_v14 }
0x4125   :  { %v2918_v63 = vpop.f32.mrb[26].mxu1 }
0x4126   :  { %v2922_v1 = vadd.f32 %v2918_v63, %v2849_v62  ;;  %v4618_v2 = vpop.f32.mrb[27].mxu1 }
0x4128   :  { %5166 = vtanh.f32 %v2922_v1  ;;  %v4098_v3 = vmul.f32 -1.442695, %v2922_v1 }
0x412a   :  { %5168 = vpow2.f32 %v4098_v3 }
0x412d   :  { %v3130_v32 = vpop.f32.mrb[28].mxu1 }
0x412e   :  { %v4640_v33 = vpop.f32.mrb[29].mxu1 }
0x4132   :  { %v5167_v15 = vpop.eup %5166 }
0x4133   :  { %2932 = vrot.lane.b32.xlu0 %v5167_v15, %s5364_s28 }
0x4134   :  { %v5169_v4 = vpop.eup %5168 }
0x4135   :  { %v2926_v5 = vadd.f32 1.0, %v5169_v4 }
0x4137   :  { %5170 = vrcp.f32 %v2926_v5 }
0x4141   :  { %v5171_v6 = vpop.eup %5170 }
0x4142   :  { %v2930_v8 = vmul.f32 %v5171_v6, %v2837_v56 }
0x41a5   :  { %v2933_v18 = vpop.permute.xlu0 %2932 }
0x41a6   :  { %v2935_v7 = vmul.f32 %v5171_v6, %v2933_v18 }
0x41a8   :  { %2937 = vrot.lane.b32.xlu1 %v2935_v7, %s5365_s29 }
0x421a   :  { %v2938_v9 = vpop.permute.xlu1 %2937 }
0x421b   :  { %v5797_v10 = vadd.f32 %v2938_v9, %v2930_v8 }
0x421d   :  { %5172 = vtanh.f32 %v5797_v10 }
0x4227   :  { %v5173_v11 = vpop.eup %5172 }
0x4228   :  { %2943 = vrot.lane.b32.xlu0 %v5173_v11, %s5364_s28 }
0x429a   :  { %v2944_v27 = vpop.permute.xlu0 %2943 }
0x429b   :  { %v2946_v28 = vmul.f32 %v5171_v6, %v2944_v27 }
0x429d   :  { %2948 = vrot.lane.b32.xlu1 %v2946_v28, %s5365_s29 }
0x430f   :  { %v2949_v41 = vpop.permute.xlu1 %2948 }
0x4310   :  { %2951 = vst.msk [vmem:[#allocation2 + $0xe] sm:$0x3] %vm365_vm6, %v2949_v41  ;;  %2953 = vst.msk [vmem:[#allocation10 + $0x4] sm:$0x3] %vm365_vm6, %v2949_v41 }
0x4317   :  { %v2961_v31 = vld [vmem:[#allocation2 + $0x8] sm:$0xff] }
0x4318   :  { %4628 = vmatmul.mubr.msk.f32.vlgmr.msra.gmra.mrb[28].mxu0 %vm159_vm5, %v2961_v31 }
0x4319   :  { %4919 = vmatpush3.bf16.msra.mxu0 %v5802_v25  ;;  %4649 = vmatprep.mubr.msk.f32.mxu0 %vm5362_vm4, %v5363_v17 }
0x431a   :  { %4920 = vmatprep.subr.bf16.mxu0 %v5361_v14 }
0x431d   :  { %4922 = vmatpush3.bf16.msra.mxu0 %v5805_v29 }
0x431e   :  { %4929 = vmatprep.subr.bf16.mxu0 %v5361_v14 }
0x43eb   :  { %v4629_v45 = vpop.f32.mrb[28].mxu0 }
0x43ec   :  { %v3053_v35 = vadd.f32 %v4629_v45, %v4100_v34  ;;  %v3047_v36 = vpop.f32.mrb[29].mxu0 }
0x43ed   :  { %v3048_v37 = vadd.f32 %v4100_v34, %v3047_v36 }
0x43ee   :  { %3057 = vst [vmem:[#allocation3 + $0x8] sm:$0xff] %v3053_v35 }
0x43ef   :  { %3056 = vst [vmem:[#allocation3] sm:$0xff] %v3048_v37 }
0x43f6   :  { %v3063_v38 = vld [vmem:[#allocation3] sm:$0x3]  ;;  %v3164_v55 = vld [vmem:[#allocation3 + $0x2] sm:$0x3]  ;;  %v3267_v9 = vld [vmem:[#allocation3 + $0x4] sm:$0x3] }
0x43f7   :  { %v3134_v39 = vadd.f32 %v3130_v32, %v3063_v38  ;;  %v3370_v34 = vld [vmem:[#allocation3 + $0x6] sm:$0x3] }
0x43f9   :  { %5174 = vtanh.f32 %v3134_v39  ;;  %v4103_v42 = vmul.f32 -1.442695, %v3134_v39 }
0x43fb   :  { %5176 = vpow2.f32 %v4103_v42 }
0x4403   :  { %v5175_v40 = vpop.eup %5174 }
0x4404   :  { %3144 = vrot.lane.b32.xlu0 %v5175_v40, %s5364_s28 }
0x4405   :  { %v5177_v43 = vpop.eup %5176 }
0x4406   :  { %v3138_v44 = vadd.f32 1.0, %v5177_v43 }
0x4408   :  { %5178 = vrcp.f32 %v3138_v44 }
0x4412   :  { %v5179_v46 = vpop.eup %5178 }
0x4413   :  { %v3142_v48 = vmul.f32 0.0, %v5179_v46 }
0x4476   :  { %v3145_v60 = vpop.permute.xlu0 %3144 }
0x4477   :  { %v3147_v47 = vmul.f32 %v5179_v46, %v3145_v60 }
0x4479   :  { %3149 = vrot.lane.b32.xlu1 %v3147_v47, %s5365_s29 }
0x44eb   :  { %v3150_v50 = vpop.permute.xlu1 %3149 }
0x44ec   :  { %v3152_v51 = vadd.f32 %v3150_v50, %v3142_v48 }
0x44ee   :  { %5180 = vtanh.f32 %v3152_v51 }
0x44f8   :  { %v5181_v0 = vpop.eup %5180 }
0x44f9   :  { %3155 = vrot.lane.b32.xlu0 %v5181_v0, %s5364_s28 }
0x456b   :  { %v3156_v52 = vpop.permute.xlu0 %3155 }
0x456c   :  { %v3158_v53 = vmul.f32 %v5179_v46, %v3156_v52  ;;  %v3473_v52 = vld [vmem:[#allocation3 + $0x8] sm:$0x3] }
0x456e   :  { %3160 = vrot.lane.b32.xlu1 %v3158_v53, %s5365_s29 }
0x45e0   :  { %v3161_v54 = vpop.permute.xlu1 %3160 }
0x45e1   :  { %3163 = vst.msk [vmem:[#allocation2] sm:$0x3] %vm365_vm6, %v3161_v54  ;;  %4650 = vmatmul.mubr.msk.f32.vlgmr.msra.gmra.mrb[30].mxu0 %vm159_vm5, %v3161_v54 }
0x45e2   :  { %4931 = vmatpush3.bf16.msra.mxu0 %v5802_v25  ;;  %4671 = vmatprep.mubr.msk.f32.mxu0 %vm5362_vm4, %v5363_v17 }
0x45e3   :  { %4932 = vmatprep.subr.bf16.mxu0 %v5361_v14 }
0x45e6   :  { %4934 = vmatpush3.bf16.msra.mxu0 %v5805_v29 }
0x45e7   :  { %4941 = vmatprep.subr.bf16.mxu0 %v5361_v14 }
0x46b4   :  { %v3233_v56 = vpop.f32.mrb[30].mxu0 }
0x46b5   :  { %v3237_v57 = vadd.f32 %v3233_v56, %v3164_v55  ;;  %v4651_v58 = vpop.f32.mrb[31].mxu0 }
0x46b7   :  { %5182 = vtanh.f32 %v3237_v57  ;;  %v4105_v61 = vmul.f32 -1.442695, %v3237_v57 }
0x46b9   :  { %5184 = vpow2.f32 %v4105_v61 }
0x46c1   :  { %v5183_v59 = vpop.eup %5182 }
0x46c2   :  { %3247 = vrot.lane.b32.xlu0 %v5183_v59, %s5364_s28 }
0x46c3   :  { %v5185_v62 = vpop.eup %5184 }
0x46c4   :  { %v3241_v63 = vadd.f32 1.0, %v5185_v62 }
0x46c6   :  { %5186 = vrcp.f32 %v3241_v63 }
0x46d0   :  { %v5187_v1 = vpop.eup %5186 }
0x46d1   :  { %v3245_v3 = vmul.f32 %v5187_v1, %v3152_v51 }
0x4734   :  { %v3248_v2 = vpop.permute.xlu0 %3247 }
0x4735   :  { %v3250_v15 = vmul.f32 %v5187_v1, %v3248_v2 }
0x4737   :  { %3252 = vrot.lane.b32.xlu1 %v3250_v15, %s5365_s29 }
0x47a9   :  { %v3253_v4 = vpop.permute.xlu1 %3252 }
0x47aa   :  { %v3255_v5 = vadd.f32 %v3253_v4, %v3245_v3 }
0x47ac   :  { %5188 = vtanh.f32 %v3255_v5 }
0x47b6   :  { %v5189_v6 = vpop.eup %5188 }
0x47b7   :  { %3258 = vrot.lane.b32.xlu0 %v5189_v6, %s5364_s28 }
0x4829   :  { %v3259_v18 = vpop.permute.xlu0 %3258 }
0x482a   :  { %v3261_v7 = vmul.f32 %v5187_v1, %v3259_v18  ;;  %v3576_v18 = vld [vmem:[#allocation3 + $0xa] sm:$0x3] }
0x482c   :  { %3263 = vrot.lane.b32.xlu1 %v3261_v7, %s5365_s29 }
0x489e   :  { %v3264_v8 = vpop.permute.xlu1 %3263 }
0x489f   :  { %3266 = vst.msk [vmem:[#allocation2 + $0x2] sm:$0x3] %vm365_vm6, %v3264_v8  ;;  %4661 = vmatmul.mubr.msk.f32.vlgmr.msra.gmra.mrb[30].mxu1 %vm159_vm5, %v3264_v8 }
0x48a0   :  { %4937 = vmatpush3.bf16.msra.mxu1 %v5802_v25  ;;  %4682 = vmatprep.mubr.msk.f32.mxu1 %vm5362_vm4, %v5363_v17 }
0x48a1   :  { %4938 = vmatprep.subr.bf16.mxu1 %v5361_v14 }
0x48a4   :  { %4940 = vmatpush3.bf16.msra.mxu1 %v5805_v29 }
0x48a5   :  { %4947 = vmatprep.subr.bf16.mxu1 %v5361_v14 }
0x4972   :  { %v3336_v11 = vpop.f32.mrb[30].mxu1 }
0x4973   :  { %v3340_v12 = vadd.f32 %v3336_v11, %v3267_v9  ;;  %v4662_v13 = vpop.f32.mrb[31].mxu1 }
0x4975   :  { %5190 = vtanh.f32 %v3340_v12  ;;  %v4107_v19 = vmul.f32 -1.442695, %v3340_v12 }
0x4977   :  { %5192 = vpow2.f32 %v4107_v19 }
0x497f   :  { %v5191_v16 = vpop.eup %5190 }
0x4980   :  { %3350 = vrot.lane.b32.xlu0 %v5191_v16, %s5364_s28 }
0x4981   :  { %v5193_v20 = vpop.eup %5192 }
0x4982   :  { %v3344_v21 = vadd.f32 1.0, %v5193_v20 }
0x4984   :  { %5194 = vrcp.f32 %v3344_v21 }
0x498e   :  { %v5195_v22 = vpop.eup %5194 }
0x498f   :  { %v3348_v26 = vmul.f32 %v5195_v22, %v3255_v5 }
0x49f2   :  { %v3351_v23 = vpop.permute.xlu0 %3350 }
0x49f3   :  { %v3353_v24 = vmul.f32 %v5195_v22, %v3351_v23 }
0x49f5   :  { %3355 = vrot.lane.b32.xlu1 %v3353_v24, %s5365_s29 }
0x4a67   :  { %v3356_v27 = vpop.permute.xlu1 %3355 }
0x4a68   :  { %v3358_v28 = vadd.f32 %v3356_v27, %v3348_v26  ;;  %v3679_v27 = vld [vmem:[#allocation3 + $0xc] sm:$0x3] }
0x4a6a   :  { %5196 = vtanh.f32 %v3358_v28 }
0x4a74   :  { %v5197_v41 = vpop.eup %5196 }
0x4a75   :  { %3361 = vrot.lane.b32.xlu0 %v5197_v41, %s5364_s28 }
0x4ae7   :  { %v3362_v31 = vpop.permute.xlu0 %3361 }
0x4ae8   :  { %v3364_v32 = vmul.f32 %v5195_v22, %v3362_v31 }
0x4aea   :  { %3366 = vrot.lane.b32.xlu1 %v3364_v32, %s5365_s29 }
0x4b5c   :  { %v3367_v33 = vpop.permute.xlu1 %3366 }
0x4b5d   :  { %3369 = vst.msk [vmem:[#allocation2 + $0x4] sm:$0x3] %vm365_vm6, %v3367_v33  ;;  %4672 = vmatmul.mubr.msk.f32.vlgmr.msra.gmra.mrb[32].mxu0 %vm159_vm5, %v3367_v33 }
0x4b5e   :  { %4943 = vmatpush3.bf16.msra.mxu0 %v5802_v25  ;;  %4693 = vmatprep.mubr.msk.f32.mxu0 %vm5362_vm4, %v5363_v17 }
0x4b5f   :  { %4944 = vmatprep.subr.bf16.mxu0 %v5361_v14 }
0x4b62   :  { %4946 = vmatpush3.bf16.msra.mxu0 %v5805_v29 }
0x4b63   :  { %4953 = vmatprep.subr.bf16.mxu0 %v5361_v14 }
0x4c30   :  { %v3439_v45 = vpop.f32.mrb[32].mxu0 }
0x4c31   :  { %v3443_v35 = vadd.f32 %v3439_v45, %v3370_v34  ;;  %v4673_v36 = vpop.f32.mrb[33].mxu0 }
0x4c33   :  { %5198 = vtanh.f32 %v3443_v35  ;;  %v4109_v38 = vmul.f32 -1.442695, %v3443_v35 }
0x4c35   :  { %5200 = vpow2.f32 %v4109_v38 }
0x4c3d   :  { %v5199_v37 = vpop.eup %5198 }
0x4c3e   :  { %3453 = vrot.lane.b32.xlu0 %v5199_v37, %s5364_s28 }
0x4c3f   :  { %v5201_v39 = vpop.eup %5200 }
0x4c40   :  { %v3447_v40 = vadd.f32 1.0, %v5201_v39 }
0x4c42   :  { %5202 = vrcp.f32 %v3447_v40 }
0x4c4c   :  { %v5203_v42 = vpop.eup %5202 }
0x4c4d   :  { %v3451_v46 = vmul.f32 %v5203_v42, %v3358_v28 }
0x4cb0   :  { %v3454_v43 = vpop.permute.xlu0 %3453 }
0x4cb1   :  { %v3456_v44 = vmul.f32 %v5203_v42, %v3454_v43 }
0x4cb3   :  { %3458 = vrot.lane.b32.xlu1 %v3456_v44, %s5365_s29 }
0x4d25   :  { %v3459_v60 = vpop.permute.xlu1 %3458 }
0x4d26   :  { %v3461_v47 = vadd.f32 %v3459_v60, %v3451_v46  ;;  %v3782_v60 = vld [vmem:[#allocation3 + $0xe] sm:$0x3] }
0x4d28   :  { %5204 = vtanh.f32 %v3461_v47 }
0x4d32   :  { %v5205_v48 = vpop.eup %5204 }
0x4d33   :  { %3464 = vrot.lane.b32.xlu0 %v5205_v48, %s5364_s28 }
0x4da5   :  { %v3465_v50 = vpop.permute.xlu0 %3464 }
0x4da6   :  { %v3467_v51 = vmul.f32 %v5203_v42, %v3465_v50 }
0x4da8   :  { %3469 = vrot.lane.b32.xlu1 %v3467_v51, %s5365_s29 }
0x4e1a   :  { %v3470_v0 = vpop.permute.xlu1 %3469 }
0x4e1b   :  { %3472 = vst.msk [vmem:[#allocation2 + $0x6] sm:$0x3] %vm365_vm6, %v3470_v0  ;;  %4683 = vmatmul.mubr.msk.f32.vlgmr.msra.gmra.mrb[32].mxu1 %vm159_vm5, %v3470_v0 }
0x4e1c   :  { %4949 = vmatpush3.bf16.msra.mxu1 %v5802_v25  ;;  %4704 = vmatprep.mubr.msk.f32.mxu1 %vm5362_vm4, %v5363_v17 }
0x4e1d   :  { %4950 = vmatprep.subr.bf16.mxu1 %v5361_v14 }
0x4e20   :  { %4952 = vmatpush3.bf16.msra.mxu1 %v5805_v29 }
0x4e22   :  { %v3893_v26 = vld [vmem:[#allocation2] sm:$0xff] }
0x4eee   :  { %v3542_v53 = vpop.f32.mrb[32].mxu1 }
0x4eef   :  { %v3546_v54 = vadd.f32 %v3542_v53, %v3473_v52  ;;  %v4684_v55 = vpop.f32.mrb[33].mxu1 }
0x4ef1   :  { %5206 = vtanh.f32 %v3546_v54  ;;  %v4111_v57 = vmul.f32 -1.442695, %v3546_v54 }
0x4ef3   :  { %5208 = vpow2.f32 %v4111_v57 }
0x4efb   :  { %v5207_v56 = vpop.eup %5206 }
0x4efc   :  { %3556 = vrot.lane.b32.xlu0 %v5207_v56, %s5364_s28 }
0x4efd   :  { %v5209_v58 = vpop.eup %5208 }
0x4efe   :  { %v3550_v59 = vadd.f32 1.0, %v5209_v58 }
0x4f00   :  { %5210 = vrcp.f32 %v3550_v59 }
0x4f0a   :  { %v5211_v61 = vpop.eup %5210 }
0x4f0b   :  { %v3554_v1 = vmul.f32 %v5211_v61, %v3461_v47 }
0x4f6e   :  { %v3557_v62 = vpop.permute.xlu0 %3556 }
0x4f6f   :  { %v3559_v63 = vmul.f32 %v5211_v61, %v3557_v62  ;;  %v3895_v62 = vld [vmem:[%s5979_s6] sm:$0xff] }
0x4f71   :  { %3561 = vrot.lane.b32.xlu1 %v3559_v63, %s5365_s29  ;;  %v3896_v63 = vld [vmem:[%s5979_s6 + $0x8] sm:$0xff] }
0x4fe3   :  { %v3562_v2 = vpop.permute.xlu1 %3561 }
0x4fe4   :  { %v3564_v15 = vadd.f32 %v3562_v2, %v3554_v1  ;;  %v4959_v1 = vpack.c.bf16 %v3896_v63, %v3895_v62  ;;  %v3897_v2 = vld [vmem:[%s5979_s6 + $0x10] sm:$0xff] }
0x4fe6   :  { %5212 = vtanh.f32 %v3564_v15  ;;  %4960 = vmatprep.subr.bf16.mxu1 %v4959_v1 }
0x4ff0   :  { %v5213_v3 = vpop.eup %5212 }
0x4ff1   :  { %3567 = vrot.lane.b32.xlu0 %v5213_v3, %s5364_s28 }
0x5063   :  { %v3568_v4 = vpop.permute.xlu0 %3567 }
0x5064   :  { %v3570_v5 = vmul.f32 %v5211_v61, %v3568_v4 }
0x5066   :  { %3572 = vrot.lane.b32.xlu1 %v3570_v5, %s5365_s29 }
0x50d8   :  { %v3573_v6 = vpop.permute.xlu1 %3572 }
0x50d9   :  { %3575 = vst.msk [vmem:[#allocation2 + $0x8] sm:$0x3] %vm365_vm6, %v3573_v6  ;;  %4694 = vmatmul.mubr.msk.f32.vlgmr.msra.gmra.mrb[34].mxu0 %vm159_vm5, %v3573_v6 }
0x50da   :  { %4955 = vmatpush3.bf16.msra.mxu0 %v5802_v25  ;;  %4715 = vmatprep.mubr.msk.f32.mxu0 %vm5362_vm4, %v5363_v17 }
0x50db   :  { %4956 = vmatprep.subr.bf16.mxu0 %v5361_v14 }
0x50de   :  { %4958 = vmatpush3.bf16.msra.mxu0 %v5805_v29 }
0x51ac   :  { %v3645_v7 = vpop.f32.mrb[34].mxu0 }
0x51ad   :  { %v3649_v8 = vadd.f32 %v3645_v7, %v3576_v18  ;;  %v4695_v9 = vpop.f32.mrb[35].mxu0 }
0x51af   :  { %5214 = vtanh.f32 %v3649_v8  ;;  %v4113_v12 = vmul.f32 -1.442695, %v3649_v8 }
0x51b1   :  { %5216 = vpow2.f32 %v4113_v12 }
0x51b9   :  { %v5215_v11 = vpop.eup %5214 }
0x51ba   :  { %3659 = vrot.lane.b32.xlu0 %v5215_v11, %s5364_s28 }
0x51bb   :  { %v5217_v13 = vpop.eup %5216 }
0x51bc   :  { %v3653_v16 = vadd.f32 1.0, %v5217_v13 }
0x51be   :  { %5218 = vrcp.f32 %v3653_v16 }
0x51c8   :  { %v5219_v25 = vpop.eup %5218 }
0x51c9   :  { %v3657_v14 = vmul.f32 %v5219_v25, %v3564_v15 }
0x522c   :  { %v3660_v19 = vpop.permute.xlu0 %3659 }
0x522d   :  { %v3662_v17 = vmul.f32 %v5219_v25, %v3660_v19 }
0x522f   :  { %3664 = vrot.lane.b32.xlu1 %v3662_v17, %s5365_s29 }
0x52a1   :  { %v3665_v29 = vpop.permute.xlu1 %3664 }
0x52a2   :  { %v3667_v20 = vadd.f32 %v3665_v29, %v3657_v14 }
0x52a4   :  { %5220 = vtanh.f32 %v3667_v20 }
0x52ae   :  { %v5221_v21 = vpop.eup %5220 }
0x52af   :  { %3670 = vrot.lane.b32.xlu0 %v5221_v21, %s5364_s28 }
0x5321   :  { %v3671_v22 = vpop.permute.xlu0 %3670 }
0x5322   :  { %v3673_v23 = vmul.f32 %v5219_v25, %v3671_v22 }
0x5324   :  { %3675 = vrot.lane.b32.xlu1 %v3673_v23, %s5365_s29 }
0x5396   :  { %v3676_v24 = vpop.permute.xlu1 %3675 }
0x5397   :  { %3678 = vst.msk [vmem:[#allocation2 + $0xa] sm:$0x3] %vm365_vm6, %v3676_v24  ;;  %4705 = vmatmul.mubr.msk.f32.vlgmr.msra.gmra.mrb[34].mxu1 %vm159_vm5, %v3676_v24 }
0x5398   :  { %4726 = vmatprep.mubr.msk.f32.mxu1 %vm159_vm5, %v3893_v26  ;;  %4962 = vmatpush3.bf16.msra.mxu1 %v4959_v1 }
0x546a   :  { %v3748_v28 = vpop.f32.mrb[34].mxu1 }
0x546b   :  { %v3752_v41 = vadd.f32 %v3748_v28, %v3679_v27  ;;  %v4706_v31 = vpop.f32.mrb[35].mxu1 }
0x546d   :  { %5222 = vtanh.f32 %v3752_v41  ;;  %v4115_v33 = vmul.f32 -1.442695, %v3752_v41 }
0x546f   :  { %5224 = vpow2.f32 %v4115_v33 }
0x5477   :  { %v5223_v32 = vpop.eup %5222 }
0x5478   :  { %3762 = vrot.lane.b32.xlu0 %v5223_v32, %s5364_s28 }
0x5479   :  { %v5225_v34 = vpop.eup %5224 }
0x547a   :  { %v3756_v45 = vadd.f32 1.0, %v5225_v34 }
0x547c   :  { %5226 = vrcp.f32 %v3756_v45 }
0x5486   :  { %v5227_v35 = vpop.eup %5226 }
0x5487   :  { %v3760_v38 = vmul.f32 %v5227_v35, %v3667_v20 }
0x54ea   :  { %v3763_v36 = vpop.permute.xlu0 %3762 }
0x54eb   :  { %v3765_v37 = vmul.f32 %v5227_v35, %v3763_v36 }
0x54ed   :  { %3767 = vrot.lane.b32.xlu1 %v3765_v37, %s5365_s29 }
0x555f   :  { %v3768_v39 = vpop.permute.xlu1 %3767 }
0x5560   :  { %v3770_v40 = vadd.f32 %v3768_v39, %v3760_v38 }
0x5562   :  { %5228 = vtanh.f32 %v3770_v40 }
0x556c   :  { %v5229_v42 = vpop.eup %5228 }
0x556d   :  { %3773 = vrot.lane.b32.xlu0 %v5229_v42, %s5364_s28 }
0x55df   :  { %v3774_v43 = vpop.permute.xlu0 %3773 }
0x55e0   :  { %v3776_v44 = vmul.f32 %v5227_v35, %v3774_v43 }
0x55e2   :  { %3778 = vrot.lane.b32.xlu1 %v3776_v44, %s5365_s29 }
0x5654   :  { %v3779_v46 = vpop.permute.xlu1 %3778 }
0x5655   :  { %3781 = vst.msk [vmem:[#allocation2 + $0xc] sm:$0x3] %vm365_vm6, %v3779_v46  ;;  %4716 = vmatmul.mubr.msk.f32.vlgmr.msra.gmra.mrb[36].mxu0 %vm159_vm5, %v3779_v46 }
0x5728   :  { %v3851_v47 = vpop.f32.mrb[36].mxu0 }
0x5729   :  { %v3855_v48 = vadd.f32 %v3851_v47, %v3782_v60  ;;  %v4717_v50 = vpop.f32.mrb[37].mxu0 }
0x572b   :  { %5230 = vtanh.f32 %v3855_v48  ;;  %v4117_v0 = vmul.f32 -1.442695, %v3855_v48 }
0x572d   :  { %5232 = vpow2.f32 %v4117_v0 }
0x5735   :  { %v5231_v51 = vpop.eup %5230 }
0x5736   :  { %3865 = vrot.lane.b32.xlu0 %v5231_v51, %s5364_s28 }
0x5737   :  { %v5233_v52 = vpop.eup %5232 }
0x5738   :  { %v3859_v53 = vadd.f32 1.0, %v5233_v52 }
0x573a   :  { %5234 = vrcp.f32 %v3859_v53 }
0x5744   :  { %v5235_v54 = vpop.eup %5234 }
0x5745   :  { %v3863_v57 = vmul.f32 %v5235_v54, %v3770_v40 }
0x57a8   :  { %v3866_v55 = vpop.permute.xlu0 %3865 }
0x57a9   :  { %v3868_v56 = vmul.f32 %v5235_v54, %v3866_v55 }
0x57ab   :  { %3870 = vrot.lane.b32.xlu1 %v3868_v56, %s5365_s29 }
0x581d   :  { %v3871_v58 = vpop.permute.xlu1 %3870 }
0x581e   :  { %v3873_v59 = vadd.f32 %v3871_v58, %v3863_v57 }
0x5820   :  { %5236 = vtanh.f32 %v3873_v59 }
0x582a   :  { %v5237_v61 = vpop.eup %5236 }
0x582b   :  { %3876 = vrot.lane.b32.xlu0 %v5237_v61, %s5364_s28 }
0x582f   :  { %1090 = vrot.lane.b32.xlu0 %v5579_v49, %s5366_s5  ;;  %v3898_v49 = vld [vmem:[%s5979_s6 + $0x18] sm:$0xff]  ;;  %s5367_s6 = smov [#allocation10]  }
0x5830   :  { %s4007_s25 = sshll.u32 %s5367_s6, 4  ;;  %s4008_s25 = int_to_ptr.vmem [resolvable:$true] %s4007_s25 }
0x5831   :  { %s5282_s4 = scalar_lea.vmem %s4008_s25, 128  ;;  %p5287_p3 = scmp.lt.s32.totalorder %s4008_s25, %s4008_s25 }
0x5832   :  { %p5283_p2 = scmp.ne.s32.totalorder %s4008_s25, %s5282_s4  ;;  %p5288_p4 = scmp.lt.s32.totalorder %s5282_s4, %s5282_s4 }
0x5833   :  { %2955 = vrot.lane.b32.xlu0 %v5797_v10, %s5366_s5  ;;  %v4963_v10 = vpack.c.bf16 %v3898_v49, %v3897_v2 }
0x5834   :  { %p5289_p5 = por %p5288_p4, %p5287_p3 }
0x5835   :  { %4964 = vmatprep.subr.bf16.mxu1 %v4963_v10 }
0x5836   :  { %4966 = vmatpush3.bf16.msra.mxu1 %v4963_v10  ;;  %p5290_p6 = pnand %p5289_p5, %p5283_p2 }
0x589d   :  { %v3877_v15 = vpop.permute.xlu0 %3876 }
0x589e   :  { %v3879_v3 = vmul.f32 %v5235_v54, %v3877_v15 }
0x58a0   :  { %3881 = vrot.lane.b32.xlu1 %v3879_v3, %s5365_s29 }
0x58a1   :  { %v1091_v4 = vpop.permute.xlu0 %1090 }
0x58a2   :  { %1093 = vst.msk [vmem:[#allocation12] sm:$0x3] %vm365_vm6, %v1091_v4 }
0x58a4   :  { %2022 = vrot.lane.b32.xlu1 %v5688_v30, %s5366_s5 }
0x58a5   :  { %v2956_v5 = vpop.permute.xlu0 %2955 }
0x58a6   :  { %2959 = vst.msk [vmem:[#allocation12 + $0x4] sm:$0x3] %vm365_vm6, %v2956_v5 }
0x58a8   :  { %3888 = vrot.lane.b32.xlu1 %v3873_v59, %s5366_s5 }
0x5912   :  { %v3882_v6 = vpop.permute.xlu1 %3881 }
0x5913   :  { %3884 = vst.msk [vmem:[#allocation2 + $0xe] sm:$0x3] %vm365_vm6, %v3882_v6  ;;  %3886 = vst.msk [vmem:[#allocation10 + $0x6] sm:$0x3] %vm365_vm6, %v3882_v6 }
0x5916   :  { %v2023_v18 = vpop.permute.xlu1 %2022 }
0x5917   :  { %2026 = vst.msk [vmem:[#allocation12 + $0x2] sm:$0x3] %vm365_vm6, %v2023_v18 }
0x591a   :  { %v3889_v7 = vpop.permute.xlu1 %3888  ;;  %v3894_v8 = vld [vmem:[#allocation2 + $0x8] sm:$0xff] }
0x591b   :  { %3892 = vst.msk [vmem:[#allocation12 + $0x6] sm:$0x3] %vm365_vm6, %v3889_v7  ;;  %4727 = vmatmul.mubr.msk.f32.vlgmr.msra.gmra.mrb[36].mxu1 %vm159_vm5, %v3894_v8 }
0x591c   :  { %5293 = shalt.err (!%p5290_p6)
}
0x591d   :  { %s5294_s1 = scalar_lea.hbm %s5982_s9, 128 }
0x591e   :  { %p5295_p7 = scmp.ne.s32.totalorder %s5982_s9, %s5294_s1  ;;  %p5298_p8 = scmp.lt.u32.totalorder %s5294_s1, %s5982_s9 }
0x5920   :  { %p5300_p9 = pnand %p5298_p8, %p5295_p7 }
0x5922   :  { %5303 = shalt.err (!%p5300_p9)
}
0x5923   :  { %s5368_s11 = smov 2   ;;  %s5369_s15 = smov [#allocation12]  }
0x5924   :  { %4013 = dma.vmem_to_hbm [thread:$0]  %s4008_s25, 128, %s5982_s9, [#allocation11], %s5365_s29, %s5365_s29, %s5368_s11  }
0x5925   :  { %s4019_s16 = sshll.u32 %s5369_s15, 4  ;;  %s4020_s16 = int_to_ptr.vmem [resolvable:$true] %s4019_s16 }
0x5926   :  { %s5304_s5 = scalar_lea.vmem %s4020_s16, 128  ;;  %p5309_p11 = scmp.lt.s32.totalorder %s4020_s16, %s4020_s16 }
0x5927   :  { %p5305_p10 = scmp.ne.s32.totalorder %s4020_s16, %s5304_s5  ;;  %p5310_p12 = scmp.lt.s32.totalorder %s5304_s5, %s5304_s5 }
0x5929   :  { %p5311_p13 = por %p5310_p12, %p5309_p11 }
0x592b   :  { %p5312_p0 = pnand %p5311_p13, %p5305_p10 }
0x592d   :  { %5315 = shalt.err (!%p5312_p0)
}
0x592e   :  { %s5316_s14 = scalar_lea.hbm %s5983_s10, 128 }
0x592f   :  { %p5317_p1 = scmp.ne.s32.totalorder %s5983_s10, %s5316_s14  ;;  %p5320_p2 = scmp.lt.u32.totalorder %s5316_s14, %s5983_s10 }
0x5931   :  { %p5322_p3 = pnand %p5320_p2, %p5317_p1 }
0x5933   :  { %5325 = shalt.err (!%p5322_p3)
}
0x5934   :  { %4025 = dma.vmem_to_hbm [thread:$0]  %s4020_s16, 128, %s5983_s10, [#allocation11], %s5365_s29, %s5365_s29, %s5368_s11   ;;  %vm3987_vm7 = vcmask 130048  }
0x5935   :  { %v4118_v30 = vld [vmem:[%s5980_s7] ss:$0 sm:$0xff]  ;;  %s5370_s4 = smov [#allocation9]  }
0x5936   :  { %s3995_s26 = sshll.u32 %s5370_s4, 4  ;;  %s3996_s26 = int_to_ptr.vmem [resolvable:$true] %s3995_s26 }
0x5937   :  { %s5326_s0 = scalar_lea.vmem %s3996_s26, 256  ;;  %p5331_p5 = scmp.lt.s32.totalorder %s3996_s26, %s3996_s26 }
0x5938   :  { %p5327_p4 = scmp.ne.s32.totalorder %s3996_s26, %s5326_s0  ;;  %p5332_p6 = scmp.lt.s32.totalorder %s5326_s0, %s5326_s0 }
0x593a   :  { %p5333_p7 = por %p5332_p6, %p5331_p5 }
0x593c   :  { %p5334_p8 = pnand %p5333_p7, %p5327_p4 }
0x59ee   :  { %v4728_v9 = vpop.f32.mrb[36].mxu1 }
0x59ef   :  { %v3984_v11 = vadd.f32 %v4728_v9, %v4118_v30  ;;  %v3978_v12 = vpop.f32.mrb[37].mxu1 }
0x59f0   :  { %v3979_v13 = vadd.f32 %v4118_v30, %v3978_v12 }
0x59f1   :  { %3989 = vst.msk [vmem:[#allocation9 + $0x8] sm:$0xff] %vm3987_vm7, %v3984_v11 }
0x59f2   :  { %3988 = vst.msk [vmem:[#allocation9] sm:$0xff] %vm3987_vm7, %v3979_v13 }
0x59f3   :  { %5337 = shalt.err (!%p5334_p8)
}
0x59f4   :  { %s5338_s7 = scalar_lea.hbm %s5981_s8, 256 }
0x59f5   :  { %p5339_p9 = scmp.ne.s32.totalorder %s5981_s8, %s5338_s7  ;;  %p5342_p10 = scmp.lt.u32.totalorder %s5338_s7, %s5981_s8 }
0x59f7   :  { %p5344_p11 = pnand %p5342_p10, %p5339_p9 }
0x59f9   :  { %5347 = shalt.err (!%p5344_p11)
}
0x59fa   :  { %4001 = dma.vmem_to_hbm [thread:$0]  %s3996_s26, 256, %s5981_s8, [#allocation6], %s5357_s23, %s5357_s23, %s5358_s24  }
0x59fb   :  { %5352 = dma.done.wait [#allocation6], 256  }
0x59fc   :  { %5353 = vsyncadd [#allocation6], 4294967040 }
0x59fd   :  { %5354 = dma.done.wait [#allocation11], 256  }
0x59fe   :  { %5355 = vsyncadd [#allocation11], 4294967040 }
0x59ff   :  { %4035 = vsyncpa [#allocation5], 1 }
0x5a00   :  { %4036 = vsyncpa [#allocation8], 1 }
0x5a01   :  { %4037 = vsyncpa [#allocation6], 1 }
0x5a02   :  { %4038 = vsyncpa [#allocation11], 1 }

</bundles_post_ra>
